<compile_context>
chip_gen: v6e
topology: v6e:2x2x1
jax: 0.10.0
libtpu: 0.0.40
codegen_flags: <defaults>
</compile_context>

<pallas_src>
import functools

import jax
import jax.numpy as jnp
from jax.experimental import pallas as pl
from jax.experimental.pallas import tpu as pltpu


def _layernorm(x, w, b, eps=1e-5):
    # PyTorch nn.LayerNorm (biased variance, eps inside rsqrt). Fused stats
    # (E[x^2] - E[x]^2) -- fine at LN-scale activations.
    mu = jnp.mean(x, axis=-1, keepdims=True)
    ms = jnp.mean(x * x, axis=-1, keepdims=True)
    var = ms - mu * mu
    return (x - mu) * jax.lax.rsqrt(var + eps) * w + b


def _gelu(x):
    # tanh approximation of GELU (see TODO at top of file)
    c = 0.7978845608028654  # sqrt(2/pi)
    return 0.5 * x * (1.0 + jnp.tanh(c * (x + 0.044715 * x * x * x)))


def encoder_block_kernel(n_heads, hpg,
                         x_ref,                 # (1, S, D) f32 full sequence
                         ln1_w, ln1_b,
                         wq_g, bq_g, wk_g, bk_g, wv_g, bv_g,   # (G,D,gw)/(G,1,gw)
                         wo_g, bo,                              # (G,gw,D)/(1,D)
                         ln2_w, ln2_b,
                         w1c, b1c, w2c, b2,     # (C,D,fc)/(C,1,fc)/(C,fc,D)/(1,D)
                         ln3_w, ln3_b,
                         out_ref,               # (1, TS, D) f32
                         kcache, vcache,        # (G, S, gw) bf16 scratch
                         og_buf):               # (TS, gw) bf16 scratch
    f32, bf16 = jnp.float32, jnp.bfloat16
    S = x_ref.shape[1]
    D = x_ref.shape[2]
    TS = out_ref.shape[1]
    dh = D // n_heads
    G = wq_g.shape[0]
    n_ff_chunks = w1c.shape[0]
    t = pl.program_id(1)

    g1, be1 = ln1_w[0], ln1_b[0]

    # ---- K/V cache fill: LN1(full seq) + K/V projections ONCE per batch ----
    @pl.when(t == 0)
    def _fill_kv():
        xf_bf = _layernorm(x_ref[0], g1, be1).astype(bf16)          # (S, D)

        @pl.loop(0, G)
        def _(g):
            kcache[g] = (jnp.dot(xf_bf, wk_g[g],
                                 preferred_element_type=f32) + bk_g[g]).astype(bf16)
            vcache[g] = (jnp.dot(xf_bf, wv_g[g],
                                 preferred_element_type=f32) + bv_g[g]).astype(bf16)

    # ---- query / residual tile (sliced from the resident full-seq block) ----
    row0 = pl.multiple_of(t * TS, TS)
    x_q = x_ref[0, pl.ds(row0, TS), :]                               # (TS, D) f32
    xq_bf = _layernorm(x_q, g1, be1).astype(bf16)

    # ---- MHA: grouped Q / O projections, per-head softmax, deferred norm ----
    def group_body(g, attn):
        # 1/sqrt(dh) scale is already folded into wq_g / bq_g.
        qg = (jnp.dot(xq_bf, wq_g[g], preferred_element_type=f32)
              + bq_g[g]).astype(bf16)                                # (TS, gw)
        kg = kcache[g]                                               # (S, gw) bf16
        vg = vcache[g]
        for j in range(hpg):                                         # small static loop
            sl = slice(j * dh, (j + 1) * dh)
            s = jax.lax.dot_general(
                qg[:, sl], kg[:, sl],
                dimension_numbers=(((1,), (1,)), ((), ())),
                preferred_element_type=f32)                          # (TS, S)
            s = s - jnp.max(s, axis=-1, keepdims=True)
            p = jnp.exp(s)
            denom = jnp.sum(p, axis=-1, keepdims=True)               # (TS, 1)
            oh = jnp.dot(p.astype(bf16), vg[:, sl],
                         preferred_element_type=f32)                 # (TS, dh)
            # deferred softmax normalization on the small (TS, dh) result
            og_buf[:, sl] = (oh * pl.reciprocal(denom, approx=True)).astype(bf16)
        # wide (gw-contraction) output projection for the whole head group
        return attn + jnp.dot(og_buf[...], wo_g[g], preferred_element_type=f32)

    attn = jax.lax.fori_loop(0, G, group_body, jnp.zeros((TS, D), f32))
    z = attn + bo[0] + x_q                                           # residual 1

    # ---- FFN (dropout = identity at inference), chunked over d_ff ----
    zb = _layernorm(z, ln2_w[0], ln2_b[0]).astype(bf16)

    def ffn_body(c, acc):
        h = jnp.dot(zb, w1c[c], preferred_element_type=f32) + b1c[c]
        h = _gelu(h).astype(bf16)                                    # f32 GELU math
        return acc + jnp.dot(h, w2c[c], preferred_element_type=f32)

    f = jax.lax.fori_loop(0, n_ff_chunks, ffn_body, jnp.zeros((TS, D), f32))
    f = f + b2[0]

    # ---- last_norm(ffn + residual 2) ----
    out_ref[0] = _layernorm(f + z, ln3_w[0], ln3_b[0])


def _pick_seq_tile(s, target=256, minimum=64):
    """Largest multiple-of-8 divisor of S <= target; avoid tiny tiles."""
    if s <= target:
        return s
    best = None
    for ts in range(target, 7, -8):
        if s % ts == 0:
            best = ts
            break
    if best is None or best < minimum:
        return s          # fall back to no tiling rather than catastrophic tiny tiles
    return best


def _pick_ff_chunk(d_ff, target=512):
    if d_ff <= target:
        return d_ff
    for c in (512, 384, 256, 128):
        if c <= target and d_ff % c == 0:
            return c
    return d_ff


def _heads_per_group(n_heads, dh, target_lanes=256):
    """Largest divisor g of n_heads with g*dh <= target_lanes (MXU-wide slabs)."""
    for g in range(n_heads, 0, -1):
        if n_heads % g == 0 and g * dh <= target_lanes:
            return g
    return 1


def _prep_weights(params, n_heads, hpg, ff_chunk):
    """bf16 matmul weights; heads grouped to wide slabs; FFN chunked; scale folded."""
    bf16, f32 = jnp.bfloat16, jnp.float32
    D = params["wq"].shape[0]
    dh = D // n_heads
    gw = hpg * dh
    G = n_heads // hpg
    d_ff = params["w1"].shape[1]
    n_chunks = d_ff // ff_chunk
    scale = 1.0 / float(dh) ** 0.5

    def group_in(w, s=1.0):      # (D, D) -> (G, D, gw), heads along output cols
        return (jnp.asarray(w, f32) * s).reshape(D, G, gw).transpose(1, 0, 2).astype(bf16)

    def group_bias(b, s=1.0):    # (1, D) -> (G, 1, gw)
        return (jnp.asarray(b, f32) * s).reshape(G, 1, gw)

    def group_out(w):            # (D, D) -> (G, gw, D), heads along input rows
        return jnp.asarray(w, f32).reshape(G, gw, D).astype(bf16)

    w1c = (jnp.asarray(params["w1"], f32)
           .reshape(D, n_chunks, ff_chunk).transpose(1, 0, 2).astype(bf16))
    b1c = jnp.asarray(params["b1"], f32).reshape(n_chunks, 1, ff_chunk)
    w2c = jnp.asarray(params["w2"], f32).reshape(n_chunks, ff_chunk, D).astype(bf16)

    return [
        params["ln1_w"].astype(f32), params["ln1_b"].astype(f32),
        group_in(params["wq"], scale), group_bias(params["bq"], scale),
        group_in(params["wk"]), group_bias(params["bk"]),
        group_in(params["wv"]), group_bias(params["bv"]),
        group_out(params["wo"]), params["bo"].astype(f32),
        params["ln2_w"].astype(f32), params["ln2_b"].astype(f32),
        w1c, b1c, w2c, params["b2"].astype(f32),
        params["ln3_w"].astype(f32), params["ln3_b"].astype(f32),
    ]


def encoder_block(x, params, n_heads, *, seq_tile_target=256, ff_chunk_target=512,
                  head_group_lanes=256, vmem_limit_mb=64):
    B, S, D = x.shape
    assert D % n_heads == 0
    dh = D // n_heads
    d_ff = params["w1"].shape[1]
    x = x.astype(jnp.float32)

    ts = _pick_seq_tile(S, seq_tile_target)
    n_tiles = S // ts
    hpg = _heads_per_group(n_heads, dh, head_group_lanes)
    G = n_heads // hpg
    gw = hpg * dh
    ffc = _pick_ff_chunk(d_ff, ff_chunk_target)

    weights = _prep_weights(params, n_heads, hpg, ffc)
    kernel = functools.partial(encoder_block_kernel, n_heads, hpg)

    x_spec = pl.BlockSpec((1, S, D), lambda b, t: (b, 0, 0))
    out_spec = pl.BlockSpec((1, ts, D), lambda b, t: (b, t, 0))

    # Advisory cost estimate for the XLA scheduler (whole call).
    flops = 2 * B * (4 * S * D * D + 2 * S * S * D + 2 * S * D * d_ff)
    transcendentals = B * (n_heads * S * S + S * d_ff)
    bytes_accessed = 2 * B * S * D * 4 + sum(int(w.size) * w.dtype.itemsize
                                             for w in weights)

    def build(buffered_weights):
        def const_spec(a):
            nd = a.ndim
            if buffered_weights:
                # constant index map => single-buffer the resident weights
                return pl.BlockSpec(a.shape, lambda b, t, _n=nd: (0,) * _n,
                                    pipeline_mode=pl.Buffered(1))
            return pl.BlockSpec(a.shape, lambda b, t, _n=nd: (0,) * _n)

        return pl.pallas_call(
            kernel,
            out_shape=jax.ShapeDtypeStruct((B, S, D), jnp.float32),
            grid=(B, n_tiles),
            in_specs=[x_spec] + [const_spec(w) for w in weights],
            out_specs=out_spec,
            scratch_shapes=[
                pltpu.VMEM((G, S, gw), jnp.bfloat16),   # K cache (per batch)
                pltpu.VMEM((G, S, gw), jnp.bfloat16),   # V cache (per batch)
                pltpu.VMEM((ts, gw), jnp.bfloat16),     # per-group head-concat buffer
            ],
            compiler_params=pltpu.CompilerParams(
                # seq-tile axis is sequential (K/V cache carried across tiles);
                # batch axis is parallel for megacore sharding.
                dimension_semantics=("parallel", "arbitrary"),
                vmem_limit_bytes=int(vmem_limit_mb) * 1024 * 1024),
            cost_estimate=pl.CostEstimate(
                flops=flops, transcendentals=transcendentals,
                bytes_accessed=bytes_accessed),
        )

    try:
        out = build(True)(x, *weights)
        jax.block_until_ready(out)
        return out
    except Exception:
        # Fallback for jax versions that reject pl.Buffered(1) on pallas_call specs.
        return build(False)(x, *weights)


def encoder_block_ref(x, params, n_heads):
    """Pure-JAX f32 reference (same math assumptions) for a tolerance check."""
    B, S, D = x.shape
    dh = D // n_heads

    def ln(v, w, b):
        mu = jnp.mean(v, -1, keepdims=True)
        var = jnp.mean((v - mu) ** 2, -1, keepdims=True)
        return (v - mu) / jnp.sqrt(var + 1e-5) * w + b

    xn = ln(x, params["ln1_w"][0], params["ln1_b"][0])
    q = xn @ params["wq"] + params["bq"]
    k = xn @ params["wk"] + params["bk"]
    v = xn @ params["wv"] + params["bv"]

    def split(a):
        return a.reshape(B, S, n_heads, dh).transpose(0, 2, 1, 3)

    qh, kh, vh = split(q), split(k), split(v)
    s = jnp.einsum("bhqd,bhkd->bhqk", qh, kh) / jnp.sqrt(float(dh))
    p = jax.nn.softmax(s, axis=-1)
    o = jnp.einsum("bhqk,bhkd->bhqd", p, vh).transpose(0, 2, 1, 3).reshape(B, S, D)
    attn = o @ params["wo"] + params["bo"]
    z = attn + x
    zn = ln(z, params["ln2_w"][0], params["ln2_b"][0])
    h = zn @ params["w1"] + params["b1"]
    h = 0.5 * h * (1.0 + jnp.tanh(0.7978845608028654 * (h + 0.044715 * h ** 3)))
    f = h @ params["w2"] + params["b2"]
    return ln(f + z, params["ln3_w"][0], params["ln3_b"][0])


def init_params(key, d_model, d_ff):
    ks = jax.random.split(key, 18)

    def lin_w(k, din, dout):
        return jax.random.normal(k, (din, dout), jnp.float32) / jnp.sqrt(float(din))

    def row(k, d, scale=0.02):
        return scale * jax.random.normal(k, (1, d), jnp.float32)

    return {
        "ln1_w": 1.0 + row(ks[0], d_model), "ln1_b": row(ks[1], d_model),
        "wq": lin_w(ks[2], d_model, d_model), "bq": row(ks[3], d_model),
        "wk": lin_w(ks[4], d_model, d_model), "bk": row(ks[5], d_model),
        "wv": lin_w(ks[6], d_model, d_model), "bv": row(ks[7], d_model),
        "wo": lin_w(ks[8], d_model, d_model), "bo": row(ks[9], d_model),
        "ln2_w": 1.0 + row(ks[10], d_model), "ln2_b": row(ks[11], d_model),
        "w1": lin_w(ks[12], d_model, d_ff), "b1": row(ks[13], d_ff),
        "w2": lin_w(ks[14], d_ff, d_model), "b2": row(ks[15], d_model),
        "ln3_w": 1.0 + row(ks[16], d_model), "ln3_b": row(ks[17], d_model),
    }


if __name__ == "__main__":
    # Small shapes consistent with the module: (batch, seq_len, d_model)
    B, S, D, H, D_FF = 2, 8, 32, 4, 64

    key = jax.random.PRNGKey(0)
    kx, kp = jax.random.split(key)
    x = jax.random.normal(kx, (B, S, D), jnp.float32)
    params = init_params(kp, D, D_FF)

    out = encoder_block(x, params, n_heads=H)
    out = jax.block_until_ready(out)
    assert out.shape == (B, S, D) and out.dtype == jnp.float32
    assert bool(jnp.all(jnp.isfinite(out)))

    # Tolerance check vs a pure-JAX f32 reference (bf16 matmuls + approx recip).
    ref = encoder_block_ref(x, params, H)
    err = float(jnp.max(jnp.abs(out - ref)))
    assert err < 0.15, f"max abs err vs reference: {err}"

    print("KERNEL_OK")
</pallas_src>

<mosaic_0001>
module attributes {stable_mosaic.version = 11 : i64} {
  func.func @encoder_block_kernel(%arg0: i32, %arg1: i32, %arg2: memref<1x8x32xf32, #tpu.memory_space<vmem>>, %arg3: memref<1x32xf32, #tpu.memory_space<vmem>>, %arg4: memref<1x32xf32, #tpu.memory_space<vmem>>, %arg5: memref<1x32x32xbf16, #tpu.memory_space<vmem>>, %arg6: memref<1x1x32xf32, #tpu.memory_space<vmem>>, %arg7: memref<1x32x32xbf16, #tpu.memory_space<vmem>>, %arg8: memref<1x1x32xf32, #tpu.memory_space<vmem>>, %arg9: memref<1x32x32xbf16, #tpu.memory_space<vmem>>, %arg10: memref<1x1x32xf32, #tpu.memory_space<vmem>>, %arg11: memref<1x32x32xbf16, #tpu.memory_space<vmem>>, %arg12: memref<1x32xf32, #tpu.memory_space<vmem>>, %arg13: memref<1x32xf32, #tpu.memory_space<vmem>>, %arg14: memref<1x32xf32, #tpu.memory_space<vmem>>, %arg15: memref<1x32x64xbf16, #tpu.memory_space<vmem>>, %arg16: memref<1x1x64xf32, #tpu.memory_space<vmem>>, %arg17: memref<1x64x32xbf16, #tpu.memory_space<vmem>>, %arg18: memref<1x32xf32, #tpu.memory_space<vmem>>, %arg19: memref<1x32xf32, #tpu.memory_space<vmem>>, %arg20: memref<1x32xf32, #tpu.memory_space<vmem>>, %arg21: memref<1x8x32xf32, #tpu.memory_space<vmem>>, %arg22: memref<1x8x32xbf16, #tpu.memory_space<vmem>>, %arg23: memref<1x8x32xbf16, #tpu.memory_space<vmem>>, %arg24: memref<8x32xbf16, #tpu.memory_space<vmem>>) attributes {dimension_semantics = [#tpu.dimension_semantics<parallel>, #tpu.dimension_semantics<arbitrary>], iteration_bounds = array<i64: 2, 1>, scalar_prefetch = 0 : i64, scratch_operands = 3 : i64, tpu.core_type = #tpu.core_type<tc>, window_params = [{transform_indices = @transform_0, window_bounds = array<i64: 1, 8, 32>}, {pipeline_mode = #tpu.pipeline_mode<synchronous>, transform_indices = @transform_1, window_bounds = array<i64: 1, 32>}, {pipeline_mode = #tpu.pipeline_mode<synchronous>, transform_indices = @transform_2, window_bounds = array<i64: 1, 32>}, {pipeline_mode = #tpu.pipeline_mode<synchronous>, transform_indices = @transform_3, window_bounds = array<i64: 1, 32, 32>}, {pipeline_mode = #tpu.pipeline_mode<synchronous>, transform_indices = @transform_4, window_bounds = array<i64: 1, 1, 32>}, {pipeline_mode = #tpu.pipeline_mode<synchronous>, transform_indices = @transform_5, window_bounds = array<i64: 1, 32, 32>}, {pipeline_mode = #tpu.pipeline_mode<synchronous>, transform_indices = @transform_6, window_bounds = array<i64: 1, 1, 32>}, {pipeline_mode = #tpu.pipeline_mode<synchronous>, transform_indices = @transform_7, window_bounds = array<i64: 1, 32, 32>}, {pipeline_mode = #tpu.pipeline_mode<synchronous>, transform_indices = @transform_8, window_bounds = array<i64: 1, 1, 32>}, {pipeline_mode = #tpu.pipeline_mode<synchronous>, transform_indices = @transform_9, window_bounds = array<i64: 1, 32, 32>}, {pipeline_mode = #tpu.pipeline_mode<synchronous>, transform_indices = @transform_10, window_bounds = array<i64: 1, 32>}, {pipeline_mode = #tpu.pipeline_mode<synchronous>, transform_indices = @transform_11, window_bounds = array<i64: 1, 32>}, {pipeline_mode = #tpu.pipeline_mode<synchronous>, transform_indices = @transform_12, window_bounds = array<i64: 1, 32>}, {pipeline_mode = #tpu.pipeline_mode<synchronous>, transform_indices = @transform_13, window_bounds = array<i64: 1, 32, 64>}, {pipeline_mode = #tpu.pipeline_mode<synchronous>, transform_indices = @transform_14, window_bounds = array<i64: 1, 1, 64>}, {pipeline_mode = #tpu.pipeline_mode<synchronous>, transform_indices = @transform_15, window_bounds = array<i64: 1, 64, 32>}, {pipeline_mode = #tpu.pipeline_mode<synchronous>, transform_indices = @transform_16, window_bounds = array<i64: 1, 32>}, {pipeline_mode = #tpu.pipeline_mode<synchronous>, transform_indices = @transform_17, window_bounds = array<i64: 1, 32>}, {pipeline_mode = #tpu.pipeline_mode<synchronous>, transform_indices = @transform_18, window_bounds = array<i64: 1, 32>}, {transform_indices = @transform_19, window_bounds = array<i64: 1, 8, 32>}]} {
    %c0 = arith.constant 0 : index
    %c0_0 = arith.constant 0 : index
    %0 = vector.load %arg3[%c0, %c0_0] : memref<1x32xf32, #tpu.memory_space<vmem>>, vector<1x32xf32>
    %1 = vector.shape_cast %0 : vector<1x32xf32> to vector<32xf32>
    %c0_1 = arith.constant 0 : index
    %c0_2 = arith.constant 0 : index
    %2 = vector.load %arg4[%c0_1, %c0_2] : memref<1x32xf32, #tpu.memory_space<vmem>>, vector<1x32xf32>
    %3 = vector.shape_cast %2 : vector<1x32xf32> to vector<32xf32>
    %c0_i32 = arith.constant 0 : i32
    %4 = arith.cmpi eq, %arg1, %c0_i32 : i32
    %5 = arith.extui %4 : i1 to i32
    %c0_i32_3 = arith.constant 0 : i32
    %6 = arith.cmpi ne, %5, %c0_i32_3 : i32
    scf.if %6 {
      %c0_87 = arith.constant 0 : index
      %c0_88 = arith.constant 0 : index
      %c0_89 = arith.constant 0 : index
      %233 = vector.load %arg2[%c0_87, %c0_88, %c0_89] : memref<1x8x32xf32, #tpu.memory_space<vmem>>, vector<1x8x32xf32>
      %234 = vector.shape_cast %233 : vector<1x8x32xf32> to vector<8x32xf32>
      %cst_90 = arith.constant dense<0.000000e+00> : vector<8xf32>
      %235 = vector.multi_reduction <add>, %234, %cst_90 [1] : vector<8x32xf32> to vector<8xf32>
      %236 = vector.shape_cast %235 : vector<8xf32> to vector<8x1xf32>
      %cst_91 = arith.constant 3.200000e+01 : f32
      %237 = vector.broadcast %cst_91 : f32 to vector<8x1xf32>
      %238 = arith.divf %236, %237 : vector<8x1xf32>
      %239 = arith.mulf %234, %234 : vector<8x32xf32>
      %cst_92 = arith.constant dense<0.000000e+00> : vector<8xf32>
      %240 = vector.multi_reduction <add>, %239, %cst_92 [1] : vector<8x32xf32> to vector<8xf32>
      %241 = vector.shape_cast %240 : vector<8xf32> to vector<8x1xf32>
      %cst_93 = arith.constant 3.200000e+01 : f32
      %242 = vector.broadcast %cst_93 : f32 to vector<8x1xf32>
      %243 = arith.divf %241, %242 : vector<8x1xf32>
      %244 = arith.mulf %238, %238 : vector<8x1xf32>
      %245 = arith.subf %243, %244 : vector<8x1xf32>
      %246 = vector.broadcast %238 : vector<8x1xf32> to vector<8x32xf32>
      %247 = arith.subf %234, %246 : vector<8x32xf32>
      %cst_94 = arith.constant 9.99999974E-6 : f32
      %248 = vector.broadcast %cst_94 : f32 to vector<8x1xf32>
      %249 = arith.addf %245, %248 : vector<8x1xf32>
      %250 = math.rsqrt %249 : vector<8x1xf32>
      %251 = vector.broadcast %250 : vector<8x1xf32> to vector<8x32xf32>
      %252 = arith.mulf %247, %251 : vector<8x32xf32>
      %253 = vector.shape_cast %1 : vector<32xf32> to vector<1x32xf32>
      %254 = vector.broadcast %253 : vector<1x32xf32> to vector<8x32xf32>
      %255 = arith.mulf %252, %254 : vector<8x32xf32>
      %256 = vector.shape_cast %3 : vector<32xf32> to vector<1x32xf32>
      %257 = vector.broadcast %256 : vector<1x32xf32> to vector<8x32xf32>
      %258 = arith.addf %255, %257 : vector<8x32xf32>
      %259 = arith.truncf %258 : vector<8x32xf32> to vector<8x32xbf16>
      %c0_i32_95 = arith.constant 0 : i32
      %c1_i32_96 = arith.constant 1 : i32
      %260 = arith.muli %c0_i32_95, %c1_i32_96 : i32
      %c0_i32_97 = arith.constant 0 : i32
      %261 = arith.addi %c0_i32_97, %260 : i32
      %262 = arith.index_cast %261 : i32 to index
      %c0_98 = arith.constant 0 : index
      %c0_99 = arith.constant 0 : index
      %263 = vector.load %arg7[%262, %c0_98, %c0_99] : memref<1x32x32xbf16, #tpu.memory_space<vmem>>, vector<1x32x32xbf16>
      %264 = vector.shape_cast %263 : vector<1x32x32xbf16> to vector<32x32xbf16>
      %cst_100 = arith.constant dense<0.000000e+00> : vector<8x32xf32>
      %265 = tpu.matmul %259, %264, %cst_100 {dimension_numbers = #tpu.dot_dimension_numbers<[1], [0], [0], [1], [0, 0, 1, 1], [], []>} : vector<8x32xbf16>, vector<32x32xbf16>, vector<8x32xf32> -> vector<8x32xf32>
      %266 = arith.index_cast %261 : i32 to index
      %c0_101 = arith.constant 0 : index
      %c0_102 = arith.constant 0 : index
      %267 = vector.load %arg8[%266, %c0_101, %c0_102] : memref<1x1x32xf32, #tpu.memory_space<vmem>>, vector<1x1x32xf32>
      %268 = vector.shape_cast %267 : vector<1x1x32xf32> to vector<1x32xf32>
      %269 = vector.broadcast %268 : vector<1x32xf32> to vector<8x32xf32>
      %270 = arith.addf %265, %269 : vector<8x32xf32>
      %271 = arith.truncf %270 : vector<8x32xf32> to vector<8x32xbf16>
      %272 = arith.index_cast %261 : i32 to index
      %c0_103 = arith.constant 0 : index
      %c0_104 = arith.constant 0 : index
      %273 = vector.load %arg22[%272, %c0_103, %c0_104] : memref<1x8x32xbf16, #tpu.memory_space<vmem>>, vector<1x8x32xbf16>
      %274 = vector.shape_cast %273 : vector<1x8x32xbf16> to vector<8x32xbf16>
      %275 = vector.shape_cast %271 : vector<8x32xbf16> to vector<1x8x32xbf16>
      tpu.vector_store %arg22[%272, %c0_103, %c0_104], %275 {strides = array<i32>} : memref<1x8x32xbf16, #tpu.memory_space<vmem>>, vector<1x8x32xbf16>,
      %276 = arith.index_cast %261 : i32 to index
      %c0_105 = arith.constant 0 : index
      %c0_106 = arith.constant 0 : index
      %277 = vector.load %arg9[%276, %c0_105, %c0_106] : memref<1x32x32xbf16, #tpu.memory_space<vmem>>, vector<1x32x32xbf16>
      %278 = vector.shape_cast %277 : vector<1x32x32xbf16> to vector<32x32xbf16>
      %cst_107 = arith.constant dense<0.000000e+00> : vector<8x32xf32>
      %279 = tpu.matmul %259, %278, %cst_107 {dimension_numbers = #tpu.dot_dimension_numbers<[1], [0], [0], [1], [0, 0, 1, 1], [], []>} : vector<8x32xbf16>, vector<32x32xbf16>, vector<8x32xf32> -> vector<8x32xf32>
      %280 = arith.index_cast %261 : i32 to index
      %c0_108 = arith.constant 0 : index
      %c0_109 = arith.constant 0 : index
      %281 = vector.load %arg10[%280, %c0_108, %c0_109] : memref<1x1x32xf32, #tpu.memory_space<vmem>>, vector<1x1x32xf32>
      %282 = vector.shape_cast %281 : vector<1x1x32xf32> to vector<1x32xf32>
      %283 = vector.broadcast %282 : vector<1x32xf32> to vector<8x32xf32>
      %284 = arith.addf %279, %283 : vector<8x32xf32>
      %285 = arith.truncf %284 : vector<8x32xf32> to vector<8x32xbf16>
      %286 = arith.index_cast %261 : i32 to index
      %c0_110 = arith.constant 0 : index
      %c0_111 = arith.constant 0 : index
      %287 = vector.load %arg23[%286, %c0_110, %c0_111] : memref<1x8x32xbf16, #tpu.memory_space<vmem>>, vector<1x8x32xbf16>
      %288 = vector.shape_cast %287 : vector<1x8x32xbf16> to vector<8x32xbf16>
      %289 = vector.shape_cast %285 : vector<8x32xbf16> to vector<1x8x32xbf16>
      tpu.vector_store %arg23[%286, %c0_110, %c0_111], %289 {strides = array<i32>} : memref<1x8x32xbf16, #tpu.memory_space<vmem>>, vector<1x8x32xbf16>,
      %c1_i32_112 = arith.constant 1 : i32
    } else {
    }
    %c8_i32 = arith.constant 8 : i32
    %7 = arith.muli %arg1, %c8_i32 : i32
    %8 = tpu.assume_multiple %7, 8 : i32
    %c0_4 = arith.constant 0 : index
    %9 = arith.index_cast %8 : i32 to index
    %c0_5 = arith.constant 0 : index
    %10 = vector.load %arg2[%c0_4, %9, %c0_5] : memref<1x8x32xf32, #tpu.memory_space<vmem>>, vector<1x8x32xf32>
    %11 = vector.shape_cast %10 : vector<1x8x32xf32> to vector<8x32xf32>
    %cst = arith.constant dense<0.000000e+00> : vector<8xf32>
    %12 = vector.multi_reduction <add>, %11, %cst [1] : vector<8x32xf32> to vector<8xf32>
    %13 = vector.shape_cast %12 : vector<8xf32> to vector<8x1xf32>
    %cst_6 = arith.constant 3.200000e+01 : f32
    %14 = vector.broadcast %cst_6 : f32 to vector<8x1xf32>
    %15 = arith.divf %13, %14 : vector<8x1xf32>
    %16 = arith.mulf %11, %11 : vector<8x32xf32>
    %cst_7 = arith.constant dense<0.000000e+00> : vector<8xf32>
    %17 = vector.multi_reduction <add>, %16, %cst_7 [1] : vector<8x32xf32> to vector<8xf32>
    %18 = vector.shape_cast %17 : vector<8xf32> to vector<8x1xf32>
    %cst_8 = arith.constant 3.200000e+01 : f32
    %19 = vector.broadcast %cst_8 : f32 to vector<8x1xf32>
    %20 = arith.divf %18, %19 : vector<8x1xf32>
    %21 = arith.mulf %15, %15 : vector<8x1xf32>
    %22 = arith.subf %20, %21 : vector<8x1xf32>
    %23 = vector.broadcast %15 : vector<8x1xf32> to vector<8x32xf32>
    %24 = arith.subf %11, %23 : vector<8x32xf32>
    %cst_9 = arith.constant 9.99999974E-6 : f32
    %25 = vector.broadcast %cst_9 : f32 to vector<8x1xf32>
    %26 = arith.addf %22, %25 : vector<8x1xf32>
    %27 = math.rsqrt %26 : vector<8x1xf32>
    %28 = vector.broadcast %27 : vector<8x1xf32> to vector<8x32xf32>
    %29 = arith.mulf %24, %28 : vector<8x32xf32>
    %30 = vector.shape_cast %1 : vector<32xf32> to vector<1x32xf32>
    %31 = vector.broadcast %30 : vector<1x32xf32> to vector<8x32xf32>
    %32 = arith.mulf %29, %31 : vector<8x32xf32>
    %33 = vector.shape_cast %3 : vector<32xf32> to vector<1x32xf32>
    %34 = vector.broadcast %33 : vector<1x32xf32> to vector<8x32xf32>
    %35 = arith.addf %32, %34 : vector<8x32xf32>
    %36 = arith.truncf %35 : vector<8x32xf32> to vector<8x32xbf16>
    %cst_10 = arith.constant 0.000000e+00 : f32
    %37 = vector.broadcast %cst_10 : f32 to vector<8x32xf32>
    %c0_i32_11 = arith.constant 0 : i32
    %38 = arith.index_cast %c0_i32_11 : i32 to index
    %c0_12 = arith.constant 0 : index
    %c0_13 = arith.constant 0 : index
    %39 = vector.load %arg5[%38, %c0_12, %c0_13] : memref<1x32x32xbf16, #tpu.memory_space<vmem>>, vector<1x32x32xbf16>
    %40 = vector.shape_cast %39 : vector<1x32x32xbf16> to vector<32x32xbf16>
    %cst_14 = arith.constant dense<0.000000e+00> : vector<8x32xf32>
    %41 = tpu.matmul %36, %40, %cst_14 {dimension_numbers = #tpu.dot_dimension_numbers<[1], [0], [0], [1], [0, 0, 1, 1], [], []>} : vector<8x32xbf16>, vector<32x32xbf16>, vector<8x32xf32> -> vector<8x32xf32>
    %42 = arith.index_cast %c0_i32_11 : i32 to index
    %c0_15 = arith.constant 0 : index
    %c0_16 = arith.constant 0 : index
    %43 = vector.load %arg6[%42, %c0_15, %c0_16] : memref<1x1x32xf32, #tpu.memory_space<vmem>>, vector<1x1x32xf32>
    %44 = vector.shape_cast %43 : vector<1x1x32xf32> to vector<1x32xf32>
    %45 = vector.broadcast %44 : vector<1x32xf32> to vector<8x32xf32>
    %46 = arith.addf %41, %45 : vector<8x32xf32>
    %47 = arith.truncf %46 : vector<8x32xf32> to vector<8x32xbf16>
    %48 = arith.index_cast %c0_i32_11 : i32 to index
    %c0_17 = arith.constant 0 : index
    %c0_18 = arith.constant 0 : index
    %49 = vector.load %arg22[%48, %c0_17, %c0_18] : memref<1x8x32xbf16, #tpu.memory_space<vmem>>, vector<1x8x32xbf16>
    %50 = vector.shape_cast %49 : vector<1x8x32xbf16> to vector<8x32xbf16>
    %51 = arith.index_cast %c0_i32_11 : i32 to index
    %c0_19 = arith.constant 0 : index
    %c0_20 = arith.constant 0 : index
    %52 = vector.load %arg23[%51, %c0_19, %c0_20] : memref<1x8x32xbf16, #tpu.memory_space<vmem>>, vector<1x8x32xbf16>
    %53 = vector.shape_cast %52 : vector<1x8x32xbf16> to vector<8x32xbf16>
    %54 = vector.extract_strided_slice %47 {offsets = [0, 0], sizes = [8, 8], strides = [1, 1]} : vector<8x32xbf16> to vector<8x8xbf16>
    %55 = vector.extract_strided_slice %50 {offsets = [0, 0], sizes = [8, 8], strides = [1, 1]} : vector<8x32xbf16> to vector<8x8xbf16>
    %cst_21 = arith.constant dense<0.000000e+00> : vector<8x8xf32>
    %56 = tpu.matmul %54, %55, %cst_21 {dimension_numbers = #tpu.dot_dimension_numbers<[1], [1], [0], [0], [0, 0, 1, 0], [], []>} : vector<8x8xbf16>, vector<8x8xbf16>, vector<8x8xf32> -> vector<8x8xf32>
    %cst_22 = arith.constant dense<0xFF800000> : vector<8xf32>
    %57 = vector.multi_reduction <maximumf>, %56, %cst_22 [1] : vector<8x8xf32> to vector<8xf32>
    %58 = vector.shape_cast %57 : vector<8xf32> to vector<8x1xf32>
    %59 = vector.broadcast %58 : vector<8x1xf32> to vector<8x8xf32>
    %60 = arith.subf %56, %59 : vector<8x8xf32>
    %61 = math.exp %60 : vector<8x8xf32>
    %cst_23 = arith.constant dense<0.000000e+00> : vector<8xf32>
    %62 = vector.multi_reduction <add>, %61, %cst_23 [1] : vector<8x8xf32> to vector<8xf32>
    %63 = vector.shape_cast %62 : vector<8xf32> to vector<8x1xf32>
    %64 = arith.truncf %61 : vector<8x8xf32> to vector<8x8xbf16>
    %65 = vector.extract_strided_slice %53 {offsets = [0, 0], sizes = [8, 8], strides = [1, 1]} : vector<8x32xbf16> to vector<8x8xbf16>
    %cst_24 = arith.constant dense<0.000000e+00> : vector<8x8xf32>
    %66 = tpu.matmul %64, %65, %cst_24 {dimension_numbers = #tpu.dot_dimension_numbers<[1], [0], [0], [1], [0, 0, 1, 1], [], []>} : vector<8x8xbf16>, vector<8x8xbf16>, vector<8x8xf32> -> vector<8x8xf32>
    %67 = tpu.reciprocal %63 {approx = true} : vector<8x1xf32> -> vector<8x1xf32>
    %68 = vector.broadcast %67 : vector<8x1xf32> to vector<8x8xf32>
    %69 = arith.mulf %66, %68 : vector<8x8xf32>
    %70 = arith.truncf %69 : vector<8x8xf32> to vector<8x8xbf16>
    %c0_25 = arith.constant 0 : index
    %c0_26 = arith.constant 0 : index
    %71 = vector.load %arg24[%c0_25, %c0_26] : memref<8x32xbf16, #tpu.memory_space<vmem>>, vector<8x8xbf16>
    tpu.vector_store %arg24[%c0_25, %c0_26], %70 {strides = array<i32>} : memref<8x32xbf16, #tpu.memory_space<vmem>>, vector<8x8xbf16>,
    %72 = vector.extract_strided_slice %47 {offsets = [0, 8], sizes = [8, 8], strides = [1, 1]} : vector<8x32xbf16> to vector<8x8xbf16>
    %73 = vector.extract_strided_slice %50 {offsets = [0, 8], sizes = [8, 8], strides = [1, 1]} : vector<8x32xbf16> to vector<8x8xbf16>
    %cst_27 = arith.constant dense<0.000000e+00> : vector<8x8xf32>
    %74 = tpu.matmul %72, %73, %cst_27 {dimension_numbers = #tpu.dot_dimension_numbers<[1], [1], [0], [0], [0, 0, 1, 0], [], []>} : vector<8x8xbf16>, vector<8x8xbf16>, vector<8x8xf32> -> vector<8x8xf32>
    %cst_28 = arith.constant dense<0xFF800000> : vector<8xf32>
    %75 = vector.multi_reduction <maximumf>, %74, %cst_28 [1] : vector<8x8xf32> to vector<8xf32>
    %76 = vector.shape_cast %75 : vector<8xf32> to vector<8x1xf32>
    %77 = vector.broadcast %76 : vector<8x1xf32> to vector<8x8xf32>
    %78 = arith.subf %74, %77 : vector<8x8xf32>
    %79 = math.exp %78 : vector<8x8xf32>
    %cst_29 = arith.constant dense<0.000000e+00> : vector<8xf32>
    %80 = vector.multi_reduction <add>, %79, %cst_29 [1] : vector<8x8xf32> to vector<8xf32>
    %81 = vector.shape_cast %80 : vector<8xf32> to vector<8x1xf32>
    %82 = arith.truncf %79 : vector<8x8xf32> to vector<8x8xbf16>
    %83 = vector.extract_strided_slice %53 {offsets = [0, 8], sizes = [8, 8], strides = [1, 1]} : vector<8x32xbf16> to vector<8x8xbf16>
    %cst_30 = arith.constant dense<0.000000e+00> : vector<8x8xf32>
    %84 = tpu.matmul %82, %83, %cst_30 {dimension_numbers = #tpu.dot_dimension_numbers<[1], [0], [0], [1], [0, 0, 1, 1], [], []>} : vector<8x8xbf16>, vector<8x8xbf16>, vector<8x8xf32> -> vector<8x8xf32>
    %85 = tpu.reciprocal %81 {approx = true} : vector<8x1xf32> -> vector<8x1xf32>
    %86 = vector.broadcast %85 : vector<8x1xf32> to vector<8x8xf32>
    %87 = arith.mulf %84, %86 : vector<8x8xf32>
    %88 = arith.truncf %87 : vector<8x8xf32> to vector<8x8xbf16>
    %c0_31 = arith.constant 0 : index
    %c8 = arith.constant 8 : index
    %89 = vector.load %arg24[%c0_31, %c8] : memref<8x32xbf16, #tpu.memory_space<vmem>>, vector<8x8xbf16>
    tpu.vector_store %arg24[%c0_31, %c8], %88 {strides = array<i32>} : memref<8x32xbf16, #tpu.memory_space<vmem>>, vector<8x8xbf16>,
    %90 = vector.extract_strided_slice %47 {offsets = [0, 16], sizes = [8, 8], strides = [1, 1]} : vector<8x32xbf16> to vector<8x8xbf16>
    %91 = vector.extract_strided_slice %50 {offsets = [0, 16], sizes = [8, 8], strides = [1, 1]} : vector<8x32xbf16> to vector<8x8xbf16>
    %cst_32 = arith.constant dense<0.000000e+00> : vector<8x8xf32>
    %92 = tpu.matmul %90, %91, %cst_32 {dimension_numbers = #tpu.dot_dimension_numbers<[1], [1], [0], [0], [0, 0, 1, 0], [], []>} : vector<8x8xbf16>, vector<8x8xbf16>, vector<8x8xf32> -> vector<8x8xf32>
    %cst_33 = arith.constant dense<0xFF800000> : vector<8xf32>
    %93 = vector.multi_reduction <maximumf>, %92, %cst_33 [1] : vector<8x8xf32> to vector<8xf32>
    %94 = vector.shape_cast %93 : vector<8xf32> to vector<8x1xf32>
    %95 = vector.broadcast %94 : vector<8x1xf32> to vector<8x8xf32>
    %96 = arith.subf %92, %95 : vector<8x8xf32>
    %97 = math.exp %96 : vector<8x8xf32>
    %cst_34 = arith.constant dense<0.000000e+00> : vector<8xf32>
    %98 = vector.multi_reduction <add>, %97, %cst_34 [1] : vector<8x8xf32> to vector<8xf32>
    %99 = vector.shape_cast %98 : vector<8xf32> to vector<8x1xf32>
    %100 = arith.truncf %97 : vector<8x8xf32> to vector<8x8xbf16>
    %101 = vector.extract_strided_slice %53 {offsets = [0, 16], sizes = [8, 8], strides = [1, 1]} : vector<8x32xbf16> to vector<8x8xbf16>
    %cst_35 = arith.constant dense<0.000000e+00> : vector<8x8xf32>
    %102 = tpu.matmul %100, %101, %cst_35 {dimension_numbers = #tpu.dot_dimension_numbers<[1], [0], [0], [1], [0, 0, 1, 1], [], []>} : vector<8x8xbf16>, vector<8x8xbf16>, vector<8x8xf32> -> vector<8x8xf32>
    %103 = tpu.reciprocal %99 {approx = true} : vector<8x1xf32> -> vector<8x1xf32>
    %104 = vector.broadcast %103 : vector<8x1xf32> to vector<8x8xf32>
    %105 = arith.mulf %102, %104 : vector<8x8xf32>
    %106 = arith.truncf %105 : vector<8x8xf32> to vector<8x8xbf16>
    %c0_36 = arith.constant 0 : index
    %c16 = arith.constant 16 : index
    %107 = vector.load %arg24[%c0_36, %c16] : memref<8x32xbf16, #tpu.memory_space<vmem>>, vector<8x8xbf16>
    tpu.vector_store %arg24[%c0_36, %c16], %106 {strides = array<i32>} : memref<8x32xbf16, #tpu.memory_space<vmem>>, vector<8x8xbf16>,
    %108 = vector.extract_strided_slice %47 {offsets = [0, 24], sizes = [8, 8], strides = [1, 1]} : vector<8x32xbf16> to vector<8x8xbf16>
    %109 = vector.extract_strided_slice %50 {offsets = [0, 24], sizes = [8, 8], strides = [1, 1]} : vector<8x32xbf16> to vector<8x8xbf16>
    %cst_37 = arith.constant dense<0.000000e+00> : vector<8x8xf32>
    %110 = tpu.matmul %108, %109, %cst_37 {dimension_numbers = #tpu.dot_dimension_numbers<[1], [1], [0], [0], [0, 0, 1, 0], [], []>} : vector<8x8xbf16>, vector<8x8xbf16>, vector<8x8xf32> -> vector<8x8xf32>
    %cst_38 = arith.constant dense<0xFF800000> : vector<8xf32>
    %111 = vector.multi_reduction <maximumf>, %110, %cst_38 [1] : vector<8x8xf32> to vector<8xf32>
    %112 = vector.shape_cast %111 : vector<8xf32> to vector<8x1xf32>
    %113 = vector.broadcast %112 : vector<8x1xf32> to vector<8x8xf32>
    %114 = arith.subf %110, %113 : vector<8x8xf32>
    %115 = math.exp %114 : vector<8x8xf32>
    %cst_39 = arith.constant dense<0.000000e+00> : vector<8xf32>
    %116 = vector.multi_reduction <add>, %115, %cst_39 [1] : vector<8x8xf32> to vector<8xf32>
    %117 = vector.shape_cast %116 : vector<8xf32> to vector<8x1xf32>
    %118 = arith.truncf %115 : vector<8x8xf32> to vector<8x8xbf16>
    %119 = vector.extract_strided_slice %53 {offsets = [0, 24], sizes = [8, 8], strides = [1, 1]} : vector<8x32xbf16> to vector<8x8xbf16>
    %cst_40 = arith.constant dense<0.000000e+00> : vector<8x8xf32>
    %120 = tpu.matmul %118, %119, %cst_40 {dimension_numbers = #tpu.dot_dimension_numbers<[1], [0], [0], [1], [0, 0, 1, 1], [], []>} : vector<8x8xbf16>, vector<8x8xbf16>, vector<8x8xf32> -> vector<8x8xf32>
    %121 = tpu.reciprocal %117 {approx = true} : vector<8x1xf32> -> vector<8x1xf32>
    %122 = vector.broadcast %121 : vector<8x1xf32> to vector<8x8xf32>
    %123 = arith.mulf %120, %122 : vector<8x8xf32>
    %124 = arith.truncf %123 : vector<8x8xf32> to vector<8x8xbf16>
    %c0_41 = arith.constant 0 : index
    %c24 = arith.constant 24 : index
    %125 = vector.load %arg24[%c0_41, %c24] : memref<8x32xbf16, #tpu.memory_space<vmem>>, vector<8x8xbf16>
    tpu.vector_store %arg24[%c0_41, %c24], %124 {strides = array<i32>} : memref<8x32xbf16, #tpu.memory_space<vmem>>, vector<8x8xbf16>,
    %c0_42 = arith.constant 0 : index
    %c0_43 = arith.constant 0 : index
    %126 = vector.load %arg24[%c0_42, %c0_43] : memref<8x32xbf16, #tpu.memory_space<vmem>>, vector<8x32xbf16>
    %127 = arith.index_cast %c0_i32_11 : i32 to index
    %c0_44 = arith.constant 0 : index
    %c0_45 = arith.constant 0 : index
    %128 = vector.load %arg11[%127, %c0_44, %c0_45] : memref<1x32x32xbf16, #tpu.memory_space<vmem>>, vector<1x32x32xbf16>
    %129 = vector.shape_cast %128 : vector<1x32x32xbf16> to vector<32x32xbf16>
    %cst_46 = arith.constant dense<0.000000e+00> : vector<8x32xf32>
    %130 = tpu.matmul %126, %129, %cst_46 {dimension_numbers = #tpu.dot_dimension_numbers<[1], [0], [0], [1], [0, 0, 1, 1], [], []>} : vector<8x32xbf16>, vector<32x32xbf16>, vector<8x32xf32> -> vector<8x32xf32>
    %131 = arith.addf %37, %130 : vector<8x32xf32>
    %c1_i32 = arith.constant 1 : i32
    %c0_47 = arith.constant 0 : index
    %c0_48 = arith.constant 0 : index
    %132 = vector.load %arg12[%c0_47, %c0_48] : memref<1x32xf32, #tpu.memory_space<vmem>>, vector<1x32xf32>
    %133 = vector.shape_cast %132 : vector<1x32xf32> to vector<32xf32>
    %134 = vector.shape_cast %133 : vector<32xf32> to vector<1x32xf32>
    %135 = vector.broadcast %134 : vector<1x32xf32> to vector<8x32xf32>
    %136 = arith.addf %131, %135 : vector<8x32xf32>
    %137 = arith.addf %136, %11 : vector<8x32xf32>
    %c0_49 = arith.constant 0 : index
    %c0_50 = arith.constant 0 : index
    %138 = vector.load %arg13[%c0_49, %c0_50] : memref<1x32xf32, #tpu.memory_space<vmem>>, vector<1x32xf32>
    %139 = vector.shape_cast %138 : vector<1x32xf32> to vector<32xf32>
    %c0_51 = arith.constant 0 : index
    %c0_52 = arith.constant 0 : index
    %140 = vector.load %arg14[%c0_51, %c0_52] : memref<1x32xf32, #tpu.memory_space<vmem>>, vector<1x32xf32>
    %141 = vector.shape_cast %140 : vector<1x32xf32> to vector<32xf32>
    %cst_53 = arith.constant dense<0.000000e+00> : vector<8xf32>
    %142 = vector.multi_reduction <add>, %137, %cst_53 [1] : vector<8x32xf32> to vector<8xf32>
    %143 = vector.shape_cast %142 : vector<8xf32> to vector<8x1xf32>
    %cst_54 = arith.constant 3.200000e+01 : f32
    %144 = vector.broadcast %cst_54 : f32 to vector<8x1xf32>
    %145 = arith.divf %143, %144 : vector<8x1xf32>
    %146 = arith.mulf %137, %137 : vector<8x32xf32>
    %cst_55 = arith.constant dense<0.000000e+00> : vector<8xf32>
    %147 = vector.multi_reduction <add>, %146, %cst_55 [1] : vector<8x32xf32> to vector<8xf32>
    %148 = vector.shape_cast %147 : vector<8xf32> to vector<8x1xf32>
    %cst_56 = arith.constant 3.200000e+01 : f32
    %149 = vector.broadcast %cst_56 : f32 to vector<8x1xf32>
    %150 = arith.divf %148, %149 : vector<8x1xf32>
    %151 = arith.mulf %145, %145 : vector<8x1xf32>
    %152 = arith.subf %150, %151 : vector<8x1xf32>
    %153 = vector.broadcast %145 : vector<8x1xf32> to vector<8x32xf32>
    %154 = arith.subf %137, %153 : vector<8x32xf32>
    %cst_57 = arith.constant 9.99999974E-6 : f32
    %155 = vector.broadcast %cst_57 : f32 to vector<8x1xf32>
    %156 = arith.addf %152, %155 : vector<8x1xf32>
    %157 = math.rsqrt %156 : vector<8x1xf32>
    %158 = vector.broadcast %157 : vector<8x1xf32> to vector<8x32xf32>
    %159 = arith.mulf %154, %158 : vector<8x32xf32>
    %160 = vector.shape_cast %139 : vector<32xf32> to vector<1x32xf32>
    %161 = vector.broadcast %160 : vector<1x32xf32> to vector<8x32xf32>
    %162 = arith.mulf %159, %161 : vector<8x32xf32>
    %163 = vector.shape_cast %141 : vector<32xf32> to vector<1x32xf32>
    %164 = vector.broadcast %163 : vector<1x32xf32> to vector<8x32xf32>
    %165 = arith.addf %162, %164 : vector<8x32xf32>
    %166 = arith.truncf %165 : vector<8x32xf32> to vector<8x32xbf16>
    %cst_58 = arith.constant 0.000000e+00 : f32
    %167 = vector.broadcast %cst_58 : f32 to vector<8x32xf32>
    %c0_i32_59 = arith.constant 0 : i32
    %168 = arith.index_cast %c0_i32_59 : i32 to index
    %c0_60 = arith.constant 0 : index
    %c0_61 = arith.constant 0 : index
    %169 = vector.load %arg15[%168, %c0_60, %c0_61] : memref<1x32x64xbf16, #tpu.memory_space<vmem>>, vector<1x32x64xbf16>
    %170 = vector.shape_cast %169 : vector<1x32x64xbf16> to vector<32x64xbf16>
    %cst_62 = arith.constant dense<0.000000e+00> : vector<8x64xf32>
    %171 = tpu.matmul %166, %170, %cst_62 {dimension_numbers = #tpu.dot_dimension_numbers<[1], [0], [0], [1], [0, 0, 1, 1], [], []>} : vector<8x32xbf16>, vector<32x64xbf16>, vector<8x64xf32> -> vector<8x64xf32>
    %172 = arith.index_cast %c0_i32_59 : i32 to index
    %c0_63 = arith.constant 0 : index
    %c0_64 = arith.constant 0 : index
    %173 = vector.load %arg16[%172, %c0_63, %c0_64] : memref<1x1x64xf32, #tpu.memory_space<vmem>>, vector<1x1x64xf32>
    %174 = vector.shape_cast %173 : vector<1x1x64xf32> to vector<1x64xf32>
    %175 = vector.broadcast %174 : vector<1x64xf32> to vector<8x64xf32>
    %176 = arith.addf %171, %175 : vector<8x64xf32>
    %cst_65 = arith.constant 5.000000e-01 : f32
    %177 = vector.broadcast %cst_65 : f32 to vector<8x64xf32>
    %178 = arith.mulf %177, %176 : vector<8x64xf32>
    %cst_66 = arith.constant 4.471500e-02 : f32
    %179 = vector.broadcast %cst_66 : f32 to vector<8x64xf32>
    %180 = arith.mulf %179, %176 : vector<8x64xf32>
    %181 = arith.mulf %180, %176 : vector<8x64xf32>
    %182 = arith.mulf %181, %176 : vector<8x64xf32>
    %183 = arith.addf %176, %182 : vector<8x64xf32>
    %cst_67 = arith.constant 0.797884583 : f32
    %184 = vector.broadcast %cst_67 : f32 to vector<8x64xf32>
    %185 = arith.mulf %184, %183 : vector<8x64xf32>
    %186 = math.tanh %185 : vector<8x64xf32>
    %cst_68 = arith.constant 1.000000e+00 : f32
    %187 = vector.broadcast %cst_68 : f32 to vector<8x64xf32>
    %188 = arith.addf %187, %186 : vector<8x64xf32>
    %189 = arith.mulf %178, %188 : vector<8x64xf32>
    %190 = arith.truncf %189 : vector<8x64xf32> to vector<8x64xbf16>
    %191 = arith.index_cast %c0_i32_59 : i32 to index
    %c0_69 = arith.constant 0 : index
    %c0_70 = arith.constant 0 : index
    %192 = vector.load %arg17[%191, %c0_69, %c0_70] : memref<1x64x32xbf16, #tpu.memory_space<vmem>>, vector<1x64x32xbf16>
    %193 = vector.shape_cast %192 : vector<1x64x32xbf16> to vector<64x32xbf16>
    %cst_71 = arith.constant dense<0.000000e+00> : vector<8x32xf32>
    %194 = tpu.matmul %190, %193, %cst_71 {dimension_numbers = #tpu.dot_dimension_numbers<[1], [0], [0], [1], [0, 0, 1, 1], [], []>} : vector<8x64xbf16>, vector<64x32xbf16>, vector<8x32xf32> -> vector<8x32xf32>
    %195 = arith.addf %167, %194 : vector<8x32xf32>
    %c1_i32_72 = arith.constant 1 : i32
    %c0_73 = arith.constant 0 : index
    %c0_74 = arith.constant 0 : index
    %196 = vector.load %arg18[%c0_73, %c0_74] : memref<1x32xf32, #tpu.memory_space<vmem>>, vector<1x32xf32>
    %197 = vector.shape_cast %196 : vector<1x32xf32> to vector<32xf32>
    %198 = vector.shape_cast %197 : vector<32xf32> to vector<1x32xf32>
    %199 = vector.broadcast %198 : vector<1x32xf32> to vector<8x32xf32>
    %200 = arith.addf %195, %199 : vector<8x32xf32>
    %201 = arith.addf %200, %137 : vector<8x32xf32>
    %c0_75 = arith.constant 0 : index
    %c0_76 = arith.constant 0 : index
    %202 = vector.load %arg19[%c0_75, %c0_76] : memref<1x32xf32, #tpu.memory_space<vmem>>, vector<1x32xf32>
    %203 = vector.shape_cast %202 : vector<1x32xf32> to vector<32xf32>
    %c0_77 = arith.constant 0 : index
    %c0_78 = arith.constant 0 : index
    %204 = vector.load %arg20[%c0_77, %c0_78] : memref<1x32xf32, #tpu.memory_space<vmem>>, vector<1x32xf32>
    %205 = vector.shape_cast %204 : vector<1x32xf32> to vector<32xf32>
    %cst_79 = arith.constant dense<0.000000e+00> : vector<8xf32>
    %206 = vector.multi_reduction <add>, %201, %cst_79 [1] : vector<8x32xf32> to vector<8xf32>
    %207 = vector.shape_cast %206 : vector<8xf32> to vector<8x1xf32>
    %cst_80 = arith.constant 3.200000e+01 : f32
    %208 = vector.broadcast %cst_80 : f32 to vector<8x1xf32>
    %209 = arith.divf %207, %208 : vector<8x1xf32>
    %210 = arith.mulf %201, %201 : vector<8x32xf32>
    %cst_81 = arith.constant dense<0.000000e+00> : vector<8xf32>
    %211 = vector.multi_reduction <add>, %210, %cst_81 [1] : vector<8x32xf32> to vector<8xf32>
    %212 = vector.shape_cast %211 : vector<8xf32> to vector<8x1xf32>
    %cst_82 = arith.constant 3.200000e+01 : f32
    %213 = vector.broadcast %cst_82 : f32 to vector<8x1xf32>
    %214 = arith.divf %212, %213 : vector<8x1xf32>
    %215 = arith.mulf %209, %209 : vector<8x1xf32>
    %216 = arith.subf %214, %215 : vector<8x1xf32>
    %217 = vector.broadcast %209 : vector<8x1xf32> to vector<8x32xf32>
    %218 = arith.subf %201, %217 : vector<8x32xf32>
    %cst_83 = arith.constant 9.99999974E-6 : f32
    %219 = vector.broadcast %cst_83 : f32 to vector<8x1xf32>
    %220 = arith.addf %216, %219 : vector<8x1xf32>
    %221 = math.rsqrt %220 : vector<8x1xf32>
    %222 = vector.broadcast %221 : vector<8x1xf32> to vector<8x32xf32>
    %223 = arith.mulf %218, %222 : vector<8x32xf32>
    %224 = vector.shape_cast %203 : vector<32xf32> to vector<1x32xf32>
    %225 = vector.broadcast %224 : vector<1x32xf32> to vector<8x32xf32>
    %226 = arith.mulf %223, %225 : vector<8x32xf32>
    %227 = vector.shape_cast %205 : vector<32xf32> to vector<1x32xf32>
    %228 = vector.broadcast %227 : vector<1x32xf32> to vector<8x32xf32>
    %229 = arith.addf %226, %228 : vector<8x32xf32>
    %c0_84 = arith.constant 0 : index
    %c0_85 = arith.constant 0 : index
    %c0_86 = arith.constant 0 : index
    %230 = vector.load %arg21[%c0_84, %c0_85, %c0_86] : memref<1x8x32xf32, #tpu.memory_space<vmem>>, vector<1x8x32xf32>
    %231 = vector.shape_cast %230 : vector<1x8x32xf32> to vector<8x32xf32>
    %232 = vector.shape_cast %229 : vector<8x32xf32> to vector<1x8x32xf32>
    tpu.vector_store %arg21[%c0_84, %c0_85, %c0_86], %232 {strides = array<i32>} : memref<1x8x32xf32, #tpu.memory_space<vmem>>, vector<1x8x32xf32>,
    return
  }
  func.func @transform_0(%arg0: i32, %arg1: i32) -> (i32, i32, i32) {
    %c0_i32 = arith.constant 0 : i32
    %c0_i32_0 = arith.constant 0 : i32
    %c0_i32_1 = arith.constant 0 : i32
    return %arg0, %c0_i32, %c0_i32_0 : i32, i32, i32
  }
  func.func @transform_1(%arg0: i32, %arg1: i32) -> (i32, i32) {
    %c0_i32 = arith.constant 0 : i32
    %c0_i32_0 = arith.constant 0 : i32
    %c0_i32_1 = arith.constant 0 : i32
    return %c0_i32, %c0_i32_0 : i32, i32
  }
  func.func @transform_2(%arg0: i32, %arg1: i32) -> (i32, i32) {
    %c0_i32 = arith.constant 0 : i32
    %c0_i32_0 = arith.constant 0 : i32
    %c0_i32_1 = arith.constant 0 : i32
    return %c0_i32, %c0_i32_0 : i32, i32
  }
  func.func @transform_3(%arg0: i32, %arg1: i32) -> (i32, i32, i32) {
    %c0_i32 = arith.constant 0 : i32
    %c0_i32_0 = arith.constant 0 : i32
    %c0_i32_1 = arith.constant 0 : i32
    %c0_i32_2 = arith.constant 0 : i32
    return %c0_i32, %c0_i32_0, %c0_i32_1 : i32, i32, i32
  }
  func.func @transform_4(%arg0: i32, %arg1: i32) -> (i32, i32, i32) {
    %c0_i32 = arith.constant 0 : i32
    %c0_i32_0 = arith.constant 0 : i32
    %c0_i32_1 = arith.constant 0 : i32
    %c0_i32_2 = arith.constant 0 : i32
    return %c0_i32, %c0_i32_0, %c0_i32_1 : i32, i32, i32
  }
  func.func @transform_5(%arg0: i32, %arg1: i32) -> (i32, i32, i32) {
    %c0_i32 = arith.constant 0 : i32
    %c0_i32_0 = arith.constant 0 : i32
    %c0_i32_1 = arith.constant 0 : i32
    %c0_i32_2 = arith.constant 0 : i32
    return %c0_i32, %c0_i32_0, %c0_i32_1 : i32, i32, i32
  }
  func.func @transform_6(%arg0: i32, %arg1: i32) -> (i32, i32, i32) {
    %c0_i32 = arith.constant 0 : i32
    %c0_i32_0 = arith.constant 0 : i32
    %c0_i32_1 = arith.constant 0 : i32
    %c0_i32_2 = arith.constant 0 : i32
    return %c0_i32, %c0_i32_0, %c0_i32_1 : i32, i32, i32
  }
  func.func @transform_7(%arg0: i32, %arg1: i32) -> (i32, i32, i32) {
    %c0_i32 = arith.constant 0 : i32
    %c0_i32_0 = arith.constant 0 : i32
    %c0_i32_1 = arith.constant 0 : i32
    %c0_i32_2 = arith.constant 0 : i32
    return %c0_i32, %c0_i32_0, %c0_i32_1 : i32, i32, i32
  }
  func.func @transform_8(%arg0: i32, %arg1: i32) -> (i32, i32, i32) {
    %c0_i32 = arith.constant 0 : i32
    %c0_i32_0 = arith.constant 0 : i32
    %c0_i32_1 = arith.constant 0 : i32
    %c0_i32_2 = arith.constant 0 : i32
    return %c0_i32, %c0_i32_0, %c0_i32_1 : i32, i32, i32
  }
  func.func @transform_9(%arg0: i32, %arg1: i32) -> (i32, i32, i32) {
    %c0_i32 = arith.constant 0 : i32
    %c0_i32_0 = arith.constant 0 : i32
    %c0_i32_1 = arith.constant 0 : i32
    %c0_i32_2 = arith.constant 0 : i32
    return %c0_i32, %c0_i32_0, %c0_i32_1 : i32, i32, i32
  }
  func.func @transform_10(%arg0: i32, %arg1: i32) -> (i32, i32) {
    %c0_i32 = arith.constant 0 : i32
    %c0_i32_0 = arith.constant 0 : i32
    %c0_i32_1 = arith.constant 0 : i32
    return %c0_i32, %c0_i32_0 : i32, i32
  }
  func.func @transform_11(%arg0: i32, %arg1: i32) -> (i32, i32) {
    %c0_i32 = arith.constant 0 : i32
    %c0_i32_0 = arith.constant 0 : i32
    %c0_i32_1 = arith.constant 0 : i32
    return %c0_i32, %c0_i32_0 : i32, i32
  }
  func.func @transform_12(%arg0: i32, %arg1: i32) -> (i32, i32) {
    %c0_i32 = arith.constant 0 : i32
    %c0_i32_0 = arith.constant 0 : i32
    %c0_i32_1 = arith.constant 0 : i32
    return %c0_i32, %c0_i32_0 : i32, i32
  }
  func.func @transform_13(%arg0: i32, %arg1: i32) -> (i32, i32, i32) {
    %c0_i32 = arith.constant 0 : i32
    %c0_i32_0 = arith.constant 0 : i32
    %c0_i32_1 = arith.constant 0 : i32
    %c0_i32_2 = arith.constant 0 : i32
    return %c0_i32, %c0_i32_0, %c0_i32_1 : i32, i32, i32
  }
  func.func @transform_14(%arg0: i32, %arg1: i32) -> (i32, i32, i32) {
    %c0_i32 = arith.constant 0 : i32
    %c0_i32_0 = arith.constant 0 : i32
    %c0_i32_1 = arith.constant 0 : i32
    %c0_i32_2 = arith.constant 0 : i32
    return %c0_i32, %c0_i32_0, %c0_i32_1 : i32, i32, i32
  }
  func.func @transform_15(%arg0: i32, %arg1: i32) -> (i32, i32, i32) {
    %c0_i32 = arith.constant 0 : i32
    %c0_i32_0 = arith.constant 0 : i32
    %c0_i32_1 = arith.constant 0 : i32
    %c0_i32_2 = arith.constant 0 : i32
    return %c0_i32, %c0_i32_0, %c0_i32_1 : i32, i32, i32
  }
  func.func @transform_16(%arg0: i32, %arg1: i32) -> (i32, i32) {
    %c0_i32 = arith.constant 0 : i32
    %c0_i32_0 = arith.constant 0 : i32
    %c0_i32_1 = arith.constant 0 : i32
    return %c0_i32, %c0_i32_0 : i32, i32
  }
  func.func @transform_17(%arg0: i32, %arg1: i32) -> (i32, i32) {
    %c0_i32 = arith.constant 0 : i32
    %c0_i32_0 = arith.constant 0 : i32
    %c0_i32_1 = arith.constant 0 : i32
    return %c0_i32, %c0_i32_0 : i32, i32
  }
  func.func @transform_18(%arg0: i32, %arg1: i32) -> (i32, i32) {
    %c0_i32 = arith.constant 0 : i32
    %c0_i32_0 = arith.constant 0 : i32
    %c0_i32_1 = arith.constant 0 : i32
    return %c0_i32, %c0_i32_0 : i32, i32
  }
  func.func @transform_19(%arg0: i32, %arg1: i32) -> (i32, i32, i32) {
    %c0_i32 = arith.constant 0 : i32
    %c0_i32_0 = arith.constant 0 : i32
    return %arg0, %arg1, %c0_i32 : i32, i32, i32
  }
}

module attributes {stable_mosaic.version = 11 : i64} {
  func.func @encoder_block_kernel(%arg0: i32, %arg1: i32, %arg2: memref<1x8x32xf32, #tpu.memory_space<vmem>>, %arg3: memref<1x32xf32, #tpu.memory_space<vmem>>, %arg4: memref<1x32xf32, #tpu.memory_space<vmem>>, %arg5: memref<1x32x32xbf16, #tpu.memory_space<vmem>>, %arg6: memref<1x1x32xf32, #tpu.memory_space<vmem>>, %arg7: memref<1x32x32xbf16, #tpu.memory_space<vmem>>, %arg8: memref<1x1x32xf32, #tpu.memory_space<vmem>>, %arg9: memref<1x32x32xbf16, #tpu.memory_space<vmem>>, %arg10: memref<1x1x32xf32, #tpu.memory_space<vmem>>, %arg11: memref<1x32x32xbf16, #tpu.memory_space<vmem>>, %arg12: memref<1x32xf32, #tpu.memory_space<vmem>>, %arg13: memref<1x32xf32, #tpu.memory_space<vmem>>, %arg14: memref<1x32xf32, #tpu.memory_space<vmem>>, %arg15: memref<1x32x64xbf16, #tpu.memory_space<vmem>>, %arg16: memref<1x1x64xf32, #tpu.memory_space<vmem>>, %arg17: memref<1x64x32xbf16, #tpu.memory_space<vmem>>, %arg18: memref<1x32xf32, #tpu.memory_space<vmem>>, %arg19: memref<1x32xf32, #tpu.memory_space<vmem>>, %arg20: memref<1x32xf32, #tpu.memory_space<vmem>>, %arg21: memref<1x8x32xf32, #tpu.memory_space<vmem>>, %arg22: memref<1x8x32xbf16, #tpu.memory_space<vmem>>, %arg23: memref<1x8x32xbf16, #tpu.memory_space<vmem>>, %arg24: memref<8x32xbf16, #tpu.memory_space<vmem>>) attributes {dimension_semantics = [#tpu.dimension_semantics<parallel>, #tpu.dimension_semantics<arbitrary>], iteration_bounds = array<i64: 2, 1>, scalar_prefetch = 0 : i64, scratch_operands = 3 : i64, tpu.core_type = #tpu.core_type<tc>, window_params = [{transform_indices = @transform_0, window_bounds = array<i64: 1, 8, 32>}, {pipeline_mode = #tpu.pipeline_mode<synchronous>, transform_indices = @transform_1, window_bounds = array<i64: 1, 32>}, {pipeline_mode = #tpu.pipeline_mode<synchronous>, transform_indices = @transform_2, window_bounds = array<i64: 1, 32>}, {pipeline_mode = #tpu.pipeline_mode<synchronous>, transform_indices = @transform_3, window_bounds = array<i64: 1, 32, 32>}, {pipeline_mode = #tpu.pipeline_mode<synchronous>, transform_indices = @transform_4, window_bounds = array<i64: 1, 1, 32>}, {pipeline_mode = #tpu.pipeline_mode<synchronous>, transform_indices = @transform_5, window_bounds = array<i64: 1, 32, 32>}, {pipeline_mode = #tpu.pipeline_mode<synchronous>, transform_indices = @transform_6, window_bounds = array<i64: 1, 1, 32>}, {pipeline_mode = #tpu.pipeline_mode<synchronous>, transform_indices = @transform_7, window_bounds = array<i64: 1, 32, 32>}, {pipeline_mode = #tpu.pipeline_mode<synchronous>, transform_indices = @transform_8, window_bounds = array<i64: 1, 1, 32>}, {pipeline_mode = #tpu.pipeline_mode<synchronous>, transform_indices = @transform_9, window_bounds = array<i64: 1, 32, 32>}, {pipeline_mode = #tpu.pipeline_mode<synchronous>, transform_indices = @transform_10, window_bounds = array<i64: 1, 32>}, {pipeline_mode = #tpu.pipeline_mode<synchronous>, transform_indices = @transform_11, window_bounds = array<i64: 1, 32>}, {pipeline_mode = #tpu.pipeline_mode<synchronous>, transform_indices = @transform_12, window_bounds = array<i64: 1, 32>}, {pipeline_mode = #tpu.pipeline_mode<synchronous>, transform_indices = @transform_13, window_bounds = array<i64: 1, 32, 64>}, {pipeline_mode = #tpu.pipeline_mode<synchronous>, transform_indices = @transform_14, window_bounds = array<i64: 1, 1, 64>}, {pipeline_mode = #tpu.pipeline_mode<synchronous>, transform_indices = @transform_15, window_bounds = array<i64: 1, 64, 32>}, {pipeline_mode = #tpu.pipeline_mode<synchronous>, transform_indices = @transform_16, window_bounds = array<i64: 1, 32>}, {pipeline_mode = #tpu.pipeline_mode<synchronous>, transform_indices = @transform_17, window_bounds = array<i64: 1, 32>}, {pipeline_mode = #tpu.pipeline_mode<synchronous>, transform_indices = @transform_18, window_bounds = array<i64: 1, 32>}, {transform_indices = @transform_19, window_bounds = array<i64: 1, 8, 32>}]} {
    %c0 = arith.constant 0 : index
    %c0_0 = arith.constant 0 : index
    %0 = vector.load %arg3[%c0, %c0_0] : memref<1x32xf32, #tpu.memory_space<vmem>>, vector<1x32xf32>
    %1 = vector.shape_cast %0 : vector<1x32xf32> to vector<32xf32>
    %c0_1 = arith.constant 0 : index
    %c0_2 = arith.constant 0 : index
    %2 = vector.load %arg4[%c0_1, %c0_2] : memref<1x32xf32, #tpu.memory_space<vmem>>, vector<1x32xf32>
    %3 = vector.shape_cast %2 : vector<1x32xf32> to vector<32xf32>
    %c0_i32 = arith.constant 0 : i32
    %4 = arith.cmpi eq, %arg1, %c0_i32 : i32
    %5 = arith.extui %4 : i1 to i32
    %c0_i32_3 = arith.constant 0 : i32
    %6 = arith.cmpi ne, %5, %c0_i32_3 : i32
    scf.if %6 {
      %c0_87 = arith.constant 0 : index
      %c0_88 = arith.constant 0 : index
      %c0_89 = arith.constant 0 : index
      %233 = vector.load %arg2[%c0_87, %c0_88, %c0_89] : memref<1x8x32xf32, #tpu.memory_space<vmem>>, vector<1x8x32xf32>
      %234 = vector.shape_cast %233 : vector<1x8x32xf32> to vector<8x32xf32>
      %cst_90 = arith.constant dense<0.000000e+00> : vector<8xf32>
      %235 = vector.multi_reduction <add>, %234, %cst_90 [1] : vector<8x32xf32> to vector<8xf32>
      %236 = vector.shape_cast %235 : vector<8xf32> to vector<8x1xf32>
      %cst_91 = arith.constant 3.200000e+01 : f32
      %237 = vector.broadcast %cst_91 : f32 to vector<8x1xf32>
      %238 = arith.divf %236, %237 : vector<8x1xf32>
      %239 = arith.mulf %234, %234 : vector<8x32xf32>
      %cst_92 = arith.constant dense<0.000000e+00> : vector<8xf32>
      %240 = vector.multi_reduction <add>, %239, %cst_92 [1] : vector<8x32xf32> to vector<8xf32>
      %241 = vector.shape_cast %240 : vector<8xf32> to vector<8x1xf32>
      %cst_93 = arith.constant 3.200000e+01 : f32
      %242 = vector.broadcast %cst_93 : f32 to vector<8x1xf32>
      %243 = arith.divf %241, %242 : vector<8x1xf32>
      %244 = arith.mulf %238, %238 : vector<8x1xf32>
      %245 = arith.subf %243, %244 : vector<8x1xf32>
      %246 = vector.broadcast %238 : vector<8x1xf32> to vector<8x32xf32>
      %247 = arith.subf %234, %246 : vector<8x32xf32>
      %cst_94 = arith.constant 9.99999974E-6 : f32
      %248 = vector.broadcast %cst_94 : f32 to vector<8x1xf32>
      %249 = arith.addf %245, %248 : vector<8x1xf32>
      %250 = math.rsqrt %249 : vector<8x1xf32>
      %251 = vector.broadcast %250 : vector<8x1xf32> to vector<8x32xf32>
      %252 = arith.mulf %247, %251 : vector<8x32xf32>
      %253 = vector.shape_cast %1 : vector<32xf32> to vector<1x32xf32>
      %254 = vector.broadcast %253 : vector<1x32xf32> to vector<8x32xf32>
      %255 = arith.mulf %252, %254 : vector<8x32xf32>
      %256 = vector.shape_cast %3 : vector<32xf32> to vector<1x32xf32>
      %257 = vector.broadcast %256 : vector<1x32xf32> to vector<8x32xf32>
      %258 = arith.addf %255, %257 : vector<8x32xf32>
      %259 = arith.truncf %258 : vector<8x32xf32> to vector<8x32xbf16>
      %c0_i32_95 = arith.constant 0 : i32
      %c1_i32_96 = arith.constant 1 : i32
      %260 = arith.muli %c0_i32_95, %c1_i32_96 : i32
      %c0_i32_97 = arith.constant 0 : i32
      %261 = arith.addi %c0_i32_97, %260 : i32
      %262 = arith.index_cast %261 : i32 to index
      %c0_98 = arith.constant 0 : index
      %c0_99 = arith.constant 0 : index
      %263 = vector.load %arg7[%262, %c0_98, %c0_99] : memref<1x32x32xbf16, #tpu.memory_space<vmem>>, vector<1x32x32xbf16>
      %264 = vector.shape_cast %263 : vector<1x32x32xbf16> to vector<32x32xbf16>
      %cst_100 = arith.constant dense<0.000000e+00> : vector<8x32xf32>
      %265 = tpu.matmul %259, %264, %cst_100 {dimension_numbers = #tpu.dot_dimension_numbers<[1], [0], [0], [1], [0, 0, 1, 1], [], []>} : vector<8x32xbf16>, vector<32x32xbf16>, vector<8x32xf32> -> vector<8x32xf32>
      %266 = arith.index_cast %261 : i32 to index
      %c0_101 = arith.constant 0 : index
      %c0_102 = arith.constant 0 : index
      %267 = vector.load %arg8[%266, %c0_101, %c0_102] : memref<1x1x32xf32, #tpu.memory_space<vmem>>, vector<1x1x32xf32>
      %268 = vector.shape_cast %267 : vector<1x1x32xf32> to vector<1x32xf32>
      %269 = vector.broadcast %268 : vector<1x32xf32> to vector<8x32xf32>
      %270 = arith.addf %265, %269 : vector<8x32xf32>
      %271 = arith.truncf %270 : vector<8x32xf32> to vector<8x32xbf16>
      %272 = arith.index_cast %261 : i32 to index
      %c0_103 = arith.constant 0 : index
      %c0_104 = arith.constant 0 : index
      %273 = vector.load %arg22[%272, %c0_103, %c0_104] : memref<1x8x32xbf16, #tpu.memory_space<vmem>>, vector<1x8x32xbf16>
      %274 = vector.shape_cast %273 : vector<1x8x32xbf16> to vector<8x32xbf16>
      %275 = vector.shape_cast %271 : vector<8x32xbf16> to vector<1x8x32xbf16>
      tpu.vector_store %arg22[%272, %c0_103, %c0_104], %275 {strides = array<i32>} : memref<1x8x32xbf16, #tpu.memory_space<vmem>>, vector<1x8x32xbf16>,
      %276 = arith.index_cast %261 : i32 to index
      %c0_105 = arith.constant 0 : index
      %c0_106 = arith.constant 0 : index
      %277 = vector.load %arg9[%276, %c0_105, %c0_106] : memref<1x32x32xbf16, #tpu.memory_space<vmem>>, vector<1x32x32xbf16>
      %278 = vector.shape_cast %277 : vector<1x32x32xbf16> to vector<32x32xbf16>
      %cst_107 = arith.constant dense<0.000000e+00> : vector<8x32xf32>
      %279 = tpu.matmul %259, %278, %cst_107 {dimension_numbers = #tpu.dot_dimension_numbers<[1], [0], [0], [1], [0, 0, 1, 1], [], []>} : vector<8x32xbf16>, vector<32x32xbf16>, vector<8x32xf32> -> vector<8x32xf32>
      %280 = arith.index_cast %261 : i32 to index
      %c0_108 = arith.constant 0 : index
      %c0_109 = arith.constant 0 : index
      %281 = vector.load %arg10[%280, %c0_108, %c0_109] : memref<1x1x32xf32, #tpu.memory_space<vmem>>, vector<1x1x32xf32>
      %282 = vector.shape_cast %281 : vector<1x1x32xf32> to vector<1x32xf32>
      %283 = vector.broadcast %282 : vector<1x32xf32> to vector<8x32xf32>
      %284 = arith.addf %279, %283 : vector<8x32xf32>
      %285 = arith.truncf %284 : vector<8x32xf32> to vector<8x32xbf16>
      %286 = arith.index_cast %261 : i32 to index
      %c0_110 = arith.constant 0 : index
      %c0_111 = arith.constant 0 : index
      %287 = vector.load %arg23[%286, %c0_110, %c0_111] : memref<1x8x32xbf16, #tpu.memory_space<vmem>>, vector<1x8x32xbf16>
      %288 = vector.shape_cast %287 : vector<1x8x32xbf16> to vector<8x32xbf16>
      %289 = vector.shape_cast %285 : vector<8x32xbf16> to vector<1x8x32xbf16>
      tpu.vector_store %arg23[%286, %c0_110, %c0_111], %289 {strides = array<i32>} : memref<1x8x32xbf16, #tpu.memory_space<vmem>>, vector<1x8x32xbf16>,
      %c1_i32_112 = arith.constant 1 : i32
    } else {
    }
    %c8_i32 = arith.constant 8 : i32
    %7 = arith.muli %arg1, %c8_i32 : i32
    %8 = tpu.assume_multiple %7, 8 : i32
    %c0_4 = arith.constant 0 : index
    %9 = arith.index_cast %8 : i32 to index
    %c0_5 = arith.constant 0 : index
    %10 = vector.load %arg2[%c0_4, %9, %c0_5] : memref<1x8x32xf32, #tpu.memory_space<vmem>>, vector<1x8x32xf32>
    %11 = vector.shape_cast %10 : vector<1x8x32xf32> to vector<8x32xf32>
    %cst = arith.constant dense<0.000000e+00> : vector<8xf32>
    %12 = vector.multi_reduction <add>, %11, %cst [1] : vector<8x32xf32> to vector<8xf32>
    %13 = vector.shape_cast %12 : vector<8xf32> to vector<8x1xf32>
    %cst_6 = arith.constant 3.200000e+01 : f32
    %14 = vector.broadcast %cst_6 : f32 to vector<8x1xf32>
    %15 = arith.divf %13, %14 : vector<8x1xf32>
    %16 = arith.mulf %11, %11 : vector<8x32xf32>
    %cst_7 = arith.constant dense<0.000000e+00> : vector<8xf32>
    %17 = vector.multi_reduction <add>, %16, %cst_7 [1] : vector<8x32xf32> to vector<8xf32>
    %18 = vector.shape_cast %17 : vector<8xf32> to vector<8x1xf32>
    %cst_8 = arith.constant 3.200000e+01 : f32
    %19 = vector.broadcast %cst_8 : f32 to vector<8x1xf32>
    %20 = arith.divf %18, %19 : vector<8x1xf32>
    %21 = arith.mulf %15, %15 : vector<8x1xf32>
    %22 = arith.subf %20, %21 : vector<8x1xf32>
    %23 = vector.broadcast %15 : vector<8x1xf32> to vector<8x32xf32>
    %24 = arith.subf %11, %23 : vector<8x32xf32>
    %cst_9 = arith.constant 9.99999974E-6 : f32
    %25 = vector.broadcast %cst_9 : f32 to vector<8x1xf32>
    %26 = arith.addf %22, %25 : vector<8x1xf32>
    %27 = math.rsqrt %26 : vector<8x1xf32>
    %28 = vector.broadcast %27 : vector<8x1xf32> to vector<8x32xf32>
    %29 = arith.mulf %24, %28 : vector<8x32xf32>
    %30 = vector.shape_cast %1 : vector<32xf32> to vector<1x32xf32>
    %31 = vector.broadcast %30 : vector<1x32xf32> to vector<8x32xf32>
    %32 = arith.mulf %29, %31 : vector<8x32xf32>
    %33 = vector.shape_cast %3 : vector<32xf32> to vector<1x32xf32>
    %34 = vector.broadcast %33 : vector<1x32xf32> to vector<8x32xf32>
    %35 = arith.addf %32, %34 : vector<8x32xf32>
    %36 = arith.truncf %35 : vector<8x32xf32> to vector<8x32xbf16>
    %cst_10 = arith.constant 0.000000e+00 : f32
    %37 = vector.broadcast %cst_10 : f32 to vector<8x32xf32>
    %c0_i32_11 = arith.constant 0 : i32
    %38 = arith.index_cast %c0_i32_11 : i32 to index
    %c0_12 = arith.constant 0 : index
    %c0_13 = arith.constant 0 : index
    %39 = vector.load %arg5[%38, %c0_12, %c0_13] : memref<1x32x32xbf16, #tpu.memory_space<vmem>>, vector<1x32x32xbf16>
    %40 = vector.shape_cast %39 : vector<1x32x32xbf16> to vector<32x32xbf16>
    %cst_14 = arith.constant dense<0.000000e+00> : vector<8x32xf32>
    %41 = tpu.matmul %36, %40, %cst_14 {dimension_numbers = #tpu.dot_dimension_numbers<[1], [0], [0], [1], [0, 0, 1, 1], [], []>} : vector<8x32xbf16>, vector<32x32xbf16>, vector<8x32xf32> -> vector<8x32xf32>
    %42 = arith.index_cast %c0_i32_11 : i32 to index
    %c0_15 = arith.constant 0 : index
    %c0_16 = arith.constant 0 : index
    %43 = vector.load %arg6[%42, %c0_15, %c0_16] : memref<1x1x32xf32, #tpu.memory_space<vmem>>, vector<1x1x32xf32>
    %44 = vector.shape_cast %43 : vector<1x1x32xf32> to vector<1x32xf32>
    %45 = vector.broadcast %44 : vector<1x32xf32> to vector<8x32xf32>
    %46 = arith.addf %41, %45 : vector<8x32xf32>
    %47 = arith.truncf %46 : vector<8x32xf32> to vector<8x32xbf16>
    %48 = arith.index_cast %c0_i32_11 : i32 to index
    %c0_17 = arith.constant 0 : index
    %c0_18 = arith.constant 0 : index
    %49 = vector.load %arg22[%48, %c0_17, %c0_18] : memref<1x8x32xbf16, #tpu.memory_space<vmem>>, vector<1x8x32xbf16>
    %50 = vector.shape_cast %49 : vector<1x8x32xbf16> to vector<8x32xbf16>
    %51 = arith.index_cast %c0_i32_11 : i32 to index
    %c0_19 = arith.constant 0 : index
    %c0_20 = arith.constant 0 : index
    %52 = vector.load %arg23[%51, %c0_19, %c0_20] : memref<1x8x32xbf16, #tpu.memory_space<vmem>>, vector<1x8x32xbf16>
    %53 = vector.shape_cast %52 : vector<1x8x32xbf16> to vector<8x32xbf16>
    %54 = vector.extract_strided_slice %47 {offsets = [0, 0], sizes = [8, 8], strides = [1, 1]} : vector<8x32xbf16> to vector<8x8xbf16>
    %55 = vector.extract_strided_slice %50 {offsets = [0, 0], sizes = [8, 8], strides = [1, 1]} : vector<8x32xbf16> to vector<8x8xbf16>
    %cst_21 = arith.constant dense<0.000000e+00> : vector<8x8xf32>
    %56 = tpu.matmul %54, %55, %cst_21 {dimension_numbers = #tpu.dot_dimension_numbers<[1], [1], [0], [0], [0, 0, 1, 0], [], []>} : vector<8x8xbf16>, vector<8x8xbf16>, vector<8x8xf32> -> vector<8x8xf32>
    %cst_22 = arith.constant dense<0xFF800000> : vector<8xf32>
    %57 = vector.multi_reduction <maximumf>, %56, %cst_22 [1] : vector<8x8xf32> to vector<8xf32>
    %58 = vector.shape_cast %57 : vector<8xf32> to vector<8x1xf32>
    %59 = vector.broadcast %58 : vector<8x1xf32> to vector<8x8xf32>
    %60 = arith.subf %56, %59 : vector<8x8xf32>
    %61 = math.exp %60 : vector<8x8xf32>
    %cst_23 = arith.constant dense<0.000000e+00> : vector<8xf32>
    %62 = vector.multi_reduction <add>, %61, %cst_23 [1] : vector<8x8xf32> to vector<8xf32>
    %63 = vector.shape_cast %62 : vector<8xf32> to vector<8x1xf32>
    %64 = arith.truncf %61 : vector<8x8xf32> to vector<8x8xbf16>
    %65 = vector.extract_strided_slice %53 {offsets = [0, 0], sizes = [8, 8], strides = [1, 1]} : vector<8x32xbf16> to vector<8x8xbf16>
    %cst_24 = arith.constant dense<0.000000e+00> : vector<8x8xf32>
    %66 = tpu.matmul %64, %65, %cst_24 {dimension_numbers = #tpu.dot_dimension_numbers<[1], [0], [0], [1], [0, 0, 1, 1], [], []>} : vector<8x8xbf16>, vector<8x8xbf16>, vector<8x8xf32> -> vector<8x8xf32>
    %67 = tpu.reciprocal %63 {approx = true} : vector<8x1xf32> -> vector<8x1xf32>
    %68 = vector.broadcast %67 : vector<8x1xf32> to vector<8x8xf32>
    %69 = arith.mulf %66, %68 : vector<8x8xf32>
    %70 = arith.truncf %69 : vector<8x8xf32> to vector<8x8xbf16>
    %c0_25 = arith.constant 0 : index
    %c0_26 = arith.constant 0 : index
    %71 = vector.load %arg24[%c0_25, %c0_26] : memref<8x32xbf16, #tpu.memory_space<vmem>>, vector<8x8xbf16>
    tpu.vector_store %arg24[%c0_25, %c0_26], %70 {strides = array<i32>} : memref<8x32xbf16, #tpu.memory_space<vmem>>, vector<8x8xbf16>,
    %72 = vector.extract_strided_slice %47 {offsets = [0, 8], sizes = [8, 8], strides = [1, 1]} : vector<8x32xbf16> to vector<8x8xbf16>
    %73 = vector.extract_strided_slice %50 {offsets = [0, 8], sizes = [8, 8], strides = [1, 1]} : vector<8x32xbf16> to vector<8x8xbf16>
    %cst_27 = arith.constant dense<0.000000e+00> : vector<8x8xf32>
    %74 = tpu.matmul %72, %73, %cst_27 {dimension_numbers = #tpu.dot_dimension_numbers<[1], [1], [0], [0], [0, 0, 1, 0], [], []>} : vector<8x8xbf16>, vector<8x8xbf16>, vector<8x8xf32> -> vector<8x8xf32>
    %cst_28 = arith.constant dense<0xFF800000> : vector<8xf32>
    %75 = vector.multi_reduction <maximumf>, %74, %cst_28 [1] : vector<8x8xf32> to vector<8xf32>
    %76 = vector.shape_cast %75 : vector<8xf32> to vector<8x1xf32>
    %77 = vector.broadcast %76 : vector<8x1xf32> to vector<8x8xf32>
    %78 = arith.subf %74, %77 : vector<8x8xf32>
    %79 = math.exp %78 : vector<8x8xf32>
    %cst_29 = arith.constant dense<0.000000e+00> : vector<8xf32>
    %80 = vector.multi_reduction <add>, %79, %cst_29 [1] : vector<8x8xf32> to vector<8xf32>
    %81 = vector.shape_cast %80 : vector<8xf32> to vector<8x1xf32>
    %82 = arith.truncf %79 : vector<8x8xf32> to vector<8x8xbf16>
    %83 = vector.extract_strided_slice %53 {offsets = [0, 8], sizes = [8, 8], strides = [1, 1]} : vector<8x32xbf16> to vector<8x8xbf16>
    %cst_30 = arith.constant dense<0.000000e+00> : vector<8x8xf32>
    %84 = tpu.matmul %82, %83, %cst_30 {dimension_numbers = #tpu.dot_dimension_numbers<[1], [0], [0], [1], [0, 0, 1, 1], [], []>} : vector<8x8xbf16>, vector<8x8xbf16>, vector<8x8xf32> -> vector<8x8xf32>
    %85 = tpu.reciprocal %81 {approx = true} : vector<8x1xf32> -> vector<8x1xf32>
    %86 = vector.broadcast %85 : vector<8x1xf32> to vector<8x8xf32>
    %87 = arith.mulf %84, %86 : vector<8x8xf32>
    %88 = arith.truncf %87 : vector<8x8xf32> to vector<8x8xbf16>
    %c0_31 = arith.constant 0 : index
    %c8 = arith.constant 8 : index
    %89 = vector.load %arg24[%c0_31, %c8] : memref<8x32xbf16, #tpu.memory_space<vmem>>, vector<8x8xbf16>
    tpu.vector_store %arg24[%c0_31, %c8], %88 {strides = array<i32>} : memref<8x32xbf16, #tpu.memory_space<vmem>>, vector<8x8xbf16>,
    %90 = vector.extract_strided_slice %47 {offsets = [0, 16], sizes = [8, 8], strides = [1, 1]} : vector<8x32xbf16> to vector<8x8xbf16>
    %91 = vector.extract_strided_slice %50 {offsets = [0, 16], sizes = [8, 8], strides = [1, 1]} : vector<8x32xbf16> to vector<8x8xbf16>
    %cst_32 = arith.constant dense<0.000000e+00> : vector<8x8xf32>
    %92 = tpu.matmul %90, %91, %cst_32 {dimension_numbers = #tpu.dot_dimension_numbers<[1], [1], [0], [0], [0, 0, 1, 0], [], []>} : vector<8x8xbf16>, vector<8x8xbf16>, vector<8x8xf32> -> vector<8x8xf32>
    %cst_33 = arith.constant dense<0xFF800000> : vector<8xf32>
    %93 = vector.multi_reduction <maximumf>, %92, %cst_33 [1] : vector<8x8xf32> to vector<8xf32>
    %94 = vector.shape_cast %93 : vector<8xf32> to vector<8x1xf32>
    %95 = vector.broadcast %94 : vector<8x1xf32> to vector<8x8xf32>
    %96 = arith.subf %92, %95 : vector<8x8xf32>
    %97 = math.exp %96 : vector<8x8xf32>
    %cst_34 = arith.constant dense<0.000000e+00> : vector<8xf32>
    %98 = vector.multi_reduction <add>, %97, %cst_34 [1] : vector<8x8xf32> to vector<8xf32>
    %99 = vector.shape_cast %98 : vector<8xf32> to vector<8x1xf32>
    %100 = arith.truncf %97 : vector<8x8xf32> to vector<8x8xbf16>
    %101 = vector.extract_strided_slice %53 {offsets = [0, 16], sizes = [8, 8], strides = [1, 1]} : vector<8x32xbf16> to vector<8x8xbf16>
    %cst_35 = arith.constant dense<0.000000e+00> : vector<8x8xf32>
    %102 = tpu.matmul %100, %101, %cst_35 {dimension_numbers = #tpu.dot_dimension_numbers<[1], [0], [0], [1], [0, 0, 1, 1], [], []>} : vector<8x8xbf16>, vector<8x8xbf16>, vector<8x8xf32> -> vector<8x8xf32>
    %103 = tpu.reciprocal %99 {approx = true} : vector<8x1xf32> -> vector<8x1xf32>
    %104 = vector.broadcast %103 : vector<8x1xf32> to vector<8x8xf32>
    %105 = arith.mulf %102, %104 : vector<8x8xf32>
    %106 = arith.truncf %105 : vector<8x8xf32> to vector<8x8xbf16>
    %c0_36 = arith.constant 0 : index
    %c16 = arith.constant 16 : index
    %107 = vector.load %arg24[%c0_36, %c16] : memref<8x32xbf16, #tpu.memory_space<vmem>>, vector<8x8xbf16>
    tpu.vector_store %arg24[%c0_36, %c16], %106 {strides = array<i32>} : memref<8x32xbf16, #tpu.memory_space<vmem>>, vector<8x8xbf16>,
    %108 = vector.extract_strided_slice %47 {offsets = [0, 24], sizes = [8, 8], strides = [1, 1]} : vector<8x32xbf16> to vector<8x8xbf16>
    %109 = vector.extract_strided_slice %50 {offsets = [0, 24], sizes = [8, 8], strides = [1, 1]} : vector<8x32xbf16> to vector<8x8xbf16>
    %cst_37 = arith.constant dense<0.000000e+00> : vector<8x8xf32>
    %110 = tpu.matmul %108, %109, %cst_37 {dimension_numbers = #tpu.dot_dimension_numbers<[1], [1], [0], [0], [0, 0, 1, 0], [], []>} : vector<8x8xbf16>, vector<8x8xbf16>, vector<8x8xf32> -> vector<8x8xf32>
    %cst_38 = arith.constant dense<0xFF800000> : vector<8xf32>
    %111 = vector.multi_reduction <maximumf>, %110, %cst_38 [1] : vector<8x8xf32> to vector<8xf32>
    %112 = vector.shape_cast %111 : vector<8xf32> to vector<8x1xf32>
    %113 = vector.broadcast %112 : vector<8x1xf32> to vector<8x8xf32>
    %114 = arith.subf %110, %113 : vector<8x8xf32>
    %115 = math.exp %114 : vector<8x8xf32>
    %cst_39 = arith.constant dense<0.000000e+00> : vector<8xf32>
    %116 = vector.multi_reduction <add>, %115, %cst_39 [1] : vector<8x8xf32> to vector<8xf32>
    %117 = vector.shape_cast %116 : vector<8xf32> to vector<8x1xf32>
    %118 = arith.truncf %115 : vector<8x8xf32> to vector<8x8xbf16>
    %119 = vector.extract_strided_slice %53 {offsets = [0, 24], sizes = [8, 8], strides = [1, 1]} : vector<8x32xbf16> to vector<8x8xbf16>
    %cst_40 = arith.constant dense<0.000000e+00> : vector<8x8xf32>
    %120 = tpu.matmul %118, %119, %cst_40 {dimension_numbers = #tpu.dot_dimension_numbers<[1], [0], [0], [1], [0, 0, 1, 1], [], []>} : vector<8x8xbf16>, vector<8x8xbf16>, vector<8x8xf32> -> vector<8x8xf32>
    %121 = tpu.reciprocal %117 {approx = true} : vector<8x1xf32> -> vector<8x1xf32>
    %122 = vector.broadcast %121 : vector<8x1xf32> to vector<8x8xf32>
    %123 = arith.mulf %120, %122 : vector<8x8xf32>
    %124 = arith.truncf %123 : vector<8x8xf32> to vector<8x8xbf16>
    %c0_41 = arith.constant 0 : index
    %c24 = arith.constant 24 : index
    %125 = vector.load %arg24[%c0_41, %c24] : memref<8x32xbf16, #tpu.memory_space<vmem>>, vector<8x8xbf16>
    tpu.vector_store %arg24[%c0_41, %c24], %124 {strides = array<i32>} : memref<8x32xbf16, #tpu.memory_space<vmem>>, vector<8x8xbf16>,
    %c0_42 = arith.constant 0 : index
    %c0_43 = arith.constant 0 : index
    %126 = vector.load %arg24[%c0_42, %c0_43] : memref<8x32xbf16, #tpu.memory_space<vmem>>, vector<8x32xbf16>
    %127 = arith.index_cast %c0_i32_11 : i32 to index
    %c0_44 = arith.constant 0 : index
    %c0_45 = arith.constant 0 : index
    %128 = vector.load %arg11[%127, %c0_44, %c0_45] : memref<1x32x32xbf16, #tpu.memory_space<vmem>>, vector<1x32x32xbf16>
    %129 = vector.shape_cast %128 : vector<1x32x32xbf16> to vector<32x32xbf16>
    %cst_46 = arith.constant dense<0.000000e+00> : vector<8x32xf32>
    %130 = tpu.matmul %126, %129, %cst_46 {dimension_numbers = #tpu.dot_dimension_numbers<[1], [0], [0], [1], [0, 0, 1, 1], [], []>} : vector<8x32xbf16>, vector<32x32xbf16>, vector<8x32xf32> -> vector<8x32xf32>
    %131 = arith.addf %37, %130 : vector<8x32xf32>
    %c1_i32 = arith.constant 1 : i32
    %c0_47 = arith.constant 0 : index
    %c0_48 = arith.constant 0 : index
    %132 = vector.load %arg12[%c0_47, %c0_48] : memref<1x32xf32, #tpu.memory_space<vmem>>, vector<1x32xf32>
    %133 = vector.shape_cast %132 : vector<1x32xf32> to vector<32xf32>
    %134 = vector.shape_cast %133 : vector<32xf32> to vector<1x32xf32>
    %135 = vector.broadcast %134 : vector<1x32xf32> to vector<8x32xf32>
    %136 = arith.addf %131, %135 : vector<8x32xf32>
    %137 = arith.addf %136, %11 : vector<8x32xf32>
    %c0_49 = arith.constant 0 : index
    %c0_50 = arith.constant 0 : index
    %138 = vector.load %arg13[%c0_49, %c0_50] : memref<1x32xf32, #tpu.memory_space<vmem>>, vector<1x32xf32>
    %139 = vector.shape_cast %138 : vector<1x32xf32> to vector<32xf32>
    %c0_51 = arith.constant 0 : index
    %c0_52 = arith.constant 0 : index
    %140 = vector.load %arg14[%c0_51, %c0_52] : memref<1x32xf32, #tpu.memory_space<vmem>>, vector<1x32xf32>
    %141 = vector.shape_cast %140 : vector<1x32xf32> to vector<32xf32>
    %cst_53 = arith.constant dense<0.000000e+00> : vector<8xf32>
    %142 = vector.multi_reduction <add>, %137, %cst_53 [1] : vector<8x32xf32> to vector<8xf32>
    %143 = vector.shape_cast %142 : vector<8xf32> to vector<8x1xf32>
    %cst_54 = arith.constant 3.200000e+01 : f32
    %144 = vector.broadcast %cst_54 : f32 to vector<8x1xf32>
    %145 = arith.divf %143, %144 : vector<8x1xf32>
    %146 = arith.mulf %137, %137 : vector<8x32xf32>
    %cst_55 = arith.constant dense<0.000000e+00> : vector<8xf32>
    %147 = vector.multi_reduction <add>, %146, %cst_55 [1] : vector<8x32xf32> to vector<8xf32>
    %148 = vector.shape_cast %147 : vector<8xf32> to vector<8x1xf32>
    %cst_56 = arith.constant 3.200000e+01 : f32
    %149 = vector.broadcast %cst_56 : f32 to vector<8x1xf32>
    %150 = arith.divf %148, %149 : vector<8x1xf32>
    %151 = arith.mulf %145, %145 : vector<8x1xf32>
    %152 = arith.subf %150, %151 : vector<8x1xf32>
    %153 = vector.broadcast %145 : vector<8x1xf32> to vector<8x32xf32>
    %154 = arith.subf %137, %153 : vector<8x32xf32>
    %cst_57 = arith.constant 9.99999974E-6 : f32
    %155 = vector.broadcast %cst_57 : f32 to vector<8x1xf32>
    %156 = arith.addf %152, %155 : vector<8x1xf32>
    %157 = math.rsqrt %156 : vector<8x1xf32>
    %158 = vector.broadcast %157 : vector<8x1xf32> to vector<8x32xf32>
    %159 = arith.mulf %154, %158 : vector<8x32xf32>
    %160 = vector.shape_cast %139 : vector<32xf32> to vector<1x32xf32>
    %161 = vector.broadcast %160 : vector<1x32xf32> to vector<8x32xf32>
    %162 = arith.mulf %159, %161 : vector<8x32xf32>
    %163 = vector.shape_cast %141 : vector<32xf32> to vector<1x32xf32>
    %164 = vector.broadcast %163 : vector<1x32xf32> to vector<8x32xf32>
    %165 = arith.addf %162, %164 : vector<8x32xf32>
    %166 = arith.truncf %165 : vector<8x32xf32> to vector<8x32xbf16>
    %cst_58 = arith.constant 0.000000e+00 : f32
    %167 = vector.broadcast %cst_58 : f32 to vector<8x32xf32>
    %c0_i32_59 = arith.constant 0 : i32
    %168 = arith.index_cast %c0_i32_59 : i32 to index
    %c0_60 = arith.constant 0 : index
    %c0_61 = arith.constant 0 : index
    %169 = vector.load %arg15[%168, %c0_60, %c0_61] : memref<1x32x64xbf16, #tpu.memory_space<vmem>>, vector<1x32x64xbf16>
    %170 = vector.shape_cast %169 : vector<1x32x64xbf16> to vector<32x64xbf16>
    %cst_62 = arith.constant dense<0.000000e+00> : vector<8x64xf32>
    %171 = tpu.matmul %166, %170, %cst_62 {dimension_numbers = #tpu.dot_dimension_numbers<[1], [0], [0], [1], [0, 0, 1, 1], [], []>} : vector<8x32xbf16>, vector<32x64xbf16>, vector<8x64xf32> -> vector<8x64xf32>
    %172 = arith.index_cast %c0_i32_59 : i32 to index
    %c0_63 = arith.constant 0 : index
    %c0_64 = arith.constant 0 : index
    %173 = vector.load %arg16[%172, %c0_63, %c0_64] : memref<1x1x64xf32, #tpu.memory_space<vmem>>, vector<1x1x64xf32>
    %174 = vector.shape_cast %173 : vector<1x1x64xf32> to vector<1x64xf32>
    %175 = vector.broadcast %174 : vector<1x64xf32> to vector<8x64xf32>
    %176 = arith.addf %171, %175 : vector<8x64xf32>
    %cst_65 = arith.constant 5.000000e-01 : f32
    %177 = vector.broadcast %cst_65 : f32 to vector<8x64xf32>
    %178 = arith.mulf %177, %176 : vector<8x64xf32>
    %cst_66 = arith.constant 4.471500e-02 : f32
    %179 = vector.broadcast %cst_66 : f32 to vector<8x64xf32>
    %180 = arith.mulf %179, %176 : vector<8x64xf32>
    %181 = arith.mulf %180, %176 : vector<8x64xf32>
    %182 = arith.mulf %181, %176 : vector<8x64xf32>
    %183 = arith.addf %176, %182 : vector<8x64xf32>
    %cst_67 = arith.constant 0.797884583 : f32
    %184 = vector.broadcast %cst_67 : f32 to vector<8x64xf32>
    %185 = arith.mulf %184, %183 : vector<8x64xf32>
    %186 = math.tanh %185 : vector<8x64xf32>
    %cst_68 = arith.constant 1.000000e+00 : f32
    %187 = vector.broadcast %cst_68 : f32 to vector<8x64xf32>
    %188 = arith.addf %187, %186 : vector<8x64xf32>
    %189 = arith.mulf %178, %188 : vector<8x64xf32>
    %190 = arith.truncf %189 : vector<8x64xf32> to vector<8x64xbf16>
    %191 = arith.index_cast %c0_i32_59 : i32 to index
    %c0_69 = arith.constant 0 : index
    %c0_70 = arith.constant 0 : index
    %192 = vector.load %arg17[%191, %c0_69, %c0_70] : memref<1x64x32xbf16, #tpu.memory_space<vmem>>, vector<1x64x32xbf16>
    %193 = vector.shape_cast %192 : vector<1x64x32xbf16> to vector<64x32xbf16>
    %cst_71 = arith.constant dense<0.000000e+00> : vector<8x32xf32>
    %194 = tpu.matmul %190, %193, %cst_71 {dimension_numbers = #tpu.dot_dimension_numbers<[1], [0], [0], [1], [0, 0, 1, 1], [], []>} : vector<8x64xbf16>, vector<64x32xbf16>, vector<8x32xf32> -> vector<8x32xf32>
    %195 = arith.addf %167, %194 : vector<8x32xf32>
    %c1_i32_72 = arith.constant 1 : i32
    %c0_73 = arith.constant 0 : index
    %c0_74 = arith.constant 0 : index
    %196 = vector.load %arg18[%c0_73, %c0_74] : memref<1x32xf32, #tpu.memory_space<vmem>>, vector<1x32xf32>
    %197 = vector.shape_cast %196 : vector<1x32xf32> to vector<32xf32>
    %198 = vector.shape_cast %197 : vector<32xf32> to vector<1x32xf32>
    %199 = vector.broadcast %198 : vector<1x32xf32> to vector<8x32xf32>
    %200 = arith.addf %195, %199 : vector<8x32xf32>
    %201 = arith.addf %200, %137 : vector<8x32xf32>
    %c0_75 = arith.constant 0 : index
    %c0_76 = arith.constant 0 : index
    %202 = vector.load %arg19[%c0_75, %c0_76] : memref<1x32xf32, #tpu.memory_space<vmem>>, vector<1x32xf32>
    %203 = vector.shape_cast %202 : vector<1x32xf32> to vector<32xf32>
    %c0_77 = arith.constant 0 : index
    %c0_78 = arith.constant 0 : index
    %204 = vector.load %arg20[%c0_77, %c0_78] : memref<1x32xf32, #tpu.memory_space<vmem>>, vector<1x32xf32>
    %205 = vector.shape_cast %204 : vector<1x32xf32> to vector<32xf32>
    %cst_79 = arith.constant dense<0.000000e+00> : vector<8xf32>
    %206 = vector.multi_reduction <add>, %201, %cst_79 [1] : vector<8x32xf32> to vector<8xf32>
    %207 = vector.shape_cast %206 : vector<8xf32> to vector<8x1xf32>
    %cst_80 = arith.constant 3.200000e+01 : f32
    %208 = vector.broadcast %cst_80 : f32 to vector<8x1xf32>
    %209 = arith.divf %207, %208 : vector<8x1xf32>
    %210 = arith.mulf %201, %201 : vector<8x32xf32>
    %cst_81 = arith.constant dense<0.000000e+00> : vector<8xf32>
    %211 = vector.multi_reduction <add>, %210, %cst_81 [1] : vector<8x32xf32> to vector<8xf32>
    %212 = vector.shape_cast %211 : vector<8xf32> to vector<8x1xf32>
    %cst_82 = arith.constant 3.200000e+01 : f32
    %213 = vector.broadcast %cst_82 : f32 to vector<8x1xf32>
    %214 = arith.divf %212, %213 : vector<8x1xf32>
    %215 = arith.mulf %209, %209 : vector<8x1xf32>
    %216 = arith.subf %214, %215 : vector<8x1xf32>
    %217 = vector.broadcast %209 : vector<8x1xf32> to vector<8x32xf32>
    %218 = arith.subf %201, %217 : vector<8x32xf32>
    %cst_83 = arith.constant 9.99999974E-6 : f32
    %219 = vector.broadcast %cst_83 : f32 to vector<8x1xf32>
    %220 = arith.addf %216, %219 : vector<8x1xf32>
    %221 = math.rsqrt %220 : vector<8x1xf32>
    %222 = vector.broadcast %221 : vector<8x1xf32> to vector<8x32xf32>
    %223 = arith.mulf %218, %222 : vector<8x32xf32>
    %224 = vector.shape_cast %203 : vector<32xf32> to vector<1x32xf32>
    %225 = vector.broadcast %224 : vector<1x32xf32> to vector<8x32xf32>
    %226 = arith.mulf %223, %225 : vector<8x32xf32>
    %227 = vector.shape_cast %205 : vector<32xf32> to vector<1x32xf32>
    %228 = vector.broadcast %227 : vector<1x32xf32> to vector<8x32xf32>
    %229 = arith.addf %226, %228 : vector<8x32xf32>
    %c0_84 = arith.constant 0 : index
    %c0_85 = arith.constant 0 : index
    %c0_86 = arith.constant 0 : index
    %230 = vector.load %arg21[%c0_84, %c0_85, %c0_86] : memref<1x8x32xf32, #tpu.memory_space<vmem>>, vector<1x8x32xf32>
    %231 = vector.shape_cast %230 : vector<1x8x32xf32> to vector<8x32xf32>
    %232 = vector.shape_cast %229 : vector<8x32xf32> to vector<1x8x32xf32>
    tpu.vector_store %arg21[%c0_84, %c0_85, %c0_86], %232 {strides = array<i32>} : memref<1x8x32xf32, #tpu.memory_space<vmem>>, vector<1x8x32xf32>,
    return
  }
  func.func @transform_0(%arg0: i32, %arg1: i32) -> (i32, i32, i32) {
    %c0_i32 = arith.constant 0 : i32
    %c0_i32_0 = arith.constant 0 : i32
    %c0_i32_1 = arith.constant 0 : i32
    return %arg0, %c0_i32, %c0_i32_0 : i32, i32, i32
  }
  func.func @transform_1(%arg0: i32, %arg1: i32) -> (i32, i32) {
    %c0_i32 = arith.constant 0 : i32
    %c0_i32_0 = arith.constant 0 : i32
    %c0_i32_1 = arith.constant 0 : i32
    return %c0_i32, %c0_i32_0 : i32, i32
  }
  func.func @transform_2(%arg0: i32, %arg1: i32) -> (i32, i32) {
    %c0_i32 = arith.constant 0 : i32
    %c0_i32_0 = arith.constant 0 : i32
    %c0_i32_1 = arith.constant 0 : i32
    return %c0_i32, %c0_i32_0 : i32, i32
  }
  func.func @transform_3(%arg0: i32, %arg1: i32) -> (i32, i32, i32) {
    %c0_i32 = arith.constant 0 : i32
    %c0_i32_0 = arith.constant 0 : i32
    %c0_i32_1 = arith.constant 0 : i32
    %c0_i32_2 = arith.constant 0 : i32
    return %c0_i32, %c0_i32_0, %c0_i32_1 : i32, i32, i32
  }
  func.func @transform_4(%arg0: i32, %arg1: i32) -> (i32, i32, i32) {
    %c0_i32 = arith.constant 0 : i32
    %c0_i32_0 = arith.constant 0 : i32
    %c0_i32_1 = arith.constant 0 : i32
    %c0_i32_2 = arith.constant 0 : i32
    return %c0_i32, %c0_i32_0, %c0_i32_1 : i32, i32, i32
  }
  func.func @transform_5(%arg0: i32, %arg1: i32) -> (i32, i32, i32) {
    %c0_i32 = arith.constant 0 : i32
    %c0_i32_0 = arith.constant 0 : i32
    %c0_i32_1 = arith.constant 0 : i32
    %c0_i32_2 = arith.constant 0 : i32
    return %c0_i32, %c0_i32_0, %c0_i32_1 : i32, i32, i32
  }
  func.func @transform_6(%arg0: i32, %arg1: i32) -> (i32, i32, i32) {
    %c0_i32 = arith.constant 0 : i32
    %c0_i32_0 = arith.constant 0 : i32
    %c0_i32_1 = arith.constant 0 : i32
    %c0_i32_2 = arith.constant 0 : i32
    return %c0_i32, %c0_i32_0, %c0_i32_1 : i32, i32, i32
  }
  func.func @transform_7(%arg0: i32, %arg1: i32) -> (i32, i32, i32) {
    %c0_i32 = arith.constant 0 : i32
    %c0_i32_0 = arith.constant 0 : i32
    %c0_i32_1 = arith.constant 0 : i32
    %c0_i32_2 = arith.constant 0 : i32
    return %c0_i32, %c0_i32_0, %c0_i32_1 : i32, i32, i32
  }
  func.func @transform_8(%arg0: i32, %arg1: i32) -> (i32, i32, i32) {
    %c0_i32 = arith.constant 0 : i32
    %c0_i32_0 = arith.constant 0 : i32
    %c0_i32_1 = arith.constant 0 : i32
    %c0_i32_2 = arith.constant 0 : i32
    return %c0_i32, %c0_i32_0, %c0_i32_1 : i32, i32, i32
  }
  func.func @transform_9(%arg0: i32, %arg1: i32) -> (i32, i32, i32) {
    %c0_i32 = arith.constant 0 : i32
    %c0_i32_0 = arith.constant 0 : i32
    %c0_i32_1 = arith.constant 0 : i32
    %c0_i32_2 = arith.constant 0 : i32
    return %c0_i32, %c0_i32_0, %c0_i32_1 : i32, i32, i32
  }
  func.func @transform_10(%arg0: i32, %arg1: i32) -> (i32, i32) {
    %c0_i32 = arith.constant 0 : i32
    %c0_i32_0 = arith.constant 0 : i32
    %c0_i32_1 = arith.constant 0 : i32
    return %c0_i32, %c0_i32_0 : i32, i32
  }
  func.func @transform_11(%arg0: i32, %arg1: i32) -> (i32, i32) {
    %c0_i32 = arith.constant 0 : i32
    %c0_i32_0 = arith.constant 0 : i32
    %c0_i32_1 = arith.constant 0 : i32
    return %c0_i32, %c0_i32_0 : i32, i32
  }
  func.func @transform_12(%arg0: i32, %arg1: i32) -> (i32, i32) {
    %c0_i32 = arith.constant 0 : i32
    %c0_i32_0 = arith.constant 0 : i32
    %c0_i32_1 = arith.constant 0 : i32
    return %c0_i32, %c0_i32_0 : i32, i32
  }
  func.func @transform_13(%arg0: i32, %arg1: i32) -> (i32, i32, i32) {
    %c0_i32 = arith.constant 0 : i32
    %c0_i32_0 = arith.constant 0 : i32
    %c0_i32_1 = arith.constant 0 : i32
    %c0_i32_2 = arith.constant 0 : i32
    return %c0_i32, %c0_i32_0, %c0_i32_1 : i32, i32, i32
  }
  func.func @transform_14(%arg0: i32, %arg1: i32) -> (i32, i32, i32) {
    %c0_i32 = arith.constant 0 : i32
    %c0_i32_0 = arith.constant 0 : i32
    %c0_i32_1 = arith.constant 0 : i32
    %c0_i32_2 = arith.constant 0 : i32
    return %c0_i32, %c0_i32_0, %c0_i32_1 : i32, i32, i32
  }
  func.func @transform_15(%arg0: i32, %arg1: i32) -> (i32, i32, i32) {
    %c0_i32 = arith.constant 0 : i32
    %c0_i32_0 = arith.constant 0 : i32
    %c0_i32_1 = arith.constant 0 : i32
    %c0_i32_2 = arith.constant 0 : i32
    return %c0_i32, %c0_i32_0, %c0_i32_1 : i32, i32, i32
  }
  func.func @transform_16(%arg0: i32, %arg1: i32) -> (i32, i32) {
    %c0_i32 = arith.constant 0 : i32
    %c0_i32_0 = arith.constant 0 : i32
    %c0_i32_1 = arith.constant 0 : i32
    return %c0_i32, %c0_i32_0 : i32, i32
  }
  func.func @transform_17(%arg0: i32, %arg1: i32) -> (i32, i32) {
    %c0_i32 = arith.constant 0 : i32
    %c0_i32_0 = arith.constant 0 : i32
    %c0_i32_1 = arith.constant 0 : i32
    return %c0_i32, %c0_i32_0 : i32, i32
  }
  func.func @transform_18(%arg0: i32, %arg1: i32) -> (i32, i32) {
    %c0_i32 = arith.constant 0 : i32
    %c0_i32_0 = arith.constant 0 : i32
    %c0_i32_1 = arith.constant 0 : i32
    return %c0_i32, %c0_i32_0 : i32, i32
  }
  func.func @transform_19(%arg0: i32, %arg1: i32) -> (i32, i32, i32) {
    %c0_i32 = arith.constant 0 : i32
    %c0_i32_0 = arith.constant 0 : i32
    return %arg0, %arg1, %c0_i32 : i32, i32, i32
  }
}

</mosaic_0001>

<bundles_post_ra>
// kernel: tpu_custom_call.1
= control target key start
LH: loop header
LB: loop body
LE: loop exit
PB: predicated region body
PF: predicated region fallthrough
CT: control target
= control target key end

     0   :  { %s3031_s0 = inlined_call_operand.vmem [shape: f32[2,8,32], index: 0, kind: input, shape index: {}]   ;;  %s3032_s1 = inlined_call_operand.hbm [shape: f32[1,32], index: 1, kind: input, shape index: {}]   ;;  %s3033_s2 = inlined_call_operand.hbm [shape: f32[1,32], index: 2, kind: input, shape index: {}]   ;;  %s3034_s3 = inlined_call_operand.vmem [shape: bf16[1,32,32], index: 3, kind: input, shape index: {}]   ;;  %s3035_s4 = inlined_call_operand.hbm [shape: f32[1,1,32], index: 4, kind: input, shape index: {}]   ;;  %s3036_s5 = inlined_call_operand.vmem [shape: bf16[1,32,32], index: 5, kind: input, shape index: {}]   ;;  %s3037_s6 = inlined_call_operand.hbm [shape: f32[1,1,32], index: 6, kind: input, shape index: {}]   ;;  %s3038_s7 = inlined_call_operand.hbm [shape: bf16[1,32,32], index: 7, kind: input, shape index: {}]   ;;  %s3039_s8 = inlined_call_operand.hbm [shape: f32[1,1,32], index: 8, kind: input, shape index: {}]   ;;  %s3040_s9 = inlined_call_operand.vmem [shape: bf16[1,32,32], index: 9, kind: input, shape index: {}]   ;;  %s3041_s10 = inlined_call_operand.vmem [shape: f32[1,32], index: 10, kind: input, shape index: {}]   ;;  %s3042_s11 = inlined_call_operand.vmem [shape: f32[1,32], index: 11, kind: input, shape index: {}]   ;;  %s3043_s12 = inlined_call_operand.vmem [shape: f32[1,32], index: 12, kind: input, shape index: {}]   ;;  %s3044_s13 = inlined_call_operand.hbm [shape: bf16[1,32,64], index: 13, kind: input, shape index: {}]   ;;  %s3045_s14 = inlined_call_operand.vmem [shape: f32[1,1,64], index: 14, kind: input, shape index: {}]   ;;  %s3046_s15 = inlined_call_operand.vmem [shape: bf16[1,64,32], index: 15, kind: input, shape index: {}]   ;;  %s3047_s16 = inlined_call_operand.vmem [shape: f32[1,32], index: 16, kind: input, shape index: {}]   ;;  %s3048_s17 = inlined_call_operand.vmem [shape: f32[1,32], index: 17, kind: input, shape index: {}]   ;;  %s3049_s18 = inlined_call_operand.vmem [shape: f32[1,32], index: 18, kind: input, shape index: {}]   ;;  %s3050_s19 = inlined_call_operand.hbm [shape: f32[2,8,32], index: 19, kind: output, shape index: {}]  }
   0x1   :  { %3065 = sst [smem:[#allocation30_spill]] %s3031_s0 }
   0x2   :  { %3066 = sst [smem:[#allocation31_spill]] %s3032_s1 }
   0x3   :  { %3067 = sst [smem:[#allocation32_spill]] %s3033_s2 }
   0x4   :  { %3068 = sst [smem:[#allocation33_spill]] %s3034_s3 }
   0x5   :  { %3069 = sst [smem:[#allocation34_spill]] %s3035_s4 }
   0x6   :  { %3070 = sst [smem:[#allocation35_spill]] %s3049_s18 }
   0x7   :  { %3071 = sst [smem:[#allocation36_spill]] %s3050_s19 }
   0x8   :  { %24 = vsyncpa [#allocation6], 0 }
   0x9   :  { %25 = vsyncpa [#allocation9], 0 }
   0xa   :  { %26 = vsyncpa [#allocation12], 0 }
   0xb   :  { %27 = vsyncpa [#allocation15], 0 }
   0xc   :  { %28 = vsyncpa [#allocation7], 0 }
   0xd   :  { %30 = vsyncpa [#allocation7 + $0x1], 0  ;;  %s2682_s0 = smov 0   ;;  %s2684_s30 = smov 0  }
   0xe   :  { %s2686_s20 = smov 0   ;;  %s2688_s21 = smov 0  }
   0xf   :  { %s2690_s1 = smov 0   ;;  %s2692_s22 = smov 0  }
  0x10 LB: > { %3072 = sst [smem:[#allocation23_spill]] %s2542_s0  ;;  %s1901_s2 = sadd.s32 4294967295, %s2562_s22   ;;  %s2562_s22 = sphi %s2692_s22, %s36_s22   ;;  %s2558_s1 = sphi %s2690_s1, %s3103_s1   ;;  %s2554_s21 = sphi %s2688_s21, %s3106_s21   ;;  %s2550_s20 = sphi %s2686_s20, %s3101_s20   ;;  %s2546_s30 = sphi %s2684_s30, %s3105_s30   ;;  %s2542_s0 = sphi %s2682_s0, %s3104_s0  }
  0x11   : > { %3073 = sst [smem:[#allocation24_spill]] %s2550_s20  ;;  %s1902_s23 = sadd.s32 4294967294, %s2562_s22  }
  0x12   : > { %3074 = sst [smem:[#allocation25_spill]] %s2558_s1  ;;  %s48_s24 = sadd.s32 1, %s2558_s1 }
  0x13   : > { %3075 = sst [smem:[#allocation26_spill]] %s2562_s22  ;;  %s461_s25 = sadd.s32 1, %s2550_s20 }
  0x14   : > { %p50_p0 = scmp.ge.s32.totalorder %s48_s24, 2  ;;  %p471_p1 = scmp.ne.s32.totalorder %s2550_s20, %s2546_s30 }
  0x15   : > { %p472_p2 = scmp.eq.s32.totalorder %s1901_s2, 1  ;;  %p477_p3 = scmp.ne.s32.totalorder %s2546_s30, %s2542_s0 }
  0x16   : > { %s3108_s24 = smov (%p50_p0, %s48_s24), 0  ;;  %p478_p5 = scmp.eq.s32.totalorder %s1902_s23, 1 }
  0x17   : > { %3076 = sst [smem:[#allocation27_spill]] %s3108_s24  ;;  %p2722_p4 = por %p472_p2, %p471_p1 }
  0x18   : > { %s456_s26 = ssub.s32 %s2558_s1, %s3108_s24  ;;  %p1903_p6 = scmp.ge.s32.totalorder %s2562_s22, 1 }
  0x19   : > { %s3077_s3 = scalar_select %p2722_p4, 1, 0 }
  0x1a   : > { %p459_p7 = scmp.eq.s32.totalorder %s456_s26, 0  ;;  %p2729_p8 = por %p478_p5, %p477_p3 }
  0x1b   : > { %p485_p9 = scmp.lt.s32.totalorder %s2562_s22, 3  ;;  %p2741_p11 = scmp.eq.s32.totalorder %s1901_s2, 0 }
  0x1c   : > { %s3078_s27 = scalar_select %p2729_p8, 1, 0 }
  0x1d   : > { %s2735_s28 = scalar_select %p459_p7, %s2550_s20, %s461_s25  }
  0x1e   : > { %3079 = sst [smem:[#allocation28_spill]] %s3078_s27  ;;  %p2737_p10 = pnand %p1903_p6, %p485_p9 }
  0x1f   : > { %3080 = sst [smem:[#allocation29_spill]] %s2735_s28  ;;  %s2564_s23 = smov [#allocation8]  }
  0x20   : > { %s3081_s29 = scalar_select %p2737_p10, 1, 0 }
  0x21   : > { %s3082_s0 = scalar_select %p2741_p11, 1, 0 }
  0x22   : > { %p2140_p12 = pneg %p2737_p10  ;;  %s509_s26 = sshll.u32 %s2564_s23, 4  ;;  %s510_s26 = int_to_ptr.vmem [resolvable:$true] %s509_s26 }
  0x23   : > { %s2565_s24 = smov [#allocation11]   ;;  %s2566_s28 = smov [#allocation14]  }
  0x24   : > { %s537_s1 = sshll.u32 %s2565_s24, 4  ;;  %p2749_p13 = pnand %p2741_p11, %p2140_p12  ;;  %s538_s1 = int_to_ptr.vmem [resolvable:$true] %s537_s1 }
  0x25   : > { %s561_s2 = sshll.u32 %s2566_s28, 4  ;;  %s2299_s27 = scalar_lea.vmem %s510_s26, 16  ;;  %s562_s2 = int_to_ptr.vmem [resolvable:$true] %s561_s2 }
  0x26   : > { %p2755_p0 = pneg %p2749_p13  ;;  %p2300_p1 = scmp.ne.s32.totalorder %s510_s26, %s2299_s27 }
  0x27   : > { %s2306_s24 = scalar_lea.vmem %s510_s26, 32  ;;  %p2307_p5 = scmp.lt.s32.totalorder %s510_s26, %s510_s26 }
  0x28   : > { %p2302_p2 = pnand %p2300_p1, %p2755_p0  ;;  %p2308_p6 = scmp.lt.s32.totalorder %s2306_s24, %s2299_s27 }
  0x2a   : > { %p2303_p3 = pneg %p2302_p2  ;;  %p2309_p7 = por %p2308_p6, %p2307_p5 }
  0x2c   : > { %p2310_p9 = pnand %p2309_p7, %p2303_p3 }
  0x2e   : > { %2313 = shalt.err (!%p2310_p9)
}
  0x2f   : > { %s3085_s22 = sld [smem:[#allocation32_spill]]  ;;  %s2325_s19 = scalar_lea.vmem %s538_s1, 16 }
  0x30   : > { %p2326_p12 = scmp.ne.s32.totalorder %s538_s1, %s2325_s19  ;;  %s2332_s18 = scalar_lea.vmem %s538_s1, 32 }
  0x31   : > { %p2333_p1 = scmp.lt.s32.totalorder %s538_s1, %s538_s1  ;;  %p2334_p2 = scmp.lt.s32.totalorder %s2332_s18, %s2325_s19 }
  0x32   : > { %p2328_p8 = pnand %p2326_p12, %p2755_p0 }
  0x33   : > { %p2335_p11 = por %p2334_p2, %p2333_p1 }
  0x34   : > { %p2329_p4 = pneg %p2328_p8 }
  0x35   : > { %2146 = dma.hbm_to_vmem [thread:$0]  (!%p2749_p13), %s3085_s22, 16, %s510_s26, [#allocation9]  }
  0x36   : > { %p2336_p10 = pnand %p2335_p11, %p2329_p4 }
  0x38   : > { %2339 = shalt.err (!%p2336_p10)
}
  0x39   : > { %2152 = dma.hbm_to_vmem [thread:$0]  (!%p2749_p13), %s3037_s6, 16, %s538_s1, [#allocation12]  }
  0x3a   : > { %s2351_s22 = scalar_lea.vmem %s562_s2, 16  ;;  %s2358_s26 = scalar_lea.vmem %s562_s2, 32 }
  0x3b   : > { %p2352_p3 = scmp.ne.s32.totalorder %s562_s2, %s2351_s22  ;;  %p2359_p8 = scmp.lt.s32.totalorder %s562_s2, %s562_s2 }
  0x3c   : > { %p2360_p7 = scmp.lt.s32.totalorder %s2358_s26, %s2351_s22 }
  0x3d   : > { %p2354_p5 = pnand %p2352_p3, %p2755_p0 }
  0x3e   : > { %p2361_p9 = por %p2360_p7, %p2359_p8 }
  0x3f   : > { %p2355_p6 = pneg %p2354_p5 }
  0x41   : > { %p2362_p12 = pnand %p2361_p9, %p2355_p6 }
  0x43   : > { %2365 = shalt.err (!%p2362_p12)
}
  0x44   : > { %2158 = dma.hbm_to_vmem [thread:$0]  (!%p2749_p13), %s3039_s8, 16, %s562_s2, [#allocation15]  }
  0x45   : > { %s2567_s1 = smov [#allocation5]   ;;  %s2568_s23 = smov [#allocation10]  }
  0x46   : > { %s498_s28 = sshll.u32 %s2567_s1, 4  ;;  %s523_s27 = sshll.u32 %s2568_s23, 4  ;;  %s499_s28 = int_to_ptr.vmem [resolvable:$true] %s498_s28  ;;  %s524_s27 = int_to_ptr.vmem [resolvable:$true] %s523_s27 }
  0x47   : > { %s2377_s24 = scalar_lea.vmem %s499_s28, 16  ;;  %s2384_s22 = scalar_lea.vmem %s499_s28, 32 }
  0x48   : > { %p2378_p4 = scmp.ne.s32.totalorder %s499_s28, %s2377_s24  ;;  %p2385_p1 = scmp.lt.s32.totalorder %s499_s28, %s499_s28 }
  0x49   : > { %p2386_p2 = scmp.lt.s32.totalorder %s2384_s22, %s2377_s24 }
  0x4a   : > { %p2380_p10 = pnand %p2378_p4, %p2755_p0 }
  0x4b   : > { %p2387_p3 = por %p2386_p2, %p2385_p1 }
  0x4c   : > { %p2381_p11 = pneg %p2380_p10 }
  0x4e   : > { %p2388_p5 = pnand %p2387_p3, %p2381_p11 }
  0x50   : > { %2391 = shalt.err (!%p2388_p5)
}
  0x51   : > { %s3086_s18 = sld [smem:[#allocation31_spill]]  ;;  %s2403_s19 = scalar_lea.vmem %s524_s27, 16 }
  0x52   : > { %p2404_p6 = scmp.ne.s32.totalorder %s524_s27, %s2403_s19  ;;  %s2410_s1 = scalar_lea.vmem %s524_s27, 32 }
  0x53   : > { %p2411_p9 = scmp.lt.s32.totalorder %s524_s27, %s524_s27  ;;  %p2412_p12 = scmp.lt.s32.totalorder %s2410_s1, %s2403_s19 }
  0x54   : > { %p2406_p8 = pnand %p2404_p6, %p2755_p0 }
  0x55   : > { %p2413_p4 = por %p2412_p12, %p2411_p9 }
  0x56   : > { %p2407_p7 = pneg %p2406_p8 }
  0x57   : > { %2143 = dma.hbm_to_vmem [thread:$0]  (!%p2749_p13), %s3086_s18, 16, %s499_s28, [#allocation6]  }
  0x58   : > { %p2414_p10 = pnand %p2413_p4, %p2407_p7 }
  0x5a   : > { %2417 = shalt.err (!%p2414_p10)
}
  0x5b   : > { %s3087_s4 = sld [smem:[#allocation34_spill]]  ;;  %s2569_s22 = smov [#allocation13]  }
  0x5c   : > { %s547_s28 = sshll.u32 %s2569_s22, 4  ;;  %s548_s28 = int_to_ptr.vmem [resolvable:$true] %s547_s28 }
  0x5d   : > { %s2429_s2 = scalar_lea.vmem %s548_s28, 256  ;;  %p2437_p3 = scmp.lt.s32.totalorder %s548_s28, %s548_s28 }
  0x5e   : > { %p2430_p11 = scmp.ne.s32.totalorder %s548_s28, %s2429_s2  ;;  %p2438_p5 = scmp.lt.s32.totalorder %s2429_s2, %s2429_s2 }
  0x60   : > { %p2432_p1 = pnand %p2430_p11, %p2755_p0  ;;  %p2439_p6 = por %p2438_p5, %p2437_p3 }
  0x61   : > { %2149 = dma.hbm_to_vmem [thread:$0]  (!%p2749_p13), %s3087_s4, 16, %s524_s27, [#allocation9]  }
  0x62   : > { %p2433_p2 = pneg %p2432_p1 }
  0x64   : > { %p2440_p8 = pnand %p2439_p6, %p2433_p2 }
  0x66   : > { %2443 = shalt.err (!%p2440_p8)
}
  0x67   : > { %s2570_s26 = smov 64   ;;  %s2571_s18 = smov 4  }
  0x68   : > { %2155 = dma.hbm_to_vmem [thread:$0]  (!%p2749_p13), %s3038_s7, 256, %s548_s28, [#allocation12], %s2570_s26, %s2570_s26, %s2571_s18  }
  0x69   : > { %s2572_s1 = smov [#allocation16]  }
  0x6a   : > { %s583_s23 = sshll.u32 %s2572_s1, 4  ;;  %s584_s23 = int_to_ptr.vmem [resolvable:$true] %s583_s23 }
  0x6b   : > { %s2455_s24 = scalar_lea.vmem %s584_s23, 256  ;;  %p2463_p4 = scmp.lt.s32.totalorder %s584_s23, %s584_s23 }
  0x6c   : > { %p2456_p7 = scmp.ne.s32.totalorder %s584_s23, %s2455_s24  ;;  %p2464_p10 = scmp.lt.s32.totalorder %s2455_s24, %s2455_s24 }
  0x6e   : > { %p2458_p9 = pnand %p2456_p7, %p2755_p0  ;;  %p2465_p11 = por %p2464_p10, %p2463_p4 }
  0x70   : > { %p2459_p12 = pneg %p2458_p9 }
  0x72   : > { %p2466_p1 = pnand %p2465_p11, %p2459_p12 }
  0x74   : > { %2469 = shalt.err (!%p2466_p1)
}
  0x75   : > { %2161 = dma.hbm_to_vmem [thread:$0]  (!%p2749_p13), %s3044_s13, 256, %s584_s23, [#allocation15], %s2570_s26, %s2570_s26, %s2571_s18  }
  0x76   : > { %p3088_p2 = scmp.ne.s32.totalorder %s3081_s29, 0 }
  0x77   : > { %p3089_p3 = scmp.ne.s32.totalorder (!%p3088_p2), %s3082_s0, 0 }
  0x78   : > { %621 = sbr.rel (%p3088_p2) target bundleno = 2302 (0x8fe), region = 96 }
  0x7d   : > { %2521 = dma.done.wait (%p3089_p3), [#allocation6], 16  }
  0x7e   : > { %2523 = vsyncadd (%p3089_p3), [#allocation6], 4294967280 }
  0x7f   : > { %2525 = dma.done.wait (%p3089_p3), [#allocation9], 32  }
  0x80   : > { %2527 = vsyncadd (%p3089_p3), [#allocation9], 4294967264 }
  0x81   : > { %2529 = dma.done.wait (%p3089_p3), [#allocation12], 272  }
  0x82   : > { %2531 = vsyncadd (%p3089_p3), [#allocation12], 4294967024 }
  0x83   : > { %2533 = dma.done.wait (%p3089_p3), [#allocation15], 272  }
  0x84   : > { %2535 = vsyncadd (%p3089_p3), [#allocation15], 4294967024  ;;  %p700_p13 = scmp.lt.s32.totalorder %s2554_s21, 1  ;;  %s3090_s26 = sld [smem:[#allocation30_spill]]  ;;  %vm712_vm0 = vcmask 261120   ;;  %v2246_v4 = vld [vmem:[%s3036_s5 + $0x8] sm:$0xff]  }
  0x85   : > { %v2247_v5 = vld [vmem:[#allocation13 + $0x8] sm:$0xff]   ;;  %v2573_v6 = vmov 0.0   ;;  %v2249_v8 = vld [vmem:[#allocation13] sm:$0xff]   ;;  %vm2574_vm1 = vmmov 0   ;;  %v1972_v26 = vld [vmem:[#allocation5] ss:$0 sm:$0xff] }
  0x86   : > { %s701_s20 = scalar_select %p700_p13, %s2554_s21, 1  ;;  %2010 = vmatprep.subr.bf16.mxu0 %v2573_v6  ;;  %2018 = vmatprep.subr.bf16.mxu1 %v2573_v6  ;;  %v2248_v7 = vld [vmem:[%s3036_s5] sm:$0xff]   ;;  %v1973_v29 = vld [vmem:[#allocation8] ss:$0 sm:$0xff]  ;;  %v1922_v39 = vld [vmem:[#allocation11] ss:$0 sm:$0xff] }
  0x87   : > { %2011 = vmatpush3.bf16.msra.mxu0 %v2246_v4  ;;  %2019 = vmatpush3.bf16.msra.mxu1 %v2247_v5  ;;  %s3091_s22 = sld [smem:[#allocation33_spill]]  ;;  %v1926_v40 = vld [vmem:[#allocation14] ss:$0 sm:$0xff]  ;;  %vm811_vm2 = vcmask 257024   ;;  %v1930_v53 = vld [vmem:[#allocation10] ss:$0 sm:$0xff] }
  0x88   : > { %s1921_s29 = sshll.u32 %s701_s20, 3  ;;  %2012 = vmatprep.subr.bf16.mxu0 %v2573_v6  ;;  %2020 = vmatprep.subr.bf16.mxu1 %v2573_v6  ;;  %vm982_vm3 = vcmask 64512   ;;  %vm1042_vm4 = vcmask 1043456   ;;  %s2575_s25 = smov 120   ;;  %vm1089_vm5 = vcmask 60416   ;;  %vm1215_vm6 = vcmask 126016  }
  0x89   : > { %2014 = vmatprep.mubr.msk.bf16.mxu0 %vm2574_vm1, %v2573_v6  ;;  %2022 = vmatprep.mubr.msk.bf16.mxu1 %vm2574_vm1, %v2573_v6  ;;  %s2576_s28 = smov 112   ;;  %s2579_s23 = smov 16   ;;  %vm1334_vm7 = vcmask 191616   ;;  %vm1453_vm8 = vcmask 257216   ;;  %vm1670_vm9 = vcmask 523264  }
  0x8a   : > { %s703_s18 = scalar_lea.vmem %s3090_s26, %s1921_s29  ;;  %s2577_s26 = smov 104  }
  0x8b   : > { %v2831_v0 = vld [vmem:[%s703_s18] sm:$0xff]  ;;  %2013 = vmatpush3.bf16.msra.mxu0 %v2248_v7  ;;  %2021 = vmatpush3.bf16.msra.mxu1 %v2249_v8  ;;  %s2578_s18 = smov 8   ;;  %s2580_s24 = smov 24  }
  0x8c   : > { %v882_v1 = vsel %vm712_vm0, %v2831_v0, 0.0  ;;  %v887_v2 = vmul.f32 %v2831_v0, %v2831_v0  ;;  %2026 = vmatprep.subr.bf16.mxu0 %v2573_v6  ;;  %2034 = vmatprep.subr.bf16.mxu1 %v2573_v6  ;;  %p3095_p5 = scmp.ne.s32.totalorder %s3077_s3, 0  ;;  %s2581_s19 = smov [#allocation17]  }
  0x8d   : > { %883 = vadd.xlane.f32.xlu1 %v882_v1  ;;  %714 = vadd.xlane.f32.xlu0 %v882_v1  ;;  %s3092_s2 = smov %s3091_s22  ;;  %v2250_v33 = vld [vmem:[%s3091_s22 + $0x8] sm:$0xff]   ;;  %s2474_s27 = sshll.u32 %s2581_s19, 4  ;;  %s2475_s27 = int_to_ptr.vmem [resolvable:$false] %s2474_s27 }
  0x8e   : > { %v888_v3 = vsel %vm712_vm0, %v887_v2, 0.0  ;;  %v2251_v36 = vld [vmem:[%s3092_s2] sm:$0xff]  }
  0x91   : > { %889 = vadd.xlane.f32.xlu1 %v888_v3  ;;  %720 = vadd.xlane.f32.xlu0 %v888_v3 }
 0x116   : > { %v884_v9 = vpop.xlane.xlu1 %883  ;;  %v715_v10 = vpop.xlane.xlu0 %714 }
 0x117   : > { %v886_v11 = vmul.f32 0.03125, %v884_v9  ;;  %v717_v12 = vmul.f32 0.03125, %v715_v10 }
 0x119   : > { %v892_v13 = vmul.f32 %v886_v11, %v886_v11  ;;  %v723_v16 = vmul.f32 %v717_v12, %v717_v12  ;;  %v725_v24 = vsub.f32 %v2831_v0, %v717_v12  ;;  %v894_v27 = vsub.f32 %v2831_v0, %v886_v11 }
 0x11a   : > { %v890_v14 = vpop.xlane.xlu1 %889  ;;  %v721_v15 = vpop.xlane.xlu0 %720 }
 0x11b   : > { %v891_v17 = vmul.f32 0.03125, %v890_v14  ;;  %v722_v18 = vmul.f32 0.03125, %v721_v15 }
 0x11d   : > { %v893_v19 = vsub.f32 %v891_v17, %v892_v13  ;;  %v724_v20 = vsub.f32 %v722_v18, %v723_v16 }
 0x11f   : > { %v895_v21 = vadd.f32 1e-05, %v893_v19  ;;  %v726_v22 = vadd.f32 1e-05, %v724_v20 }
 0x121   : > { %2262 = vrsqrt.f32 %v895_v21 }
 0x122   : > { %2264 = vrsqrt.f32 %v726_v22 }
 0x12e   : > { %v2263_v23 = vpop.eup %2262 }
 0x12f   : > { %v2265_v25 = vpop.eup %2264  ;;  %v897_v31 = vmul.f32 %v2263_v23, %v894_v27 }
 0x130   : > { %v728_v28 = vmul.f32 %v2265_v25, %v725_v24 }
 0x131   : > { %v904_v35 = vmul.f32 %v1972_v26, %v897_v31 }
 0x132   : > { %v735_v30 = vmul.f32 %v1972_v26, %v728_v28 }
 0x133   : > { %v911_v37 = vadd.f32 %v1973_v29, %v904_v35 }
 0x134   : > { %v742_v32 = vadd.f32 %v1973_v29, %v735_v30 }
 0x135   : > { %v912_v38 = vpack.c.bf16 %v911_v37, %v911_v37 }
 0x136   : > { %v743_v34 = vpack.c.bf16 %v742_v32, %v742_v32 }
 0x138   : > { %2015 = vmatmul.mubr.msk.bf16.vlgmr.msra.gmra.mxu0 %vm712_vm0, %v743_v34  ;;  %2023 = vmatmul.mubr.msk.bf16.vlgmr.msra.gmra.mxu1 %vm712_vm0, %v743_v34 }
 0x139   : > { %2027 = vmatpush3.bf16.msra.mxu0 %v2250_v33  ;;  %2030 = vmatprep.mubr.msk.bf16.mxu0 %vm2574_vm1, %v2573_v6 }
 0x13a   : > { %2028 = vmatprep.subr.bf16.mxu0 %v2573_v6  ;;  %2036 = vmatprep.mubr.msk.bf16.mxu1 %vm2574_vm1, %v2573_v6 }
 0x13d   : > { %2029 = vmatpush3.bf16.msra.mxu0 %v2251_v36 }
 0x13e   : > { %2040 = vmatprep.subr.bf16.mxu0 %v2573_v6 }
 0x140   : > { %2031 = vmatmul.mubr.msk.bf16.vlgmr.msra.gmra.mxu0 %vm712_vm0, %v912_v38 }
 0x141   : > { %2042 = vmatprep.mubr.msk.bf16.mxu0 %vm2574_vm1, %v2573_v6 }
 0x1f8   : > { %v804_v41 = vpop.f32.mrf.mxu0  ;;  %v870_v42 = vpop.f32.mrf.mxu1 }
 0x1f9   : > { %v805_v43 = vadd.f32 %v1922_v39, %v804_v41  ;;  %v871_v44 = vadd.f32 %v1926_v40, %v870_v42 }
 0x1fa   : > { %v2016_v45 = vpop.f32.mrf.mxu0  ;;  %v2024_v46 = vpop.f32.mrf.mxu1 }
 0x1fb   : > { %v810_v47 = vpack.c.bf16 %v805_v43, %v805_v43  ;;  %v876_v48 = vpack.c.bf16 %v871_v44, %v871_v44 }
 0x1fc   : > { %v807_v49 = vpop.f32.mrf.mxu0  ;;  %v873_v50 = vpop.f32.mrf.mxu1 }
 0x1fd   : > { %812 = vst.msk [vmem:[#allocation2] sm:$0xf] %vm811_vm2, %v810_v47  ;;  %877 = vst.msk [vmem:[#allocation3] sm:$0xf] %vm811_vm2, %v876_v48 }
 0x1fe   : > { %v2017_v51 = vpop.f32.mrf.mxu0  ;;  %v2025_v52 = vpop.f32.mrf.mxu1 }
 0x200   : > { %v973_v54 = vpop.f32.mrf.mxu0 }
 0x201   : > { %v974_v55 = vadd.f32 %v1930_v53, %v973_v54 }
 0x202   : > { %v2032_v56 = vpop.f32.mrf.mxu0 }
 0x203   : > { %v979_v57 = vpack.c.bf16 %v974_v55, %v974_v55 }
 0x204   : > { %v976_v58 = vpop.f32.mrf.mxu0  ;;  %v980_v59 = vld [vmem:[#allocation2] sm:$0xf]  ;;  %v981_v60 = vld [vmem:[#allocation3] sm:$0xf] }
 0x205   : > { %1092 = vrot.lane.b32.xlu1 %v979_v57, %s2575_s25  ;;  %v987_v61 = vsel %vm982_vm3, %v980_v59, 0  ;;  %v1044_v62 = vsel %vm1042_vm4, %v981_v60, 0  ;;  %v1936_v63 = vcombine.low %v980_v59, %v980_v59  ;;  %v1938_v29 = vcombine.low %v981_v60, %v981_v60 }
 0x206   : > { %v2033_v1 = vpop.f32.mrf.mxu0  ;;  %2035 = vmatpush3.bf16.xpose.msra.mxu1 %v987_v61  ;;  %2041 = vmatpush3.bf16.msra.mxu0 %v1044_v62 }
 0x207   : > { %1097 = vrot.lane.b32.xlu0 %v1936_v63, %s2575_s25  ;;  %2046 = vmatprep.subr.bf16.mxu1 %v2573_v6 }
 0x208   : > { %2052 = vmatprep.subr.bf16.mxu0 %v2573_v6 }
 0x209   : > { %1219 = vrot.lane.b32.xlu1 %v1936_v63, %s2576_s28 }
 0x20b   : > { %1338 = vrot.lane.b32.xlu0 %v1936_v63, %s2577_s26 }
 0x20d   : > { %1217 = vrot.lane.b32.xlu1 %v979_v57, %s2576_s28  ;;  %2037 = vmatmul.mubr.msk.bf16.vlgmr.msra.gmra.mxu1 %vm982_vm3, %v979_v57 }
 0x20e   : > { %2048 = vmatprep.mubr.msk.bf16.mxu1 %vm2574_vm1, %v2573_v6 }
 0x211   : > { %1336 = vrot.lane.b32.xlu1 %v979_v57, %s2577_s26 }
 0x277   : > { %v1093_v2 = vpop.permute.xlu1 %1092 }
 0x279   : > { %v1098_v3 = vpop.permute.xlu0 %1097 }
 0x27a   : > { %v1103_v4 = vsel %vm982_vm3, %v1098_v3, 0 }
 0x27b   : > { %2047 = vmatpush3.bf16.xpose.msra.mxu1 %v1103_v4  ;;  %v1220_v5 = vpop.permute.xlu1 %1219 }
 0x27c   : > { %2058 = vmatprep.subr.bf16.mxu1 %v2573_v6  ;;  %v1225_v7 = vsel %vm982_vm3, %v1220_v5, 0 }
 0x27d   : > { %v1339_v8 = vpop.permute.xlu0 %1338 }
 0x27e   : > { %v1344_v10 = vsel %vm982_vm3, %v1339_v8, 0 }
 0x27f   : > { %v1218_v9 = vpop.permute.xlu1 %1217 }
 0x282   : > { %2049 = vmatmul.mubr.msk.bf16.vlgmr.msra.gmra.mxu1 %vm982_vm3, %v1093_v2 }
 0x283   : > { %2059 = vmatpush3.bf16.xpose.msra.mxu1 %v1225_v7  ;;  %2060 = vmatprep.mubr.msk.bf16.mxu1 %vm2574_vm1, %v2573_v6  ;;  %v1337_v11 = vpop.permute.xlu1 %1336 }
 0x284   : > { %2070 = vmatprep.subr.bf16.mxu1 %v2573_v6 }
 0x28a   : > { %2061 = vmatmul.mubr.msk.bf16.vlgmr.msra.gmra.mxu1 %vm982_vm3, %v1218_v9 }
 0x28b   : > { %2071 = vmatpush3.bf16.xpose.msra.mxu1 %v1344_v10  ;;  %2072 = vmatprep.mubr.msk.bf16.mxu1 %vm2574_vm1, %v2573_v6 }
 0x28c   : > { %2082 = vmatprep.subr.bf16.mxu1 %v2573_v6 }
 0x292   : > { %2073 = vmatmul.mubr.msk.bf16.vlgmr.msra.gmra.mxu1 %vm982_vm3, %v1337_v11 }
 0x293   : > { %2086 = vmatprep.mubr.msk.bf16.mxu1 %vm2574_vm1, %v2573_v6 }
 0x2cd   : > { %v1023_v12 = vpop.f32.mrf.mxu1 }
 0x2ce   : > { %v1029_v13 = vsel %vm982_vm3, %v1023_v12, -inf }
 0x2cf   : > { %1030 = vmax.xlane.f32.xlu0 %v1029_v13  ;;  %v2038_v14 = vpop.f32.mrf.mxu1 }
 0x2d1   : > { %v1026_v15 = vpop.f32.mrf.mxu1 }
 0x2d3   : > { %v2039_v16 = vpop.f32.mrf.mxu1 }
 0x342   : > { %v1139_v17 = vpop.f32.mrf.mxu1 }
 0x343   : > { %v1145_v18 = vsel %vm982_vm3, %v1139_v17, -inf }
 0x344   : > { %1146 = vmax.xlane.f32.xlu1 %v1145_v18  ;;  %v2050_v19 = vpop.f32.mrf.mxu1 }
 0x346   : > { %v1142_v20 = vpop.f32.mrf.mxu1 }
 0x348   : > { %v2051_v21 = vpop.f32.mrf.mxu1 }
 0x349   : > { %v2254_v21 = vld [vmem:[%s3040_s9 + $0x8] sm:$0xff]  }
 0x34a   : > { %v1261_v22 = vpop.f32.mrf.mxu1  ;;  %2083 = vmatpush3.bf16.msra.mxu1 %v2254_v21 }
 0x34b   : > { %v1267_v23 = vsel %vm982_vm3, %v1261_v22, -inf  ;;  %2084 = vmatprep.subr.bf16.mxu1 %v2573_v6 }
 0x34c   : > { %1268 = vmax.xlane.f32.xlu0 %v1267_v23  ;;  %v2062_v24 = vpop.f32.mrf.mxu1 }
 0x34d   : > { %v2255_v24 = vld [vmem:[%s3040_s9] sm:$0xff]  }
 0x34e   : > { %v1264_v25 = vpop.f32.mrf.mxu1  ;;  %2085 = vmatpush3.bf16.msra.mxu1 %v2255_v24 }
 0x34f   : > { %2098 = vmatprep.subr.bf16.mxu1 %v2573_v6 }
 0x350   : > { %v2063_v26 = vpop.f32.mrf.mxu1 }
 0x352   : > { %v1380_v27 = vpop.f32.mrf.mxu1 }
 0x353   : > { %v1386_v28 = vsel %vm982_vm3, %v1380_v27, -inf }
 0x354   : > { %1387 = vmax.xlane.f32.xlu0 %v1386_v28  ;;  %v2074_v30 = vpop.f32.mrf.mxu1 }
 0x355   : > { %1277 = vrot.lane.b32.xlu1 %v1938_v29, %s2576_s28  ;;  %s3094_s28 = sld [smem:[#allocation36_spill]] }
 0x356   : > { %v1383_v31 = vpop.f32.mrf.mxu1 }
 0x358   : > { %v1031_v32 = vpop.xlane.xlu0 %1030  ;;  %v2075_v33 = vpop.f32.mrf.mxu1 }
 0x359   : > { %v1032_v34 = vsub.f32 %v1023_v12, %v1031_v32  ;;  %1396 = vrot.lane.b32.xlu1 %v1938_v29, %s2577_s26  ;;  %s697_s26 = sand.u32 1, %s2546_s30  }
 0x35a   : > { %s1748_s4 = scalar_lea.sflag [#allocation7], %s697_s26 }
 0x35b   : > { %v1033_v35 = vmul.f32 1.442695, %v1032_v34 }
 0x35d   : > { %2266 = vpow2.f32 %v1033_v35 }
 0x36a   : > { %v2267_v36 = vpop.eup %2266  ;;  %1158 = vrot.lane.b32.xlu0 %v1938_v29, %s2575_s25 }
 0x36b   : > { %v1038_v37 = vpack.c.bf16 %v2267_v36, %v2267_v36  ;;  %v1035_v61 = vsel %vm982_vm3, %v2267_v36, 0.0 }
 0x36d   : > { %2043 = vmatmul.mubr.msk.bf16.vlgmr.msra.gmra.mxu0 %vm982_vm3, %v1038_v37 }
 0x36e   : > { %2054 = vmatprep.mubr.msk.bf16.mxu0 %vm2574_vm1, %v2573_v6 }
 0x3cd   : > { %v1147_v38 = vpop.xlane.xlu1 %1146 }
 0x3ce   : > { %v1148_v39 = vsub.f32 %v1139_v17, %v1147_v38 }
 0x3d0   : > { %v1149_v40 = vmul.f32 1.442695, %v1148_v39  ;;  %v1947_v39 = vld [vmem:[%s3041_s10] ss:$0 sm:$0xff] }
 0x3d1   : > { %v1278_v51 = vpop.permute.xlu1 %1277 }
 0x3d2   : > { %2268 = vpow2.f32 %v1149_v40  ;;  %v1283_v53 = vsel %vm1042_vm4, %v1278_v51, 0 }
 0x3d5   : > { %v1269_v41 = vpop.xlane.xlu0 %1268  ;;  %v1397_v56 = vpop.permute.xlu1 %1396 }
 0x3d6   : > { %v1270_v42 = vsub.f32 %v1261_v22, %v1269_v41  ;;  %v1402_v58 = vsel %vm1042_vm4, %v1397_v56, 0 }
 0x3d8   : > { %v1271_v43 = vmul.f32 1.442695, %v1270_v42 }
 0x3da   : > { %2270 = vpow2.f32 %v1271_v43 }
 0x3dd   : > { %v1388_v44 = vpop.xlane.xlu0 %1387 }
 0x3de   : > { %v1389_v45 = vsub.f32 %v1380_v27, %v1388_v44 }
 0x3df   : > { %v2269_v46 = vpop.eup %2268 }
 0x3e0   : > { %v1390_v47 = vmul.f32 1.442695, %v1389_v45  ;;  %v1151_v48 = vsel %vm982_vm3, %v2269_v46, 0.0  ;;  %v1154_v52 = vpack.c.bf16 %v2269_v46, %v2269_v46 }
 0x3e1   : > { %1152 = vadd.xlane.f32.xlu1 %v1151_v48  ;;  %v1159_v49 = vpop.permute.xlu0 %1158 }
 0x3e2   : > { %2272 = vpow2.f32 %v1390_v47  ;;  %v1164_v50 = vsel %vm1042_vm4, %v1159_v49, 0  ;;  %v2256_v49 = vld [vmem:[#allocation16 + $0x8] sm:$0xff]  }
 0x3e3   : > { %2053 = vmatpush3.bf16.msra.mxu0 %v1164_v50  ;;  %v2257_v50 = vld [vmem:[#allocation16] sm:$0xff]  }
 0x3e4   : > { %2064 = vmatprep.subr.bf16.mxu0 %v2573_v6 }
 0x3e6   : > { %2055 = vmatmul.mubr.msk.bf16.vlgmr.msra.gmra.mxu0 %vm982_vm3, %v1154_v52 }
 0x3e7   : > { %v2271_v54 = vpop.eup %2270  ;;  %2065 = vmatpush3.bf16.msra.mxu0 %v1283_v53  ;;  %2066 = vmatprep.mubr.msk.bf16.mxu0 %vm2574_vm1, %v2573_v6 }
 0x3e8   : > { %v1273_v55 = vsel %vm982_vm3, %v2271_v54, 0.0  ;;  %2076 = vmatprep.subr.bf16.mxu0 %v2573_v6  ;;  %v1276_v57 = vpack.c.bf16 %v2271_v54, %v2271_v54 }
 0x3e9   : > { %1274 = vadd.xlane.f32.xlu0 %v1273_v55 }
 0x3ee   : > { %2067 = vmatmul.mubr.msk.bf16.vlgmr.msra.gmra.mxu0 %vm982_vm3, %v1276_v57 }
 0x3ef   : > { %v2273_v59 = vpop.eup %2272  ;;  %2077 = vmatpush3.bf16.msra.mxu0 %v1402_v58  ;;  %2078 = vmatprep.mubr.msk.bf16.mxu0 %vm2574_vm1, %v2573_v6 }
 0x3f0   : > { %v1392_v60 = vsel %vm982_vm3, %v2273_v59, 0.0  ;;  %2090 = vmatprep.subr.bf16.mxu0 %v2573_v6  ;;  %v1395_v62 = vpack.c.bf16 %v2273_v59, %v2273_v59  ;;  %v1951_v59 = vld [vmem:[%s3042_s11] ss:$0 sm:$0xff] }
 0x3f1   : > { %1393 = vadd.xlane.f32.xlu0 %v1392_v60 }
 0x3f5   : > { %1036 = vadd.xlane.f32.xlu0 %v1035_v61  ;;  %v1952_v61 = vld [vmem:[%s3043_s12] ss:$0 sm:$0xff] }
 0x3f6   : > { %2079 = vmatmul.mubr.msk.bf16.vlgmr.msra.gmra.mxu0 %vm982_vm3, %v1395_v62 }
 0x3f7   : > { %2094 = vmatprep.mubr.msk.bf16.mxu0 %vm2574_vm1, %v2573_v6  ;;  %2091 = vmatpush3.bf16.msra.mxu0 %v2256_v49 }
 0x3f8   : > { %2092 = vmatprep.subr.bf16.mxu0 %v2573_v6 }
 0x3fb   : > { %2093 = vmatpush3.bf16.msra.mxu0 %v2257_v50 }
 0x42d   : > { %v1080_v63 = vpop.f32.mrf.mxu0 }
 0x42f   : > { %v2044_v1 = vpop.f32.mrf.mxu0 }
 0x431   : > { %v1083_v2 = vpop.f32.mrf.mxu0 }
 0x432   : > { %v2258_v2 = vld [vmem:[%s3046_s15 + $0x18] sm:$0xff]  }
 0x433   : > { %v2045_v3 = vpop.f32.mrf.mxu0 }
 0x434   : > { %v2259_v3 = vld [vmem:[%s3046_s15 + $0x10] sm:$0xff]  }
 0x46a   : > { %v1153_v11 = vpop.xlane.xlu1 %1152 }
 0x472   : > { %v1275_v4 = vpop.xlane.xlu0 %1274 }
 0x47a   : > { %v1394_v5 = vpop.xlane.xlu0 %1393 }
 0x47e   : > { %v1037_v7 = vpop.xlane.xlu0 %1036 }
 0x47f   : > { %2274 = vrcp.f32 %v1037_v7  ;;  %v1953_v7 = vld [vmem:[%s3045_s14] ss:$0 sm:$0xff] }
 0x480   : > { %2276 = vrcp.f32 %v1153_v11 }
 0x481   : > { %2278 = vrcp.f32 %v1275_v4  ;;  %v2260_v4 = vld [vmem:[%s3046_s15 + $0x8] sm:$0xff]  }
 0x482   : > { %2280 = vrcp.f32 %v1394_v5  ;;  %v2261_v5 = vld [vmem:[%s3046_s15] sm:$0xff]  }
 0x48c   : > { %v2275_v8 = vpop.eup %2274 }
 0x48d   : > { %v1087_v9 = vmul.f32 %v2275_v8, %v1080_v63  ;;  %v2277_v12 = vpop.eup %2276 }
 0x48e   : > { %v2279_v19 = vpop.eup %2278 }
 0x48f   : > { %v1088_v10 = vpack.c.bf16 %v1087_v9, %v1087_v9  ;;  %v2281_v28 = vpop.eup %2280 }
 0x491   : > { %1090 = vst.msk [vmem:[#allocation4] sm:$0xf] %vm1089_vm5, %v1088_v10 }
 0x4a6   : > { %v1200_v13 = vpop.f32.mrf.mxu0 }
 0x4a7   : > { %v1207_v14 = vmul.f32 %v2277_v12, %v1200_v13 }
 0x4a8   : > { %v2056_v15 = vpop.f32.mrf.mxu0 }
 0x4a9   : > { %v1969_v16 = vpack.c.bf16 %v1207_v14, %v1207_v14 }
 0x4aa   : > { %v1203_v17 = vpop.f32.mrf.mxu0 }
 0x4ab   : > { %1212 = vrot.lane.b32.xlu1 %v1969_v16, %s2578_s18  ;;  %s1920_s18 = sshll.u32 %s697_s26, 3 }
 0x4ac   : > { %v2057_v18 = vpop.f32.mrf.mxu0  ;;  %s699_s22 = scalar_lea.vmem [#allocation17], %s1920_s18 }
 0x4ad   : > { %s1762_s20 = sshll.u32 %s699_s22, 4  ;;  %s1763_s20 = int_to_ptr.vmem [resolvable:$true] %s1762_s20 }
 0x4ae   : > { %v1319_v20 = vpop.f32.mrf.mxu0  ;;  %s2470_s0 = scalar_lea.vmem %s1763_s20, 128  ;;  %p2477_p7 = scmp.lt.s32.totalorder %s1763_s20, %s2475_s27 }
 0x4af   : > { %v1326_v22 = vmul.f32 %v2279_v19, %v1319_v20  ;;  %p2471_p0 = scmp.ne.s32.totalorder %s1763_s20, %s2470_s0 }
 0x4b0   : > { %v2068_v23 = vpop.f32.mrf.mxu0 }
 0x4b1   : > { %v1970_v25 = vpack.c.bf16 %v1326_v22, %v1326_v22  ;;  %v1957_v22 = vld [vmem:[%s3047_s16] ss:$0 sm:$0xff]  ;;  %p2472_p6 = pnand %p2471_p0, %p3095_p5 }
 0x4b2   : > { %v1322_v26 = vpop.f32.mrf.mxu0 }
 0x4b3   : > { %1331 = vrot.lane.b32.xlu0 %v1970_v25, %s2579_s23  ;;  %s3093_s23 = sld [smem:[#allocation35_spill]]  ;;  %p2473_p8 = pneg %p2472_p6 }
 0x4b4   : > { %v2069_v27 = vpop.f32.mrf.mxu0 }
 0x4b6   : > { %v1438_v29 = vpop.f32.mrf.mxu0 }
 0x4b7   : > { %v1445_v30 = vmul.f32 %v2281_v28, %v1438_v29 }
 0x4b8   : > { %v2080_v31 = vpop.f32.mrf.mxu0 }
 0x4b9   : > { %v1971_v32 = vpack.c.bf16 %v1445_v30, %v1445_v30 }
 0x4ba   : > { %v1441_v33 = vpop.f32.mrf.mxu0 }
 0x4bb   : > { %1450 = vrot.lane.b32.xlu1 %v1971_v32, %s2580_s24  ;;  %s1966_s24 = sshll.u32 %s2554_s21, 7  ;;  %s2476_s21 = scalar_lea.vmem %s2475_s27, 256 }
 0x4bc   : > { %v2081_v34 = vpop.f32.mrf.mxu0  ;;  %s1760_s2 = scalar_lea.hbm %s3094_s28, %s1966_s24  ;;  %p2478_p9 = scmp.lt.s32.totalorder %s2476_s21, %s2470_s0 }
 0x4be   : > { %p2479_p12 = por %p2478_p9, %p2477_p7 }
 0x4c0   : > { %p2480_p4 = pnand %p2479_p12, %p2473_p8 }
 0x51d   : > { %v1213_v35 = vpop.permute.xlu1 %1212 }
 0x51e   : > { %1216 = vst.msk [vmem:[#allocation4] sm:$0xf] %vm1215_vm6, %v1213_v35 }
 0x525   : > { %v1332_v36 = vpop.permute.xlu0 %1331 }
 0x526   : > { %1335 = vst.msk [vmem:[#allocation4] sm:$0xf] %vm1334_vm7, %v1332_v36 }
 0x52d   : > { %v1451_v37 = vpop.permute.xlu1 %1450 }
 0x52e   : > { %1454 = vst.msk [vmem:[#allocation4] sm:$0xf] %vm1453_vm8, %v1451_v37 }
 0x535   : > { %v1455_v38 = vld [vmem:[#allocation4] sm:$0xf] }
 0x536   : > { %2087 = vmatmul.mubr.msk.bf16.vlgmr.msra.gmra.mxu1 %vm712_vm0, %v1455_v38 }
 0x537   : > { %2106 = vmatprep.mubr.msk.bf16.mxu1 %vm2574_vm1, %v2573_v6  ;;  %2099 = vmatpush3.bf16.msra.mxu1 %v2258_v2 }
 0x538   : > { %2100 = vmatprep.subr.bf16.mxu1 %v2573_v6 }
 0x53b   : > { %2101 = vmatpush3.bf16.msra.mxu1 %v2259_v3 }
 0x53c   : > { %2102 = vmatprep.subr.bf16.mxu1 %v2573_v6 }
 0x53f   : > { %2103 = vmatpush3.bf16.msra.mxu1 %v2260_v4 }
 0x540   : > { %2104 = vmatprep.subr.bf16.mxu1 %v2573_v6 }
 0x543   : > { %2105 = vmatpush3.bf16.msra.mxu1 %v2261_v5 }
 0x5f6   : > { %v1516_v40 = vpop.f32.mrf.mxu1 }
 0x5f7   : > { %v1517_v41 = vadd.f32 %v1947_v39, %v1516_v40 }
 0x5f8   : > { %v2088_v42 = vpop.f32.mrf.mxu1 }
 0x5f9   : > { %v2945_v43 = vadd.f32 %v1517_v41, %v2831_v0  ;;  %v1963_v41 = vld [vmem:[%s3048_s17] ss:$0 sm:$0xff] }
 0x5fa   : > { %v1519_v44 = vpop.f32.mrf.mxu1 }
 0x5fb   : > { %v1525_v45 = vsel %vm712_vm0, %v2945_v43, 0.0  ;;  %v1529_v46 = vmul.f32 %v2945_v43, %v2945_v43 }
 0x5fc   : > { %1526 = vadd.xlane.f32.xlu1 %v1525_v45  ;;  %v2089_v47 = vpop.f32.mrf.mxu1 }
 0x5fd   : > { %v1530_v48 = vsel %vm712_vm0, %v1529_v46, 0.0 }
 0x5fe   : > { %1531 = vadd.xlane.f32.xlu0 %v1530_v48 }
 0x685   : > { %v1527_v0 = vpop.xlane.xlu1 %1526 }
 0x686   : > { %v1528_v51 = vmul.f32 0.03125, %v1527_v0 }
 0x687   : > { %v1532_v52 = vpop.xlane.xlu0 %1531 }
 0x688   : > { %v1534_v53 = vmul.f32 %v1528_v51, %v1528_v51  ;;  %v1533_v54 = vmul.f32 0.03125, %v1532_v52  ;;  %v1536_v57 = vsub.f32 %v2945_v43, %v1528_v51 }
 0x68a   : > { %v1535_v55 = vsub.f32 %v1533_v54, %v1534_v53 }
 0x68c   : > { %v1537_v56 = vadd.f32 1e-05, %v1535_v55 }
 0x68e   : > { %2282 = vrsqrt.f32 %v1537_v56 }
 0x69b   : > { %v2283_v58 = vpop.eup %2282 }
 0x69c   : > { %v1539_v60 = vmul.f32 %v2283_v58, %v1536_v57 }
 0x69e   : > { %v1546_v62 = vmul.f32 %v1951_v59, %v1539_v60 }
 0x6a0   : > { %v1553_v63 = vadd.f32 %v1952_v61, %v1546_v62 }
 0x6a2   : > { %v1554_v1 = vpack.c.bf16 %v1553_v63, %v1553_v63 }
 0x6a4   : > { %2095 = vmatmul.mubr.msk.bf16.vlgmr.msra.gmra.mxu0 %vm712_vm0, %v1554_v1 }
 0x764   : > { %v1615_v8 = vpop.f32.mrf.mxu0 }
 0x765   : > { %v1616_v9 = vadd.f32 %v1953_v7, %v1615_v8 }
 0x766   : > { %v2096_v10 = vpop.f32.mrf.mxu0 }
 0x767   : > { %v1622_v11 = vmul.f32 0.044715, %v1616_v9  ;;  %v1621_v19 = vmul.f32 0.5, %v1616_v9 }
 0x768   : > { %v1618_v12 = vpop.f32.mrf.mxu0 }
 0x769   : > { %v1623_v13 = vmul.f32 %v1622_v11, %v1616_v9 }
 0x76a   : > { %v2097_v14 = vpop.f32.mrf.mxu0 }
 0x76b   : > { %v1624_v15 = vmul.f32 %v1623_v13, %v1616_v9 }
 0x76d   : > { %v1625_v16 = vadd.f32 %v1624_v15, %v1616_v9 }
 0x76f   : > { %v1626_v17 = vmul.f32 0.7978846, %v1625_v16 }
 0x771   : > { %2284 = vtanh.f32 %v1626_v17 }
 0x77e   : > { %v2285_v18 = vpop.eup %2284 }
 0x77f   : > { %v1628_v20 = vadd.f32 1.0, %v2285_v18 }
 0x781   : > { %v1629_v6 = vmul.f32 %v1628_v20, %v1621_v19 }
 0x783   : > { %v1630_v21 = vpack.c.bf16 %v1629_v6, %v1629_v6 }
 0x785   : > { %2107 = vmatmul.mubr.msk.bf16.vlgmr.msra.gmra.mxu1 %vm1670_vm9, %v1630_v21 }
 0x845   : > { %v1708_v23 = vpop.f32.mrf.mxu1 }
 0x846   : > { %v1709_v24 = vadd.f32 %v1957_v22, %v1708_v23 }
 0x847   : > { %v2108_v25 = vpop.f32.mrf.mxu1 }
 0x848   : > { %v1714_v26 = vadd.f32 %v1709_v24, %v2945_v43  ;;  %v1964_v43 = vld [vmem:[%s3093_s23] ss:$0 sm:$0xff] }
 0x849   : > { %v1711_v27 = vpop.f32.mrf.mxu1 }
 0x84a   : > { %v1717_v28 = vsel %vm712_vm0, %v1714_v26, 0.0  ;;  %v1721_v29 = vmul.f32 %v1714_v26, %v1714_v26 }
 0x84b   : > { %1718 = vadd.xlane.f32.xlu0 %v1717_v28  ;;  %v2109_v30 = vpop.f32.mrf.mxu1 }
 0x84c   : > { %v1722_v31 = vsel %vm712_vm0, %v1721_v29, 0.0 }
 0x84d   : > { %1723 = vadd.xlane.f32.xlu1 %v1722_v31 }
 0x8d4   : > { %v1719_v32 = vpop.xlane.xlu0 %1718 }
 0x8d5   : > { %v1720_v33 = vmul.f32 0.03125, %v1719_v32 }
 0x8d6   : > { %v1724_v34 = vpop.xlane.xlu1 %1723 }
 0x8d7   : > { %v1726_v35 = vmul.f32 %v1720_v33, %v1720_v33  ;;  %v1725_v36 = vmul.f32 0.03125, %v1724_v34  ;;  %v1728_v39 = vsub.f32 %v1714_v26, %v1720_v33 }
 0x8d9   : > { %v1727_v37 = vsub.f32 %v1725_v36, %v1726_v35 }
 0x8db   : > { %v1729_v38 = vadd.f32 1e-05, %v1727_v37 }
 0x8dd   : > { %2286 = vrsqrt.f32 %v1729_v38 }
 0x8ea   : > { %v2287_v40 = vpop.eup %2286 }
 0x8eb   : > { %v1731_v42 = vmul.f32 %v2287_v40, %v1728_v39 }
 0x8ed   : > { %v1738_v44 = vmul.f32 %v1963_v41, %v1731_v42 }
 0x8ef   : > { %v1745_v45 = vadd.f32 %v1964_v43, %v1738_v44 }
 0x8f1   : > { %1746 = vst.msk [vmem:[%s699_s22] sm:$0xff] %vm712_vm0, %v1745_v45 }
 0x8f2   : > { %2483 = shalt.err (!%p2480_p4)
}
 0x8f3   : > { %s2484_s18 = scalar_lea.hbm %s1760_s2, 128  ;;  %s2488_s23 = scalar_lea.hbm %s3094_s28, 256 }
 0x8f4   : > { %p2485_p10 = scmp.ne.s32.totalorder %s1760_s2, %s2484_s18  ;;  %p2489_p2 = scmp.lt.s32.totalorder %s1760_s2, %s3094_s28 }
 0x8f5   : > { %p2490_p3 = scmp.lt.s32.totalorder %s2488_s23, %s2484_s18 }
 0x8f6   : > { %p2486_p11 = pnand %p2485_p10, %p3095_p5 }
 0x8f7   : > { %p2491_p13 = por %p2490_p3, %p2489_p2 }
 0x8f8   : > { %p2487_p1 = pneg %p2486_p11 }
 0x8fa   : > { %p2492_p0 = pnand %p2491_p13, %p2487_p1 }
 0x8fc   : > { %2495 = shalt.err (!%p2492_p0)
}
 0x8fd   : > { %2138 = dma.vmem_to_hbm [thread:$0]  (%p3095_p5), %s1763_s20, 128, %s1760_s2, %s1748_s4  }
 0x8fe PF: > { %s3096_s29 = sld [smem:[#allocation26_spill]] }
 0x8ff   : > { %s3097_s25 = sld [smem:[#allocation23_spill]] }
 0x900   : > { %s3098_s0 = sld [smem:[#allocation28_spill]] }
 0x904   : > { %p2180_p6 = scmp.ge.s32.totalorder %s3096_s29, 2 }
 0x905   : > { %s1774_s19 = sand.u32 1, %s3097_s25  }
 0x906   : > { %p3099_p8 = scmp.ne.s32.totalorder %s3098_s0, 0  ;;  %s1775_s27 = scalar_lea.sflag [#allocation7], %s1774_s19 }
 0x908   : > { %p2163_p7 = pnand %p2180_p6, %p3099_p8 }
 0x90a   : > { %p2164_p9 = pneg %p2163_p7 }
 0x90c   : > { %2537 = dma.done.wait (%p2164_p9), %s1775_s27, 128  }
 0x90d   : > { %2539 = vsyncadd (%p2164_p9), %s1775_s27, 4294967168  ;;  %s36_s22 = sadd.s32 1, %s3096_s29   ;;  %s3100_s21 = sld [smem:[#allocation24_spill]] }
 0x90e   : > { %p33_p12 = scmp.ge.s32.totalorder %s36_s22, 4   ;;  %s3101_s20 = sld [smem:[#allocation29_spill]] }
 0x90f   : > { %s3102_s3 = sld [smem:[#allocation25_spill]]  ;;  %s3104_s0 = smov %s2546_s30 }
 0x910   : > { %s3103_s1 = sld [smem:[#allocation27_spill]] }
 0x911   :  { %35 = sbr.rel (!%p33_p12) target bundleno = 16 (0x10), region = 165 }
 0x913   : > { %s3105_s30 = smov %s3100_s21 }
 0x915   : > { %s3106_s21 = smov %s3102_s3 }
 0x916   :  { %1780 = vsyncpa [#allocation6], 1 }
 0x917   :  { %1782 = vsyncpa [#allocation6 + $0x1], 1 }
 0x918   :  { %1783 = vsyncpa [#allocation9], 1 }
 0x919   :  { %1784 = vsyncpa [#allocation12], 1 }
 0x91a   :  { %1785 = vsyncpa [#allocation15], 1 }
 0x91b   :  { %1786 = vsyncpa [#allocation7], 1 }
 0x91c   :  { %1788 = vsyncpa [#allocation7 + $0x1], 1 }

// kernel: tpu_custom_call.1
= control target key start
LH: loop header
LB: loop body
LE: loop exit
PB: predicated region body
PF: predicated region fallthrough
CT: control target
= control target key end

     0   :  { %s3031_s0 = inlined_call_operand.vmem [shape: f32[2,8,32], index: 0, kind: input, shape index: {}]   ;;  %s3032_s1 = inlined_call_operand.hbm [shape: f32[1,32], index: 1, kind: input, shape index: {}]   ;;  %s3033_s2 = inlined_call_operand.hbm [shape: f32[1,32], index: 2, kind: input, shape index: {}]   ;;  %s3034_s3 = inlined_call_operand.vmem [shape: bf16[1,32,32], index: 3, kind: input, shape index: {}]   ;;  %s3035_s4 = inlined_call_operand.hbm [shape: f32[1,1,32], index: 4, kind: input, shape index: {}]   ;;  %s3036_s5 = inlined_call_operand.vmem [shape: bf16[1,32,32], index: 5, kind: input, shape index: {}]   ;;  %s3037_s6 = inlined_call_operand.hbm [shape: f32[1,1,32], index: 6, kind: input, shape index: {}]   ;;  %s3038_s7 = inlined_call_operand.hbm [shape: bf16[1,32,32], index: 7, kind: input, shape index: {}]   ;;  %s3039_s8 = inlined_call_operand.hbm [shape: f32[1,1,32], index: 8, kind: input, shape index: {}]   ;;  %s3040_s9 = inlined_call_operand.vmem [shape: bf16[1,32,32], index: 9, kind: input, shape index: {}]   ;;  %s3041_s10 = inlined_call_operand.vmem [shape: f32[1,32], index: 10, kind: input, shape index: {}]   ;;  %s3042_s11 = inlined_call_operand.vmem [shape: f32[1,32], index: 11, kind: input, shape index: {}]   ;;  %s3043_s12 = inlined_call_operand.vmem [shape: f32[1,32], index: 12, kind: input, shape index: {}]   ;;  %s3044_s13 = inlined_call_operand.hbm [shape: bf16[1,32,64], index: 13, kind: input, shape index: {}]   ;;  %s3045_s14 = inlined_call_operand.vmem [shape: f32[1,1,64], index: 14, kind: input, shape index: {}]   ;;  %s3046_s15 = inlined_call_operand.vmem [shape: bf16[1,64,32], index: 15, kind: input, shape index: {}]   ;;  %s3047_s16 = inlined_call_operand.vmem [shape: f32[1,32], index: 16, kind: input, shape index: {}]   ;;  %s3048_s17 = inlined_call_operand.vmem [shape: f32[1,32], index: 17, kind: input, shape index: {}]   ;;  %s3049_s18 = inlined_call_operand.vmem [shape: f32[1,32], index: 18, kind: input, shape index: {}]   ;;  %s3050_s19 = inlined_call_operand.hbm [shape: f32[2,8,32], index: 19, kind: output, shape index: {}]  }
   0x1   :  { %3065 = sst [smem:[#allocation30_spill]] %s3031_s0 }
   0x2   :  { %3066 = sst [smem:[#allocation31_spill]] %s3032_s1 }
   0x3   :  { %3067 = sst [smem:[#allocation32_spill]] %s3033_s2 }
   0x4   :  { %3068 = sst [smem:[#allocation33_spill]] %s3034_s3 }
   0x5   :  { %3069 = sst [smem:[#allocation34_spill]] %s3035_s4 }
   0x6   :  { %3070 = sst [smem:[#allocation35_spill]] %s3049_s18 }
   0x7   :  { %3071 = sst [smem:[#allocation36_spill]] %s3050_s19 }
   0x8   :  { %24 = vsyncpa [#allocation6], 0 }
   0x9   :  { %25 = vsyncpa [#allocation9], 0 }
   0xa   :  { %26 = vsyncpa [#allocation12], 0 }
   0xb   :  { %27 = vsyncpa [#allocation15], 0 }
   0xc   :  { %28 = vsyncpa [#allocation7], 0 }
   0xd   :  { %30 = vsyncpa [#allocation7 + $0x1], 0  ;;  %s2682_s0 = smov 0   ;;  %s2684_s30 = smov 0  }
   0xe   :  { %s2686_s20 = smov 0   ;;  %s2688_s21 = smov 0  }
   0xf   :  { %s2690_s1 = smov 0   ;;  %s2692_s22 = smov 0  }
  0x10 LB: > { %3072 = sst [smem:[#allocation23_spill]] %s2542_s0  ;;  %s1901_s2 = sadd.s32 4294967295, %s2562_s22   ;;  %s2562_s22 = sphi %s2692_s22, %s36_s22   ;;  %s2558_s1 = sphi %s2690_s1, %s3103_s1   ;;  %s2554_s21 = sphi %s2688_s21, %s3106_s21   ;;  %s2550_s20 = sphi %s2686_s20, %s3101_s20   ;;  %s2546_s30 = sphi %s2684_s30, %s3105_s30   ;;  %s2542_s0 = sphi %s2682_s0, %s3104_s0  }
  0x11   : > { %3073 = sst [smem:[#allocation24_spill]] %s2550_s20  ;;  %s1902_s23 = sadd.s32 4294967294, %s2562_s22  }
  0x12   : > { %3074 = sst [smem:[#allocation25_spill]] %s2558_s1  ;;  %s48_s24 = sadd.s32 1, %s2558_s1 }
  0x13   : > { %3075 = sst [smem:[#allocation26_spill]] %s2562_s22  ;;  %s461_s25 = sadd.s32 1, %s2550_s20 }
  0x14   : > { %p50_p0 = scmp.ge.s32.totalorder %s48_s24, 2  ;;  %p471_p1 = scmp.ne.s32.totalorder %s2550_s20, %s2546_s30 }
  0x15   : > { %p472_p2 = scmp.eq.s32.totalorder %s1901_s2, 1  ;;  %p477_p3 = scmp.ne.s32.totalorder %s2546_s30, %s2542_s0 }
  0x16   : > { %s3108_s24 = smov (%p50_p0, %s48_s24), 0  ;;  %p478_p5 = scmp.eq.s32.totalorder %s1902_s23, 1 }
  0x17   : > { %3076 = sst [smem:[#allocation27_spill]] %s3108_s24  ;;  %p2722_p4 = por %p472_p2, %p471_p1 }
  0x18   : > { %s456_s26 = ssub.s32 %s2558_s1, %s3108_s24  ;;  %p1903_p6 = scmp.ge.s32.totalorder %s2562_s22, 1 }
  0x19   : > { %s3077_s3 = scalar_select %p2722_p4, 1, 0 }
  0x1a   : > { %p459_p7 = scmp.eq.s32.totalorder %s456_s26, 0  ;;  %p2729_p8 = por %p478_p5, %p477_p3 }
  0x1b   : > { %p485_p9 = scmp.lt.s32.totalorder %s2562_s22, 3  ;;  %p2741_p11 = scmp.eq.s32.totalorder %s1901_s2, 0 }
  0x1c   : > { %s3078_s27 = scalar_select %p2729_p8, 1, 0 }
  0x1d   : > { %s2735_s28 = scalar_select %p459_p7, %s2550_s20, %s461_s25  }
  0x1e   : > { %3079 = sst [smem:[#allocation28_spill]] %s3078_s27  ;;  %p2737_p10 = pnand %p1903_p6, %p485_p9 }
  0x1f   : > { %3080 = sst [smem:[#allocation29_spill]] %s2735_s28  ;;  %s2564_s23 = smov [#allocation8]  }
  0x20   : > { %s3081_s29 = scalar_select %p2737_p10, 1, 0 }
  0x21   : > { %s3082_s0 = scalar_select %p2741_p11, 1, 0 }
  0x22   : > { %p2140_p12 = pneg %p2737_p10  ;;  %s509_s26 = sshll.u32 %s2564_s23, 4  ;;  %s510_s26 = int_to_ptr.vmem [resolvable:$true] %s509_s26 }
  0x23   : > { %s2565_s24 = smov [#allocation11]   ;;  %s2566_s28 = smov [#allocation14]  }
  0x24   : > { %s537_s1 = sshll.u32 %s2565_s24, 4  ;;  %p2749_p13 = pnand %p2741_p11, %p2140_p12  ;;  %s538_s1 = int_to_ptr.vmem [resolvable:$true] %s537_s1 }
  0x25   : > { %s561_s2 = sshll.u32 %s2566_s28, 4  ;;  %s2299_s27 = scalar_lea.vmem %s510_s26, 16  ;;  %s562_s2 = int_to_ptr.vmem [resolvable:$true] %s561_s2 }
  0x26   : > { %p2755_p0 = pneg %p2749_p13  ;;  %p2300_p1 = scmp.ne.s32.totalorder %s510_s26, %s2299_s27 }
  0x27   : > { %s2306_s24 = scalar_lea.vmem %s510_s26, 32  ;;  %p2307_p5 = scmp.lt.s32.totalorder %s510_s26, %s510_s26 }
  0x28   : > { %p2302_p2 = pnand %p2300_p1, %p2755_p0  ;;  %p2308_p6 = scmp.lt.s32.totalorder %s2306_s24, %s2299_s27 }
  0x2a   : > { %p2303_p3 = pneg %p2302_p2  ;;  %p2309_p7 = por %p2308_p6, %p2307_p5 }
  0x2c   : > { %p2310_p9 = pnand %p2309_p7, %p2303_p3 }
  0x2e   : > { %2313 = shalt.err (!%p2310_p9)
}
  0x2f   : > { %s3085_s22 = sld [smem:[#allocation32_spill]]  ;;  %s2325_s19 = scalar_lea.vmem %s538_s1, 16 }
  0x30   : > { %p2326_p12 = scmp.ne.s32.totalorder %s538_s1, %s2325_s19  ;;  %s2332_s18 = scalar_lea.vmem %s538_s1, 32 }
  0x31   : > { %p2333_p1 = scmp.lt.s32.totalorder %s538_s1, %s538_s1  ;;  %p2334_p2 = scmp.lt.s32.totalorder %s2332_s18, %s2325_s19 }
  0x32   : > { %p2328_p8 = pnand %p2326_p12, %p2755_p0 }
  0x33   : > { %p2335_p11 = por %p2334_p2, %p2333_p1 }
  0x34   : > { %p2329_p4 = pneg %p2328_p8 }
  0x35   : > { %2146 = dma.hbm_to_vmem [thread:$0]  (!%p2749_p13), %s3085_s22, 16, %s510_s26, [#allocation9]  }
  0x36   : > { %p2336_p10 = pnand %p2335_p11, %p2329_p4 }
  0x38   : > { %2339 = shalt.err (!%p2336_p10)
}
  0x39   : > { %2152 = dma.hbm_to_vmem [thread:$0]  (!%p2749_p13), %s3037_s6, 16, %s538_s1, [#allocation12]  }
  0x3a   : > { %s2351_s22 = scalar_lea.vmem %s562_s2, 16  ;;  %s2358_s26 = scalar_lea.vmem %s562_s2, 32 }
  0x3b   : > { %p2352_p3 = scmp.ne.s32.totalorder %s562_s2, %s2351_s22  ;;  %p2359_p8 = scmp.lt.s32.totalorder %s562_s2, %s562_s2 }
  0x3c   : > { %p2360_p7 = scmp.lt.s32.totalorder %s2358_s26, %s2351_s22 }
  0x3d   : > { %p2354_p5 = pnand %p2352_p3, %p2755_p0 }
  0x3e   : > { %p2361_p9 = por %p2360_p7, %p2359_p8 }
  0x3f   : > { %p2355_p6 = pneg %p2354_p5 }
  0x41   : > { %p2362_p12 = pnand %p2361_p9, %p2355_p6 }
  0x43   : > { %2365 = shalt.err (!%p2362_p12)
}
  0x44   : > { %2158 = dma.hbm_to_vmem [thread:$0]  (!%p2749_p13), %s3039_s8, 16, %s562_s2, [#allocation15]  }
  0x45   : > { %s2567_s1 = smov [#allocation5]   ;;  %s2568_s23 = smov [#allocation10]  }
  0x46   : > { %s498_s28 = sshll.u32 %s2567_s1, 4  ;;  %s523_s27 = sshll.u32 %s2568_s23, 4  ;;  %s499_s28 = int_to_ptr.vmem [resolvable:$true] %s498_s28  ;;  %s524_s27 = int_to_ptr.vmem [resolvable:$true] %s523_s27 }
  0x47   : > { %s2377_s24 = scalar_lea.vmem %s499_s28, 16  ;;  %s2384_s22 = scalar_lea.vmem %s499_s28, 32 }
  0x48   : > { %p2378_p4 = scmp.ne.s32.totalorder %s499_s28, %s2377_s24  ;;  %p2385_p1 = scmp.lt.s32.totalorder %s499_s28, %s499_s28 }
  0x49   : > { %p2386_p2 = scmp.lt.s32.totalorder %s2384_s22, %s2377_s24 }
  0x4a   : > { %p2380_p10 = pnand %p2378_p4, %p2755_p0 }
  0x4b   : > { %p2387_p3 = por %p2386_p2, %p2385_p1 }
  0x4c   : > { %p2381_p11 = pneg %p2380_p10 }
  0x4e   : > { %p2388_p5 = pnand %p2387_p3, %p2381_p11 }
  0x50   : > { %2391 = shalt.err (!%p2388_p5)
}
  0x51   : > { %s3086_s18 = sld [smem:[#allocation31_spill]]  ;;  %s2403_s19 = scalar_lea.vmem %s524_s27, 16 }
  0x52   : > { %p2404_p6 = scmp.ne.s32.totalorder %s524_s27, %s2403_s19  ;;  %s2410_s1 = scalar_lea.vmem %s524_s27, 32 }
  0x53   : > { %p2411_p9 = scmp.lt.s32.totalorder %s524_s27, %s524_s27  ;;  %p2412_p12 = scmp.lt.s32.totalorder %s2410_s1, %s2403_s19 }
  0x54   : > { %p2406_p8 = pnand %p2404_p6, %p2755_p0 }
  0x55   : > { %p2413_p4 = por %p2412_p12, %p2411_p9 }
  0x56   : > { %p2407_p7 = pneg %p2406_p8 }
  0x57   : > { %2143 = dma.hbm_to_vmem [thread:$0]  (!%p2749_p13), %s3086_s18, 16, %s499_s28, [#allocation6]  }
  0x58   : > { %p2414_p10 = pnand %p2413_p4, %p2407_p7 }
  0x5a   : > { %2417 = shalt.err (!%p2414_p10)
}
  0x5b   : > { %s3087_s4 = sld [smem:[#allocation34_spill]]  ;;  %s2569_s22 = smov [#allocation13]  }
  0x5c   : > { %s547_s28 = sshll.u32 %s2569_s22, 4  ;;  %s548_s28 = int_to_ptr.vmem [resolvable:$true] %s547_s28 }
  0x5d   : > { %s2429_s2 = scalar_lea.vmem %s548_s28, 256  ;;  %p2437_p3 = scmp.lt.s32.totalorder %s548_s28, %s548_s28 }
  0x5e   : > { %p2430_p11 = scmp.ne.s32.totalorder %s548_s28, %s2429_s2  ;;  %p2438_p5 = scmp.lt.s32.totalorder %s2429_s2, %s2429_s2 }
  0x60   : > { %p2432_p1 = pnand %p2430_p11, %p2755_p0  ;;  %p2439_p6 = por %p2438_p5, %p2437_p3 }
  0x61   : > { %2149 = dma.hbm_to_vmem [thread:$0]  (!%p2749_p13), %s3087_s4, 16, %s524_s27, [#allocation9]  }
  0x62   : > { %p2433_p2 = pneg %p2432_p1 }
  0x64   : > { %p2440_p8 = pnand %p2439_p6, %p2433_p2 }
  0x66   : > { %2443 = shalt.err (!%p2440_p8)
}
  0x67   : > { %s2570_s26 = smov 64   ;;  %s2571_s18 = smov 4  }
  0x68   : > { %2155 = dma.hbm_to_vmem [thread:$0]  (!%p2749_p13), %s3038_s7, 256, %s548_s28, [#allocation12], %s2570_s26, %s2570_s26, %s2571_s18  }
  0x69   : > { %s2572_s1 = smov [#allocation16]  }
  0x6a   : > { %s583_s23 = sshll.u32 %s2572_s1, 4  ;;  %s584_s23 = int_to_ptr.vmem [resolvable:$true] %s583_s23 }
  0x6b   : > { %s2455_s24 = scalar_lea.vmem %s584_s23, 256  ;;  %p2463_p4 = scmp.lt.s32.totalorder %s584_s23, %s584_s23 }
  0x6c   : > { %p2456_p7 = scmp.ne.s32.totalorder %s584_s23, %s2455_s24  ;;  %p2464_p10 = scmp.lt.s32.totalorder %s2455_s24, %s2455_s24 }
  0x6e   : > { %p2458_p9 = pnand %p2456_p7, %p2755_p0  ;;  %p2465_p11 = por %p2464_p10, %p2463_p4 }
  0x70   : > { %p2459_p12 = pneg %p2458_p9 }
  0x72   : > { %p2466_p1 = pnand %p2465_p11, %p2459_p12 }
  0x74   : > { %2469 = shalt.err (!%p2466_p1)
}
  0x75   : > { %2161 = dma.hbm_to_vmem [thread:$0]  (!%p2749_p13), %s3044_s13, 256, %s584_s23, [#allocation15], %s2570_s26, %s2570_s26, %s2571_s18  }
  0x76   : > { %p3088_p2 = scmp.ne.s32.totalorder %s3081_s29, 0 }
  0x77   : > { %p3089_p3 = scmp.ne.s32.totalorder (!%p3088_p2), %s3082_s0, 0 }
  0x78   : > { %621 = sbr.rel (%p3088_p2) target bundleno = 2302 (0x8fe), region = 96 }
  0x7d   : > { %2521 = dma.done.wait (%p3089_p3), [#allocation6], 16  }
  0x7e   : > { %2523 = vsyncadd (%p3089_p3), [#allocation6], 4294967280 }
  0x7f   : > { %2525 = dma.done.wait (%p3089_p3), [#allocation9], 32  }
  0x80   : > { %2527 = vsyncadd (%p3089_p3), [#allocation9], 4294967264 }
  0x81   : > { %2529 = dma.done.wait (%p3089_p3), [#allocation12], 272  }
  0x82   : > { %2531 = vsyncadd (%p3089_p3), [#allocation12], 4294967024 }
  0x83   : > { %2533 = dma.done.wait (%p3089_p3), [#allocation15], 272  }
  0x84   : > { %2535 = vsyncadd (%p3089_p3), [#allocation15], 4294967024  ;;  %p700_p13 = scmp.lt.s32.totalorder %s2554_s21, 1  ;;  %s3090_s26 = sld [smem:[#allocation30_spill]]  ;;  %vm712_vm0 = vcmask 261120   ;;  %v2246_v4 = vld [vmem:[%s3036_s5 + $0x8] sm:$0xff]  }
  0x85   : > { %v2247_v5 = vld [vmem:[#allocation13 + $0x8] sm:$0xff]   ;;  %v2573_v6 = vmov 0.0   ;;  %v2249_v8 = vld [vmem:[#allocation13] sm:$0xff]   ;;  %vm2574_vm1 = vmmov 0   ;;  %v1972_v26 = vld [vmem:[#allocation5] ss:$0 sm:$0xff] }
  0x86   : > { %s701_s20 = scalar_select %p700_p13, %s2554_s21, 1  ;;  %2010 = vmatprep.subr.bf16.mxu0 %v2573_v6  ;;  %2018 = vmatprep.subr.bf16.mxu1 %v2573_v6  ;;  %v2248_v7 = vld [vmem:[%s3036_s5] sm:$0xff]   ;;  %v1973_v29 = vld [vmem:[#allocation8] ss:$0 sm:$0xff]  ;;  %v1922_v39 = vld [vmem:[#allocation11] ss:$0 sm:$0xff] }
  0x87   : > { %2011 = vmatpush3.bf16.msra.mxu0 %v2246_v4  ;;  %2019 = vmatpush3.bf16.msra.mxu1 %v2247_v5  ;;  %s3091_s22 = sld [smem:[#allocation33_spill]]  ;;  %v1926_v40 = vld [vmem:[#allocation14] ss:$0 sm:$0xff]  ;;  %vm811_vm2 = vcmask 257024   ;;  %v1930_v53 = vld [vmem:[#allocation10] ss:$0 sm:$0xff] }
  0x88   : > { %s1921_s29 = sshll.u32 %s701_s20, 3  ;;  %2012 = vmatprep.subr.bf16.mxu0 %v2573_v6  ;;  %2020 = vmatprep.subr.bf16.mxu1 %v2573_v6  ;;  %vm982_vm3 = vcmask 64512   ;;  %vm1042_vm4 = vcmask 1043456   ;;  %s2575_s25 = smov 120   ;;  %vm1089_vm5 = vcmask 60416   ;;  %vm1215_vm6 = vcmask 126016  }
  0x89   : > { %2014 = vmatprep.mubr.msk.bf16.mxu0 %vm2574_vm1, %v2573_v6  ;;  %2022 = vmatprep.mubr.msk.bf16.mxu1 %vm2574_vm1, %v2573_v6  ;;  %s2576_s28 = smov 112   ;;  %s2579_s23 = smov 16   ;;  %vm1334_vm7 = vcmask 191616   ;;  %vm1453_vm8 = vcmask 257216   ;;  %vm1670_vm9 = vcmask 523264  }
  0x8a   : > { %s703_s18 = scalar_lea.vmem %s3090_s26, %s1921_s29  ;;  %s2577_s26 = smov 104  }
  0x8b   : > { %v2831_v0 = vld [vmem:[%s703_s18] sm:$0xff]  ;;  %2013 = vmatpush3.bf16.msra.mxu0 %v2248_v7  ;;  %2021 = vmatpush3.bf16.msra.mxu1 %v2249_v8  ;;  %s2578_s18 = smov 8   ;;  %s2580_s24 = smov 24  }
  0x8c   : > { %v882_v1 = vsel %vm712_vm0, %v2831_v0, 0.0  ;;  %v887_v2 = vmul.f32 %v2831_v0, %v2831_v0  ;;  %2026 = vmatprep.subr.bf16.mxu0 %v2573_v6  ;;  %2034 = vmatprep.subr.bf16.mxu1 %v2573_v6  ;;  %p3095_p5 = scmp.ne.s32.totalorder %s3077_s3, 0  ;;  %s2581_s19 = smov [#allocation17]  }
  0x8d   : > { %883 = vadd.xlane.f32.xlu1 %v882_v1  ;;  %714 = vadd.xlane.f32.xlu0 %v882_v1  ;;  %s3092_s2 = smov %s3091_s22  ;;  %v2250_v33 = vld [vmem:[%s3091_s22 + $0x8] sm:$0xff]   ;;  %s2474_s27 = sshll.u32 %s2581_s19, 4  ;;  %s2475_s27 = int_to_ptr.vmem [resolvable:$false] %s2474_s27 }
  0x8e   : > { %v888_v3 = vsel %vm712_vm0, %v887_v2, 0.0  ;;  %v2251_v36 = vld [vmem:[%s3092_s2] sm:$0xff]  }
  0x91   : > { %889 = vadd.xlane.f32.xlu1 %v888_v3  ;;  %720 = vadd.xlane.f32.xlu0 %v888_v3 }
 0x116   : > { %v884_v9 = vpop.xlane.xlu1 %883  ;;  %v715_v10 = vpop.xlane.xlu0 %714 }
 0x117   : > { %v886_v11 = vmul.f32 0.03125, %v884_v9  ;;  %v717_v12 = vmul.f32 0.03125, %v715_v10 }
 0x119   : > { %v892_v13 = vmul.f32 %v886_v11, %v886_v11  ;;  %v723_v16 = vmul.f32 %v717_v12, %v717_v12  ;;  %v725_v24 = vsub.f32 %v2831_v0, %v717_v12  ;;  %v894_v27 = vsub.f32 %v2831_v0, %v886_v11 }
 0x11a   : > { %v890_v14 = vpop.xlane.xlu1 %889  ;;  %v721_v15 = vpop.xlane.xlu0 %720 }
 0x11b   : > { %v891_v17 = vmul.f32 0.03125, %v890_v14  ;;  %v722_v18 = vmul.f32 0.03125, %v721_v15 }
 0x11d   : > { %v893_v19 = vsub.f32 %v891_v17, %v892_v13  ;;  %v724_v20 = vsub.f32 %v722_v18, %v723_v16 }
 0x11f   : > { %v895_v21 = vadd.f32 1e-05, %v893_v19  ;;  %v726_v22 = vadd.f32 1e-05, %v724_v20 }
 0x121   : > { %2262 = vrsqrt.f32 %v895_v21 }
 0x122   : > { %2264 = vrsqrt.f32 %v726_v22 }
 0x12e   : > { %v2263_v23 = vpop.eup %2262 }
 0x12f   : > { %v2265_v25 = vpop.eup %2264  ;;  %v897_v31 = vmul.f32 %v2263_v23, %v894_v27 }
 0x130   : > { %v728_v28 = vmul.f32 %v2265_v25, %v725_v24 }
 0x131   : > { %v904_v35 = vmul.f32 %v1972_v26, %v897_v31 }
 0x132   : > { %v735_v30 = vmul.f32 %v1972_v26, %v728_v28 }
 0x133   : > { %v911_v37 = vadd.f32 %v1973_v29, %v904_v35 }
 0x134   : > { %v742_v32 = vadd.f32 %v1973_v29, %v735_v30 }
 0x135   : > { %v912_v38 = vpack.c.bf16 %v911_v37, %v911_v37 }
 0x136   : > { %v743_v34 = vpack.c.bf16 %v742_v32, %v742_v32 }
 0x138   : > { %2015 = vmatmul.mubr.msk.bf16.vlgmr.msra.gmra.mxu0 %vm712_vm0, %v743_v34  ;;  %2023 = vmatmul.mubr.msk.bf16.vlgmr.msra.gmra.mxu1 %vm712_vm0, %v743_v34 }
 0x139   : > { %2027 = vmatpush3.bf16.msra.mxu0 %v2250_v33  ;;  %2030 = vmatprep.mubr.msk.bf16.mxu0 %vm2574_vm1, %v2573_v6 }
 0x13a   : > { %2028 = vmatprep.subr.bf16.mxu0 %v2573_v6  ;;  %2036 = vmatprep.mubr.msk.bf16.mxu1 %vm2574_vm1, %v2573_v6 }
 0x13d   : > { %2029 = vmatpush3.bf16.msra.mxu0 %v2251_v36 }
 0x13e   : > { %2040 = vmatprep.subr.bf16.mxu0 %v2573_v6 }
 0x140   : > { %2031 = vmatmul.mubr.msk.bf16.vlgmr.msra.gmra.mxu0 %vm712_vm0, %v912_v38 }
 0x141   : > { %2042 = vmatprep.mubr.msk.bf16.mxu0 %vm2574_vm1, %v2573_v6 }
 0x1f8   : > { %v804_v41 = vpop.f32.mrf.mxu0  ;;  %v870_v42 = vpop.f32.mrf.mxu1 }
 0x1f9   : > { %v805_v43 = vadd.f32 %v1922_v39, %v804_v41  ;;  %v871_v44 = vadd.f32 %v1926_v40, %v870_v42 }
 0x1fa   : > { %v2016_v45 = vpop.f32.mrf.mxu0  ;;  %v2024_v46 = vpop.f32.mrf.mxu1 }
 0x1fb   : > { %v810_v47 = vpack.c.bf16 %v805_v43, %v805_v43  ;;  %v876_v48 = vpack.c.bf16 %v871_v44, %v871_v44 }
 0x1fc   : > { %v807_v49 = vpop.f32.mrf.mxu0  ;;  %v873_v50 = vpop.f32.mrf.mxu1 }
 0x1fd   : > { %812 = vst.msk [vmem:[#allocation2] sm:$0xf] %vm811_vm2, %v810_v47  ;;  %877 = vst.msk [vmem:[#allocation3] sm:$0xf] %vm811_vm2, %v876_v48 }
 0x1fe   : > { %v2017_v51 = vpop.f32.mrf.mxu0  ;;  %v2025_v52 = vpop.f32.mrf.mxu1 }
 0x200   : > { %v973_v54 = vpop.f32.mrf.mxu0 }
 0x201   : > { %v974_v55 = vadd.f32 %v1930_v53, %v973_v54 }
 0x202   : > { %v2032_v56 = vpop.f32.mrf.mxu0 }
 0x203   : > { %v979_v57 = vpack.c.bf16 %v974_v55, %v974_v55 }
 0x204   : > { %v976_v58 = vpop.f32.mrf.mxu0  ;;  %v980_v59 = vld [vmem:[#allocation2] sm:$0xf]  ;;  %v981_v60 = vld [vmem:[#allocation3] sm:$0xf] }
 0x205   : > { %1092 = vrot.lane.b32.xlu1 %v979_v57, %s2575_s25  ;;  %v987_v61 = vsel %vm982_vm3, %v980_v59, 0  ;;  %v1044_v62 = vsel %vm1042_vm4, %v981_v60, 0  ;;  %v1936_v63 = vcombine.low %v980_v59, %v980_v59  ;;  %v1938_v29 = vcombine.low %v981_v60, %v981_v60 }
 0x206   : > { %v2033_v1 = vpop.f32.mrf.mxu0  ;;  %2035 = vmatpush3.bf16.xpose.msra.mxu1 %v987_v61  ;;  %2041 = vmatpush3.bf16.msra.mxu0 %v1044_v62 }
 0x207   : > { %1097 = vrot.lane.b32.xlu0 %v1936_v63, %s2575_s25  ;;  %2046 = vmatprep.subr.bf16.mxu1 %v2573_v6 }
 0x208   : > { %2052 = vmatprep.subr.bf16.mxu0 %v2573_v6 }
 0x209   : > { %1219 = vrot.lane.b32.xlu1 %v1936_v63, %s2576_s28 }
 0x20b   : > { %1338 = vrot.lane.b32.xlu0 %v1936_v63, %s2577_s26 }
 0x20d   : > { %1217 = vrot.lane.b32.xlu1 %v979_v57, %s2576_s28  ;;  %2037 = vmatmul.mubr.msk.bf16.vlgmr.msra.gmra.mxu1 %vm982_vm3, %v979_v57 }
 0x20e   : > { %2048 = vmatprep.mubr.msk.bf16.mxu1 %vm2574_vm1, %v2573_v6 }
 0x211   : > { %1336 = vrot.lane.b32.xlu1 %v979_v57, %s2577_s26 }
 0x277   : > { %v1093_v2 = vpop.permute.xlu1 %1092 }
 0x279   : > { %v1098_v3 = vpop.permute.xlu0 %1097 }
 0x27a   : > { %v1103_v4 = vsel %vm982_vm3, %v1098_v3, 0 }
 0x27b   : > { %2047 = vmatpush3.bf16.xpose.msra.mxu1 %v1103_v4  ;;  %v1220_v5 = vpop.permute.xlu1 %1219 }
 0x27c   : > { %2058 = vmatprep.subr.bf16.mxu1 %v2573_v6  ;;  %v1225_v7 = vsel %vm982_vm3, %v1220_v5, 0 }
 0x27d   : > { %v1339_v8 = vpop.permute.xlu0 %1338 }
 0x27e   : > { %v1344_v10 = vsel %vm982_vm3, %v1339_v8, 0 }
 0x27f   : > { %v1218_v9 = vpop.permute.xlu1 %1217 }
 0x282   : > { %2049 = vmatmul.mubr.msk.bf16.vlgmr.msra.gmra.mxu1 %vm982_vm3, %v1093_v2 }
 0x283   : > { %2059 = vmatpush3.bf16.xpose.msra.mxu1 %v1225_v7  ;;  %2060 = vmatprep.mubr.msk.bf16.mxu1 %vm2574_vm1, %v2573_v6  ;;  %v1337_v11 = vpop.permute.xlu1 %1336 }
 0x284   : > { %2070 = vmatprep.subr.bf16.mxu1 %v2573_v6 }
 0x28a   : > { %2061 = vmatmul.mubr.msk.bf16.vlgmr.msra.gmra.mxu1 %vm982_vm3, %v1218_v9 }
 0x28b   : > { %2071 = vmatpush3.bf16.xpose.msra.mxu1 %v1344_v10  ;;  %2072 = vmatprep.mubr.msk.bf16.mxu1 %vm2574_vm1, %v2573_v6 }
 0x28c   : > { %2082 = vmatprep.subr.bf16.mxu1 %v2573_v6 }
 0x292   : > { %2073 = vmatmul.mubr.msk.bf16.vlgmr.msra.gmra.mxu1 %vm982_vm3, %v1337_v11 }
 0x293   : > { %2086 = vmatprep.mubr.msk.bf16.mxu1 %vm2574_vm1, %v2573_v6 }
 0x2cd   : > { %v1023_v12 = vpop.f32.mrf.mxu1 }
 0x2ce   : > { %v1029_v13 = vsel %vm982_vm3, %v1023_v12, -inf }
 0x2cf   : > { %1030 = vmax.xlane.f32.xlu0 %v1029_v13  ;;  %v2038_v14 = vpop.f32.mrf.mxu1 }
 0x2d1   : > { %v1026_v15 = vpop.f32.mrf.mxu1 }
 0x2d3   : > { %v2039_v16 = vpop.f32.mrf.mxu1 }
 0x342   : > { %v1139_v17 = vpop.f32.mrf.mxu1 }
 0x343   : > { %v1145_v18 = vsel %vm982_vm3, %v1139_v17, -inf }
 0x344   : > { %1146 = vmax.xlane.f32.xlu1 %v1145_v18  ;;  %v2050_v19 = vpop.f32.mrf.mxu1 }
 0x346   : > { %v1142_v20 = vpop.f32.mrf.mxu1 }
 0x348   : > { %v2051_v21 = vpop.f32.mrf.mxu1 }
 0x349   : > { %v2254_v21 = vld [vmem:[%s3040_s9 + $0x8] sm:$0xff]  }
 0x34a   : > { %v1261_v22 = vpop.f32.mrf.mxu1  ;;  %2083 = vmatpush3.bf16.msra.mxu1 %v2254_v21 }
 0x34b   : > { %v1267_v23 = vsel %vm982_vm3, %v1261_v22, -inf  ;;  %2084 = vmatprep.subr.bf16.mxu1 %v2573_v6 }
 0x34c   : > { %1268 = vmax.xlane.f32.xlu0 %v1267_v23  ;;  %v2062_v24 = vpop.f32.mrf.mxu1 }
 0x34d   : > { %v2255_v24 = vld [vmem:[%s3040_s9] sm:$0xff]  }
 0x34e   : > { %v1264_v25 = vpop.f32.mrf.mxu1  ;;  %2085 = vmatpush3.bf16.msra.mxu1 %v2255_v24 }
 0x34f   : > { %2098 = vmatprep.subr.bf16.mxu1 %v2573_v6 }
 0x350   : > { %v2063_v26 = vpop.f32.mrf.mxu1 }
 0x352   : > { %v1380_v27 = vpop.f32.mrf.mxu1 }
 0x353   : > { %v1386_v28 = vsel %vm982_vm3, %v1380_v27, -inf }
 0x354   : > { %1387 = vmax.xlane.f32.xlu0 %v1386_v28  ;;  %v2074_v30 = vpop.f32.mrf.mxu1 }
 0x355   : > { %1277 = vrot.lane.b32.xlu1 %v1938_v29, %s2576_s28  ;;  %s3094_s28 = sld [smem:[#allocation36_spill]] }
 0x356   : > { %v1383_v31 = vpop.f32.mrf.mxu1 }
 0x358   : > { %v1031_v32 = vpop.xlane.xlu0 %1030  ;;  %v2075_v33 = vpop.f32.mrf.mxu1 }
 0x359   : > { %v1032_v34 = vsub.f32 %v1023_v12, %v1031_v32  ;;  %1396 = vrot.lane.b32.xlu1 %v1938_v29, %s2577_s26  ;;  %s697_s26 = sand.u32 1, %s2546_s30  }
 0x35a   : > { %s1748_s4 = scalar_lea.sflag [#allocation7], %s697_s26 }
 0x35b   : > { %v1033_v35 = vmul.f32 1.442695, %v1032_v34 }
 0x35d   : > { %2266 = vpow2.f32 %v1033_v35 }
 0x36a   : > { %v2267_v36 = vpop.eup %2266  ;;  %1158 = vrot.lane.b32.xlu0 %v1938_v29, %s2575_s25 }
 0x36b   : > { %v1038_v37 = vpack.c.bf16 %v2267_v36, %v2267_v36  ;;  %v1035_v61 = vsel %vm982_vm3, %v2267_v36, 0.0 }
 0x36d   : > { %2043 = vmatmul.mubr.msk.bf16.vlgmr.msra.gmra.mxu0 %vm982_vm3, %v1038_v37 }
 0x36e   : > { %2054 = vmatprep.mubr.msk.bf16.mxu0 %vm2574_vm1, %v2573_v6 }
 0x3cd   : > { %v1147_v38 = vpop.xlane.xlu1 %1146 }
 0x3ce   : > { %v1148_v39 = vsub.f32 %v1139_v17, %v1147_v38 }
 0x3d0   : > { %v1149_v40 = vmul.f32 1.442695, %v1148_v39  ;;  %v1947_v39 = vld [vmem:[%s3041_s10] ss:$0 sm:$0xff] }
 0x3d1   : > { %v1278_v51 = vpop.permute.xlu1 %1277 }
 0x3d2   : > { %2268 = vpow2.f32 %v1149_v40  ;;  %v1283_v53 = vsel %vm1042_vm4, %v1278_v51, 0 }
 0x3d5   : > { %v1269_v41 = vpop.xlane.xlu0 %1268  ;;  %v1397_v56 = vpop.permute.xlu1 %1396 }
 0x3d6   : > { %v1270_v42 = vsub.f32 %v1261_v22, %v1269_v41  ;;  %v1402_v58 = vsel %vm1042_vm4, %v1397_v56, 0 }
 0x3d8   : > { %v1271_v43 = vmul.f32 1.442695, %v1270_v42 }
 0x3da   : > { %2270 = vpow2.f32 %v1271_v43 }
 0x3dd   : > { %v1388_v44 = vpop.xlane.xlu0 %1387 }
 0x3de   : > { %v1389_v45 = vsub.f32 %v1380_v27, %v1388_v44 }
 0x3df   : > { %v2269_v46 = vpop.eup %2268 }
 0x3e0   : > { %v1390_v47 = vmul.f32 1.442695, %v1389_v45  ;;  %v1151_v48 = vsel %vm982_vm3, %v2269_v46, 0.0  ;;  %v1154_v52 = vpack.c.bf16 %v2269_v46, %v2269_v46 }
 0x3e1   : > { %1152 = vadd.xlane.f32.xlu1 %v1151_v48  ;;  %v1159_v49 = vpop.permute.xlu0 %1158 }
 0x3e2   : > { %2272 = vpow2.f32 %v1390_v47  ;;  %v1164_v50 = vsel %vm1042_vm4, %v1159_v49, 0  ;;  %v2256_v49 = vld [vmem:[#allocation16 + $0x8] sm:$0xff]  }
 0x3e3   : > { %2053 = vmatpush3.bf16.msra.mxu0 %v1164_v50  ;;  %v2257_v50 = vld [vmem:[#allocation16] sm:$0xff]  }
 0x3e4   : > { %2064 = vmatprep.subr.bf16.mxu0 %v2573_v6 }
 0x3e6   : > { %2055 = vmatmul.mubr.msk.bf16.vlgmr.msra.gmra.mxu0 %vm982_vm3, %v1154_v52 }
 0x3e7   : > { %v2271_v54 = vpop.eup %2270  ;;  %2065 = vmatpush3.bf16.msra.mxu0 %v1283_v53  ;;  %2066 = vmatprep.mubr.msk.bf16.mxu0 %vm2574_vm1, %v2573_v6 }
 0x3e8   : > { %v1273_v55 = vsel %vm982_vm3, %v2271_v54, 0.0  ;;  %2076 = vmatprep.subr.bf16.mxu0 %v2573_v6  ;;  %v1276_v57 = vpack.c.bf16 %v2271_v54, %v2271_v54 }
 0x3e9   : > { %1274 = vadd.xlane.f32.xlu0 %v1273_v55 }
 0x3ee   : > { %2067 = vmatmul.mubr.msk.bf16.vlgmr.msra.gmra.mxu0 %vm982_vm3, %v1276_v57 }
 0x3ef   : > { %v2273_v59 = vpop.eup %2272  ;;  %2077 = vmatpush3.bf16.msra.mxu0 %v1402_v58  ;;  %2078 = vmatprep.mubr.msk.bf16.mxu0 %vm2574_vm1, %v2573_v6 }
 0x3f0   : > { %v1392_v60 = vsel %vm982_vm3, %v2273_v59, 0.0  ;;  %2090 = vmatprep.subr.bf16.mxu0 %v2573_v6  ;;  %v1395_v62 = vpack.c.bf16 %v2273_v59, %v2273_v59  ;;  %v1951_v59 = vld [vmem:[%s3042_s11] ss:$0 sm:$0xff] }
 0x3f1   : > { %1393 = vadd.xlane.f32.xlu0 %v1392_v60 }
 0x3f5   : > { %1036 = vadd.xlane.f32.xlu0 %v1035_v61  ;;  %v1952_v61 = vld [vmem:[%s3043_s12] ss:$0 sm:$0xff] }
 0x3f6   : > { %2079 = vmatmul.mubr.msk.bf16.vlgmr.msra.gmra.mxu0 %vm982_vm3, %v1395_v62 }
 0x3f7   : > { %2094 = vmatprep.mubr.msk.bf16.mxu0 %vm2574_vm1, %v2573_v6  ;;  %2091 = vmatpush3.bf16.msra.mxu0 %v2256_v49 }
 0x3f8   : > { %2092 = vmatprep.subr.bf16.mxu0 %v2573_v6 }
 0x3fb   : > { %2093 = vmatpush3.bf16.msra.mxu0 %v2257_v50 }
 0x42d   : > { %v1080_v63 = vpop.f32.mrf.mxu0 }
 0x42f   : > { %v2044_v1 = vpop.f32.mrf.mxu0 }
 0x431   : > { %v1083_v2 = vpop.f32.mrf.mxu0 }
 0x432   : > { %v2258_v2 = vld [vmem:[%s3046_s15 + $0x18] sm:$0xff]  }
 0x433   : > { %v2045_v3 = vpop.f32.mrf.mxu0 }
 0x434   : > { %v2259_v3 = vld [vmem:[%s3046_s15 + $0x10] sm:$0xff]  }
 0x46a   : > { %v1153_v11 = vpop.xlane.xlu1 %1152 }
 0x472   : > { %v1275_v4 = vpop.xlane.xlu0 %1274 }
 0x47a   : > { %v1394_v5 = vpop.xlane.xlu0 %1393 }
 0x47e   : > { %v1037_v7 = vpop.xlane.xlu0 %1036 }
 0x47f   : > { %2274 = vrcp.f32 %v1037_v7  ;;  %v1953_v7 = vld [vmem:[%s3045_s14] ss:$0 sm:$0xff] }
 0x480   : > { %2276 = vrcp.f32 %v1153_v11 }
 0x481   : > { %2278 = vrcp.f32 %v1275_v4  ;;  %v2260_v4 = vld [vmem:[%s3046_s15 + $0x8] sm:$0xff]  }
 0x482   : > { %2280 = vrcp.f32 %v1394_v5  ;;  %v2261_v5 = vld [vmem:[%s3046_s15] sm:$0xff]  }
 0x48c   : > { %v2275_v8 = vpop.eup %2274 }
 0x48d   : > { %v1087_v9 = vmul.f32 %v2275_v8, %v1080_v63  ;;  %v2277_v12 = vpop.eup %2276 }
 0x48e   : > { %v2279_v19 = vpop.eup %2278 }
 0x48f   : > { %v1088_v10 = vpack.c.bf16 %v1087_v9, %v1087_v9  ;;  %v2281_v28 = vpop.eup %2280 }
 0x491   : > { %1090 = vst.msk [vmem:[#allocation4] sm:$0xf] %vm1089_vm5, %v1088_v10 }
 0x4a6   : > { %v1200_v13 = vpop.f32.mrf.mxu0 }
 0x4a7   : > { %v1207_v14 = vmul.f32 %v2277_v12, %v1200_v13 }
 0x4a8   : > { %v2056_v15 = vpop.f32.mrf.mxu0 }
 0x4a9   : > { %v1969_v16 = vpack.c.bf16 %v1207_v14, %v1207_v14 }
 0x4aa   : > { %v1203_v17 = vpop.f32.mrf.mxu0 }
 0x4ab   : > { %1212 = vrot.lane.b32.xlu1 %v1969_v16, %s2578_s18  ;;  %s1920_s18 = sshll.u32 %s697_s26, 3 }
 0x4ac   : > { %v2057_v18 = vpop.f32.mrf.mxu0  ;;  %s699_s22 = scalar_lea.vmem [#allocation17], %s1920_s18 }
 0x4ad   : > { %s1762_s20 = sshll.u32 %s699_s22, 4  ;;  %s1763_s20 = int_to_ptr.vmem [resolvable:$true] %s1762_s20 }
 0x4ae   : > { %v1319_v20 = vpop.f32.mrf.mxu0  ;;  %s2470_s0 = scalar_lea.vmem %s1763_s20, 128  ;;  %p2477_p7 = scmp.lt.s32.totalorder %s1763_s20, %s2475_s27 }
 0x4af   : > { %v1326_v22 = vmul.f32 %v2279_v19, %v1319_v20  ;;  %p2471_p0 = scmp.ne.s32.totalorder %s1763_s20, %s2470_s0 }
 0x4b0   : > { %v2068_v23 = vpop.f32.mrf.mxu0 }
 0x4b1   : > { %v1970_v25 = vpack.c.bf16 %v1326_v22, %v1326_v22  ;;  %v1957_v22 = vld [vmem:[%s3047_s16] ss:$0 sm:$0xff]  ;;  %p2472_p6 = pnand %p2471_p0, %p3095_p5 }
 0x4b2   : > { %v1322_v26 = vpop.f32.mrf.mxu0 }
 0x4b3   : > { %1331 = vrot.lane.b32.xlu0 %v1970_v25, %s2579_s23  ;;  %s3093_s23 = sld [smem:[#allocation35_spill]]  ;;  %p2473_p8 = pneg %p2472_p6 }
 0x4b4   : > { %v2069_v27 = vpop.f32.mrf.mxu0 }
 0x4b6   : > { %v1438_v29 = vpop.f32.mrf.mxu0 }
 0x4b7   : > { %v1445_v30 = vmul.f32 %v2281_v28, %v1438_v29 }
 0x4b8   : > { %v2080_v31 = vpop.f32.mrf.mxu0 }
 0x4b9   : > { %v1971_v32 = vpack.c.bf16 %v1445_v30, %v1445_v30 }
 0x4ba   : > { %v1441_v33 = vpop.f32.mrf.mxu0 }
 0x4bb   : > { %1450 = vrot.lane.b32.xlu1 %v1971_v32, %s2580_s24  ;;  %s1966_s24 = sshll.u32 %s2554_s21, 7  ;;  %s2476_s21 = scalar_lea.vmem %s2475_s27, 256 }
 0x4bc   : > { %v2081_v34 = vpop.f32.mrf.mxu0  ;;  %s1760_s2 = scalar_lea.hbm %s3094_s28, %s1966_s24  ;;  %p2478_p9 = scmp.lt.s32.totalorder %s2476_s21, %s2470_s0 }
 0x4be   : > { %p2479_p12 = por %p2478_p9, %p2477_p7 }
 0x4c0   : > { %p2480_p4 = pnand %p2479_p12, %p2473_p8 }
 0x51d   : > { %v1213_v35 = vpop.permute.xlu1 %1212 }
 0x51e   : > { %1216 = vst.msk [vmem:[#allocation4] sm:$0xf] %vm1215_vm6, %v1213_v35 }
 0x525   : > { %v1332_v36 = vpop.permute.xlu0 %1331 }
 0x526   : > { %1335 = vst.msk [vmem:[#allocation4] sm:$0xf] %vm1334_vm7, %v1332_v36 }
 0x52d   : > { %v1451_v37 = vpop.permute.xlu1 %1450 }
 0x52e   : > { %1454 = vst.msk [vmem:[#allocation4] sm:$0xf] %vm1453_vm8, %v1451_v37 }
 0x535   : > { %v1455_v38 = vld [vmem:[#allocation4] sm:$0xf] }
 0x536   : > { %2087 = vmatmul.mubr.msk.bf16.vlgmr.msra.gmra.mxu1 %vm712_vm0, %v1455_v38 }
 0x537   : > { %2106 = vmatprep.mubr.msk.bf16.mxu1 %vm2574_vm1, %v2573_v6  ;;  %2099 = vmatpush3.bf16.msra.mxu1 %v2258_v2 }
 0x538   : > { %2100 = vmatprep.subr.bf16.mxu1 %v2573_v6 }
 0x53b   : > { %2101 = vmatpush3.bf16.msra.mxu1 %v2259_v3 }
 0x53c   : > { %2102 = vmatprep.subr.bf16.mxu1 %v2573_v6 }
 0x53f   : > { %2103 = vmatpush3.bf16.msra.mxu1 %v2260_v4 }
 0x540   : > { %2104 = vmatprep.subr.bf16.mxu1 %v2573_v6 }
 0x543   : > { %2105 = vmatpush3.bf16.msra.mxu1 %v2261_v5 }
 0x5f6   : > { %v1516_v40 = vpop.f32.mrf.mxu1 }
 0x5f7   : > { %v1517_v41 = vadd.f32 %v1947_v39, %v1516_v40 }
 0x5f8   : > { %v2088_v42 = vpop.f32.mrf.mxu1 }
 0x5f9   : > { %v2945_v43 = vadd.f32 %v1517_v41, %v2831_v0  ;;  %v1963_v41 = vld [vmem:[%s3048_s17] ss:$0 sm:$0xff] }
 0x5fa   : > { %v1519_v44 = vpop.f32.mrf.mxu1 }
 0x5fb   : > { %v1525_v45 = vsel %vm712_vm0, %v2945_v43, 0.0  ;;  %v1529_v46 = vmul.f32 %v2945_v43, %v2945_v43 }
 0x5fc   : > { %1526 = vadd.xlane.f32.xlu1 %v1525_v45  ;;  %v2089_v47 = vpop.f32.mrf.mxu1 }
 0x5fd   : > { %v1530_v48 = vsel %vm712_vm0, %v1529_v46, 0.0 }
 0x5fe   : > { %1531 = vadd.xlane.f32.xlu0 %v1530_v48 }
 0x685   : > { %v1527_v0 = vpop.xlane.xlu1 %1526 }
 0x686   : > { %v1528_v51 = vmul.f32 0.03125, %v1527_v0 }
 0x687   : > { %v1532_v52 = vpop.xlane.xlu0 %1531 }
 0x688   : > { %v1534_v53 = vmul.f32 %v1528_v51, %v1528_v51  ;;  %v1533_v54 = vmul.f32 0.03125, %v1532_v52  ;;  %v1536_v57 = vsub.f32 %v2945_v43, %v1528_v51 }
 0x68a   : > { %v1535_v55 = vsub.f32 %v1533_v54, %v1534_v53 }
 0x68c   : > { %v1537_v56 = vadd.f32 1e-05, %v1535_v55 }
 0x68e   : > { %2282 = vrsqrt.f32 %v1537_v56 }
 0x69b   : > { %v2283_v58 = vpop.eup %2282 }
 0x69c   : > { %v1539_v60 = vmul.f32 %v2283_v58, %v1536_v57 }
 0x69e   : > { %v1546_v62 = vmul.f32 %v1951_v59, %v1539_v60 }
 0x6a0   : > { %v1553_v63 = vadd.f32 %v1952_v61, %v1546_v62 }
 0x6a2   : > { %v1554_v1 = vpack.c.bf16 %v1553_v63, %v1553_v63 }
 0x6a4   : > { %2095 = vmatmul.mubr.msk.bf16.vlgmr.msra.gmra.mxu0 %vm712_vm0, %v1554_v1 }
 0x764   : > { %v1615_v8 = vpop.f32.mrf.mxu0 }
 0x765   : > { %v1616_v9 = vadd.f32 %v1953_v7, %v1615_v8 }
 0x766   : > { %v2096_v10 = vpop.f32.mrf.mxu0 }
 0x767   : > { %v1622_v11 = vmul.f32 0.044715, %v1616_v9  ;;  %v1621_v19 = vmul.f32 0.5, %v1616_v9 }
 0x768   : > { %v1618_v12 = vpop.f32.mrf.mxu0 }
 0x769   : > { %v1623_v13 = vmul.f32 %v1622_v11, %v1616_v9 }
 0x76a   : > { %v2097_v14 = vpop.f32.mrf.mxu0 }
 0x76b   : > { %v1624_v15 = vmul.f32 %v1623_v13, %v1616_v9 }
 0x76d   : > { %v1625_v16 = vadd.f32 %v1624_v15, %v1616_v9 }
 0x76f   : > { %v1626_v17 = vmul.f32 0.7978846, %v1625_v16 }
 0x771   : > { %2284 = vtanh.f32 %v1626_v17 }
 0x77e   : > { %v2285_v18 = vpop.eup %2284 }
 0x77f   : > { %v1628_v20 = vadd.f32 1.0, %v2285_v18 }
 0x781   : > { %v1629_v6 = vmul.f32 %v1628_v20, %v1621_v19 }
 0x783   : > { %v1630_v21 = vpack.c.bf16 %v1629_v6, %v1629_v6 }
 0x785   : > { %2107 = vmatmul.mubr.msk.bf16.vlgmr.msra.gmra.mxu1 %vm1670_vm9, %v1630_v21 }
 0x845   : > { %v1708_v23 = vpop.f32.mrf.mxu1 }
 0x846   : > { %v1709_v24 = vadd.f32 %v1957_v22, %v1708_v23 }
 0x847   : > { %v2108_v25 = vpop.f32.mrf.mxu1 }
 0x848   : > { %v1714_v26 = vadd.f32 %v1709_v24, %v2945_v43  ;;  %v1964_v43 = vld [vmem:[%s3093_s23] ss:$0 sm:$0xff] }
 0x849   : > { %v1711_v27 = vpop.f32.mrf.mxu1 }
 0x84a   : > { %v1717_v28 = vsel %vm712_vm0, %v1714_v26, 0.0  ;;  %v1721_v29 = vmul.f32 %v1714_v26, %v1714_v26 }
 0x84b   : > { %1718 = vadd.xlane.f32.xlu0 %v1717_v28  ;;  %v2109_v30 = vpop.f32.mrf.mxu1 }
 0x84c   : > { %v1722_v31 = vsel %vm712_vm0, %v1721_v29, 0.0 }
 0x84d   : > { %1723 = vadd.xlane.f32.xlu1 %v1722_v31 }
 0x8d4   : > { %v1719_v32 = vpop.xlane.xlu0 %1718 }
 0x8d5   : > { %v1720_v33 = vmul.f32 0.03125, %v1719_v32 }
 0x8d6   : > { %v1724_v34 = vpop.xlane.xlu1 %1723 }
 0x8d7   : > { %v1726_v35 = vmul.f32 %v1720_v33, %v1720_v33  ;;  %v1725_v36 = vmul.f32 0.03125, %v1724_v34  ;;  %v1728_v39 = vsub.f32 %v1714_v26, %v1720_v33 }
 0x8d9   : > { %v1727_v37 = vsub.f32 %v1725_v36, %v1726_v35 }
 0x8db   : > { %v1729_v38 = vadd.f32 1e-05, %v1727_v37 }
 0x8dd   : > { %2286 = vrsqrt.f32 %v1729_v38 }
 0x8ea   : > { %v2287_v40 = vpop.eup %2286 }
 0x8eb   : > { %v1731_v42 = vmul.f32 %v2287_v40, %v1728_v39 }
 0x8ed   : > { %v1738_v44 = vmul.f32 %v1963_v41, %v1731_v42 }
 0x8ef   : > { %v1745_v45 = vadd.f32 %v1964_v43, %v1738_v44 }
 0x8f1   : > { %1746 = vst.msk [vmem:[%s699_s22] sm:$0xff] %vm712_vm0, %v1745_v45 }
 0x8f2   : > { %2483 = shalt.err (!%p2480_p4)
}
 0x8f3   : > { %s2484_s18 = scalar_lea.hbm %s1760_s2, 128  ;;  %s2488_s23 = scalar_lea.hbm %s3094_s28, 256 }
 0x8f4   : > { %p2485_p10 = scmp.ne.s32.totalorder %s1760_s2, %s2484_s18  ;;  %p2489_p2 = scmp.lt.s32.totalorder %s1760_s2, %s3094_s28 }
 0x8f5   : > { %p2490_p3 = scmp.lt.s32.totalorder %s2488_s23, %s2484_s18 }
 0x8f6   : > { %p2486_p11 = pnand %p2485_p10, %p3095_p5 }
 0x8f7   : > { %p2491_p13 = por %p2490_p3, %p2489_p2 }
 0x8f8   : > { %p2487_p1 = pneg %p2486_p11 }
 0x8fa   : > { %p2492_p0 = pnand %p2491_p13, %p2487_p1 }
 0x8fc   : > { %2495 = shalt.err (!%p2492_p0)
}
 0x8fd   : > { %2138 = dma.vmem_to_hbm [thread:$0]  (%p3095_p5), %s1763_s20, 128, %s1760_s2, %s1748_s4  }
 0x8fe PF: > { %s3096_s29 = sld [smem:[#allocation26_spill]] }
 0x8ff   : > { %s3097_s25 = sld [smem:[#allocation23_spill]] }
 0x900   : > { %s3098_s0 = sld [smem:[#allocation28_spill]] }
 0x904   : > { %p2180_p6 = scmp.ge.s32.totalorder %s3096_s29, 2 }
 0x905   : > { %s1774_s19 = sand.u32 1, %s3097_s25  }
 0x906   : > { %p3099_p8 = scmp.ne.s32.totalorder %s3098_s0, 0  ;;  %s1775_s27 = scalar_lea.sflag [#allocation7], %s1774_s19 }
 0x908   : > { %p2163_p7 = pnand %p2180_p6, %p3099_p8 }
 0x90a   : > { %p2164_p9 = pneg %p2163_p7 }
 0x90c   : > { %2537 = dma.done.wait (%p2164_p9), %s1775_s27, 128  }
 0x90d   : > { %2539 = vsyncadd (%p2164_p9), %s1775_s27, 4294967168  ;;  %s36_s22 = sadd.s32 1, %s3096_s29   ;;  %s3100_s21 = sld [smem:[#allocation24_spill]] }
 0x90e   : > { %p33_p12 = scmp.ge.s32.totalorder %s36_s22, 4   ;;  %s3101_s20 = sld [smem:[#allocation29_spill]] }
 0x90f   : > { %s3102_s3 = sld [smem:[#allocation25_spill]]  ;;  %s3104_s0 = smov %s2546_s30 }
 0x910   : > { %s3103_s1 = sld [smem:[#allocation27_spill]] }
 0x911   :  { %35 = sbr.rel (!%p33_p12) target bundleno = 16 (0x10), region = 165 }
 0x913   : > { %s3105_s30 = smov %s3100_s21 }
 0x915   : > { %s3106_s21 = smov %s3102_s3 }
 0x916   :  { %1780 = vsyncpa [#allocation6], 1 }
 0x917   :  { %1782 = vsyncpa [#allocation6 + $0x1], 1 }
 0x918   :  { %1783 = vsyncpa [#allocation9], 1 }
 0x919   :  { %1784 = vsyncpa [#allocation12], 1 }
 0x91a   :  { %1785 = vsyncpa [#allocation15], 1 }
 0x91b   :  { %1786 = vsyncpa [#allocation7], 1 }
 0x91c   :  { %1788 = vsyncpa [#allocation7 + $0x1], 1 }

</bundles_post_ra>
